<compile_context>
chip_gen: v6e
topology: v6e:2x2x1
jax: 0.10.0
libtpu: 0.0.40
codegen_flags: <defaults>
</compile_context>

<pallas_src>
import math

import jax
import jax.numpy as jnp
from jax.experimental import pallas as pl
from jax.experimental.pallas import tpu as pltpu


# ----------------------------- parameter setup -----------------------------

def mps_chain_dims(input_dim, bond_dim):
    """Mirror MPSModalityEncoder._build_mps_chain layer shapes."""
    chain_length = max(3, min(8, int(math.log2(input_dim)) + 1))
    target = min(bond_dim, input_dim)
    dims = []
    cur = input_dim
    while cur > target and len(dims) < chain_length:
        nxt = max(target, cur // 2)
        dims.append((cur, nxt))
        cur = nxt
    if not dims:
        dims.append((input_dim, target))
    return dims, target


def _dense_init(key, din, dout, bias=True):
    kw, kb = jax.random.split(key)
    bound = 1.0 / math.sqrt(din)
    w = jax.random.uniform(kw, (din, dout), jnp.float32, -bound, bound)
    if bias:
        b = jax.random.uniform(kb, (dout,), jnp.float32, -bound, bound)
        return w, b
    return w, None


def init_encoder(key, input_dim, output_dim, bond_dim):
    dims, final_dim = mps_chain_dims(input_dim, bond_dim)
    keys = jax.random.split(key, len(dims) + 1)
    mps = [_dense_init(keys[i], a, b, bias=False)[0] for i, (a, b) in enumerate(dims)]
    proj_w, proj_b = _dense_init(keys[-1], final_dim, output_dim, bias=True)
    return dict(mps=mps, proj_w=proj_w, proj_b=proj_b,
                ln_g=jnp.ones((output_dim,), jnp.float32),
                ln_b=jnp.zeros((output_dim,), jnp.float32))


def init_model(key, cfg):
    k = jax.random.split(key, 8)
    D = cfg['unified_dim']
    params = dict(
        text_encoder=init_encoder(k[0], cfg['text_dim'], D, cfg['bond_dim']),
        image_encoder=init_encoder(k[1], cfg['image_dim'], D, cfg['bond_dim']),
        tabular_encoder=init_encoder(k[2], cfg['tabular_dim'], D, cfg['bond_dim']),
        # nn.init.eye_ on the (3,3) fusion_weights -> identity (off-diagonals 0)
        fusion_weights=jnp.eye(3, dtype=jnp.float32),
    )
    # TODO(synk): the reference TensorProductFusion builds its compression Linear with
    # in_features = prod(modality_dims) = D**3, which does not match the actual
    # 3-modality concatenated product dim (3*D*D) and would error at runtime in
    # PyTorch; we size it to the true runtime dim 3*D*D.
    comp_in = 3 * D * D
    w1, b1 = _dense_init(k[3], comp_in, 4 * D)
    w2, b2 = _dense_init(k[4], 4 * D, D)
    params['comp'] = (w1, b1, w2, b2)
    fw1, fb1 = _dense_init(k[5], D, D)
    fw2, fb2 = _dense_init(k[6], D, D)
    params['fusion_layers'] = (fw1, fb1, fw2, fb2)
    params['ln_g'] = jnp.ones((D,), jnp.float32)
    params['ln_b'] = jnp.zeros((D,), jnp.float32)
    return params


# ----------------------------- fused Pallas kernel -----------------------------

def _layernorm(x, g, b):
    mean = jnp.mean(x, axis=-1, keepdims=True)
    xc = x - mean
    var = jnp.mean(xc * xc, axis=-1, keepdims=True)
    return xc * jax.lax.rsqrt(var + 1e-5) * g + b      # PyTorch LayerNorm eps


def _l2_normalize(x):
    # F.normalize(p=2): x / max(||x||, 1e-12)  ==  x * rsqrt(max(||x||^2, 1e-24))
    ss = jnp.sum(x * x, axis=-1, keepdims=True)
    return x * jax.lax.rsqrt(jnp.maximum(ss, 1e-24))


def _bf16_dot(x, w_ref):
    # bf16 operands for the MXU, f32 accumulation.
    return jnp.dot(x.astype(jnp.bfloat16), w_ref[...],
                   preferred_element_type=jnp.float32)


def make_fused_kernel(mps_counts, D):
    """One fused kernel for the whole forward pass (one batch tile per grid step)."""
    H = 4 * D
    n_out = 4

    def kernel(fw_ref, xt_ref, xi_ref, xtab_ref, *refs):
        w_refs = list(refs[:-n_out])
        fused_out, t_out, i_out, tab_out = refs[-n_out:]

        pos = [0]

        def take(n):
            r = w_refs[pos[0]:pos[0] + n]
            pos[0] += n
            return r

        def encode(x_ref, n_mps):
            mps_ws = take(n_mps)
            proj_w, proj_b, ln_g, ln_b = take(4)
            h = x_ref[...].astype(jnp.float32)
            for w in mps_ws:                             # bias-free MPS chain + ReLU
                h = jnp.maximum(_bf16_dot(h, w), 0.0)
            h = _bf16_dot(h, proj_w) + proj_b[...]       # output_projection
            return _layernorm(h, ln_g[...], ln_b[...])   # layer_norm

        t = encode(xt_ref, mps_counts[0])
        im = encode(xi_ref, mps_counts[1])
        tb = encode(xtab_ref, mps_counts[2])
        t_out[...] = t
        i_out[...] = im
        tab_out[...] = tb

        # --- TensorProductFusion fused with the first compression GEMM ---
        # tprod[b, p*D*D + i*D + j] = s_p * a_p[b,i] * b_p[b,j]
        # z = tprod @ W1 is computed pair-by-pair:
        #   g = a_p @ W1_p_reshaped                 (W1_p_reshaped[i, j*H+o] = W1[p*D*D+i*D+j, o])
        #   z += s_p * sum_j b_p[:, j] * g[:, j*H:(j+1)*H]
        # so the (B, 3*D*D) tensor product never exists in HBM (or VMEM).
        n1, n2, n3 = _l2_normalize(t), _l2_normalize(im), _l2_normalize(tb)
        w1_parts = take(3)                                # each (D, D*H), bf16
        b1, w2, b2 = take(3)
        pairs = ((n1, n2, fw_ref[0, 1]),
                 (n1, n3, fw_ref[0, 2]),
                 (n2, n3, fw_ref[1, 2]))
        z = jnp.zeros((t.shape[0], H), jnp.float32)
        for p, (a, b, scale) in enumerate(pairs):
            g = _bf16_dot(a, w1_parts[p])                 # (bm, D*H), f32 accumulate
            bs = b * scale                                # fold pair scale once
            for j in range(D):                            # 128-lane-aligned slices of g
                z = z + bs[:, j:j + 1] * g[:, j * H:(j + 1) * H]

        h = jnp.maximum(z + b1[...], 0.0)                 # compression Linear -> ReLU
        # nn.Dropout(0.1): identity in eval mode
        fused = _bf16_dot(h, w2) + b2[...]                # compression Linear

        # --- fusion_layers: Linear -> ReLU -> Dropout(id) -> Linear; final LayerNorm ---
        fw1, fb1, fw2, fb2, g_ln, b_ln = take(6)
        x = jnp.maximum(_bf16_dot(fused, fw1) + fb1[...], 0.0)
        x = _bf16_dot(x, fw2) + fb2[...]
        fused_out[...] = _layernorm(x, g_ln[...], b_ln[...])

    return kernel


# ----------------------------- forward pass wrapper -----------------------------

def multimodal_fusion_forward(params, text, image, tabular,
                              fusion_method='tensor_product', *, bm=8):
    D = params['ln_g'].shape[0]
    H = 4 * D
    B = text.shape[0]
    n_b = pl.cdiv(B, bm)
    B_pad = n_b * bm

    def pad(x):
        x = jnp.asarray(x, jnp.float32)
        return x if x.shape[0] == B_pad else jnp.pad(x, ((0, B_pad - B), (0, 0)))

    xt, xi, xtab = pad(text), pad(image), pad(tabular)

    # Flat weight operand list (all 2-D): GEMM weights in bf16 for the MXU,
    # biases / LayerNorm params as (1, n) f32.
    weights = []

    def add_mat(w):
        weights.append(jnp.asarray(w, jnp.bfloat16))

    def add_vec(v):
        v = jnp.asarray(v, jnp.float32)
        weights.append(v.reshape(1, v.shape[-1]))

    mps_counts = []
    for enc in ('text_encoder', 'image_encoder', 'tabular_encoder'):
        p = params[enc]
        mps_counts.append(len(p['mps']))
        for w in p['mps']:
            add_mat(w)
        add_mat(p['proj_w'])
        add_vec(p['proj_b'])
        add_vec(p['ln_g'])
        add_vec(p['ln_b'])

    w1, b1, w2, b2 = params['comp']
    # Reshape W1 pair-blocks (D*D, 4D) -> (D, D*4D) (contiguous, zero-copy in XLA)
    # so the kernel can fuse the outer product with the compression GEMM.
    for pp in range(3):
        add_mat(w1[pp * D * D:(pp + 1) * D * D, :].reshape(D, D * H))
    add_vec(b1)
    add_mat(w2)
    add_vec(b2)
    fw1, fb1, fw2, fb2 = params['fusion_layers']
    add_mat(fw1)
    add_vec(fb1)
    add_mat(fw2)
    add_vec(fb2)
    add_vec(params['ln_g'])
    add_vec(params['ln_b'])

    kernel = make_fused_kernel(tuple(mps_counts), D)

    def full_spec(arr):
        # whole array resident in VMEM across all batch tiles
        return pl.BlockSpec(arr.shape, lambda i: (0, 0))

    in_specs = [
        pl.BlockSpec(memory_space=pltpu.MemorySpace.SMEM),        # (3,3) fusion weights
        pl.BlockSpec((bm, xt.shape[1]), lambda i: (i, 0)),
        pl.BlockSpec((bm, xi.shape[1]), lambda i: (i, 0)),
        pl.BlockSpec((bm, xtab.shape[1]), lambda i: (i, 0)),
    ] + [full_spec(w) for w in weights]

    out_spec = pl.BlockSpec((bm, D), lambda i: (i, 0))
    out_shape = tuple(jax.ShapeDtypeStruct((B_pad, D), jnp.float32) for _ in range(4))

    fused, t, im, tb = pl.pallas_call(
        kernel,
        out_shape=out_shape,
        grid=(n_b,),
        in_specs=in_specs,
        out_specs=(out_spec,) * 4,
        compiler_params=pltpu.CompilerParams(
            dimension_semantics=("parallel",)),   # batch axis shards across TCs on v7x
    )(jnp.asarray(params['fusion_weights'], jnp.float32), xt, xi, xtab, *weights)

    return {
        'fused_features': fused[:B],
        'modality_features': {'text': t[:B], 'image': im[:B], 'tabular': tb[:B]},
        'coherence_measure': jnp.float32(0.0),
        'fusion_method': fusion_method,
        'active_modalities': ['text', 'image', 'tabular'],
    }


# ----------------------------- main -----------------------------

if __name__ == "__main__":
    cfg = dict(text_dim=32, image_dim=64, tabular_dim=16, unified_dim=32, bond_dim=8)
    key = jax.random.PRNGKey(0)
    kp, kt, ki, kb = jax.random.split(key, 4)
    params = init_model(kp, cfg)

    batch = 2
    text_features = jax.random.normal(kt, (batch, cfg['text_dim']), jnp.float32)
    image_features = jax.random.normal(ki, (batch, cfg['image_dim']), jnp.float32)
    tabular_features = jax.random.normal(kb, (batch, cfg['tabular_dim']), jnp.float32)

    out = multimodal_fusion_forward(params, text_features, image_features,
                                    tabular_features)
    jax.block_until_ready(out['fused_features'])
    assert out['fused_features'].shape == (batch, cfg['unified_dim'])
    assert out['modality_features']['text'].shape == (batch, cfg['unified_dim'])
    print("KERNEL_OK")
</pallas_src>

<mosaic_0001>
module attributes {stable_mosaic.version = 11 : i64} {
  func.func @kernel(%arg0: i32, %arg1: memref<3x3xf32, #tpu.memory_space<smem>>, %arg2: memref<8x32xf32, #tpu.memory_space<vmem>>, %arg3: memref<8x64xf32, #tpu.memory_space<vmem>>, %arg4: memref<8x16xf32, #tpu.memory_space<vmem>>, %arg5: memref<32x16xbf16, #tpu.memory_space<vmem>>, %arg6: memref<16x8xbf16, #tpu.memory_space<vmem>>, %arg7: memref<8x32xbf16, #tpu.memory_space<vmem>>, %arg8: memref<1x32xf32, #tpu.memory_space<vmem>>, %arg9: memref<1x32xf32, #tpu.memory_space<vmem>>, %arg10: memref<1x32xf32, #tpu.memory_space<vmem>>, %arg11: memref<64x32xbf16, #tpu.memory_space<vmem>>, %arg12: memref<32x16xbf16, #tpu.memory_space<vmem>>, %arg13: memref<16x8xbf16, #tpu.memory_space<vmem>>, %arg14: memref<8x32xbf16, #tpu.memory_space<vmem>>, %arg15: memref<1x32xf32, #tpu.memory_space<vmem>>, %arg16: memref<1x32xf32, #tpu.memory_space<vmem>>, %arg17: memref<1x32xf32, #tpu.memory_space<vmem>>, %arg18: memref<16x8xbf16, #tpu.memory_space<vmem>>, %arg19: memref<8x32xbf16, #tpu.memory_space<vmem>>, %arg20: memref<1x32xf32, #tpu.memory_space<vmem>>, %arg21: memref<1x32xf32, #tpu.memory_space<vmem>>, %arg22: memref<1x32xf32, #tpu.memory_space<vmem>>, %arg23: memref<32x4096xbf16, #tpu.memory_space<vmem>>, %arg24: memref<32x4096xbf16, #tpu.memory_space<vmem>>, %arg25: memref<32x4096xbf16, #tpu.memory_space<vmem>>, %arg26: memref<1x128xf32, #tpu.memory_space<vmem>>, %arg27: memref<128x32xbf16, #tpu.memory_space<vmem>>, %arg28: memref<1x32xf32, #tpu.memory_space<vmem>>, %arg29: memref<32x32xbf16, #tpu.memory_space<vmem>>, %arg30: memref<1x32xf32, #tpu.memory_space<vmem>>, %arg31: memref<32x32xbf16, #tpu.memory_space<vmem>>, %arg32: memref<1x32xf32, #tpu.memory_space<vmem>>, %arg33: memref<1x32xf32, #tpu.memory_space<vmem>>, %arg34: memref<1x32xf32, #tpu.memory_space<vmem>>, %arg35: memref<8x32xf32, #tpu.memory_space<vmem>>, %arg36: memref<8x32xf32, #tpu.memory_space<vmem>>, %arg37: memref<8x32xf32, #tpu.memory_space<vmem>>, %arg38: memref<8x32xf32, #tpu.memory_space<vmem>>) attributes {dimension_semantics = [#tpu.dimension_semantics<parallel>], iteration_bounds = array<i64: 1>, scalar_prefetch = 0 : i64, scratch_operands = 0 : i64, tpu.core_type = #tpu.core_type<tc>, window_params = [{transform_indices = @transform_0, window_bounds = array<i64: 3, 3>}, {transform_indices = @transform_1, window_bounds = array<i64: 8, 32>}, {transform_indices = @transform_2, window_bounds = array<i64: 8, 64>}, {transform_indices = @transform_3, window_bounds = array<i64: 8, 16>}, {pipeline_mode = #tpu.pipeline_mode<synchronous>, transform_indices = @transform_4, window_bounds = array<i64: 32, 16>}, {pipeline_mode = #tpu.pipeline_mode<synchronous>, transform_indices = @transform_5, window_bounds = array<i64: 16, 8>}, {pipeline_mode = #tpu.pipeline_mode<synchronous>, transform_indices = @transform_6, window_bounds = array<i64: 8, 32>}, {pipeline_mode = #tpu.pipeline_mode<synchronous>, transform_indices = @transform_7, window_bounds = array<i64: 1, 32>}, {pipeline_mode = #tpu.pipeline_mode<synchronous>, transform_indices = @transform_8, window_bounds = array<i64: 1, 32>}, {pipeline_mode = #tpu.pipeline_mode<synchronous>, transform_indices = @transform_9, window_bounds = array<i64: 1, 32>}, {pipeline_mode = #tpu.pipeline_mode<synchronous>, transform_indices = @transform_10, window_bounds = array<i64: 64, 32>}, {pipeline_mode = #tpu.pipeline_mode<synchronous>, transform_indices = @transform_11, window_bounds = array<i64: 32, 16>}, {pipeline_mode = #tpu.pipeline_mode<synchronous>, transform_indices = @transform_12, window_bounds = array<i64: 16, 8>}, {pipeline_mode = #tpu.pipeline_mode<synchronous>, transform_indices = @transform_13, window_bounds = array<i64: 8, 32>}, {pipeline_mode = #tpu.pipeline_mode<synchronous>, transform_indices = @transform_14, window_bounds = array<i64: 1, 32>}, {pipeline_mode = #tpu.pipeline_mode<synchronous>, transform_indices = @transform_15, window_bounds = array<i64: 1, 32>}, {pipeline_mode = #tpu.pipeline_mode<synchronous>, transform_indices = @transform_16, window_bounds = array<i64: 1, 32>}, {pipeline_mode = #tpu.pipeline_mode<synchronous>, transform_indices = @transform_17, window_bounds = array<i64: 16, 8>}, {pipeline_mode = #tpu.pipeline_mode<synchronous>, transform_indices = @transform_18, window_bounds = array<i64: 8, 32>}, {pipeline_mode = #tpu.pipeline_mode<synchronous>, transform_indices = @transform_19, window_bounds = array<i64: 1, 32>}, {pipeline_mode = #tpu.pipeline_mode<synchronous>, transform_indices = @transform_20, window_bounds = array<i64: 1, 32>}, {pipeline_mode = #tpu.pipeline_mode<synchronous>, transform_indices = @transform_21, window_bounds = array<i64: 1, 32>}, {pipeline_mode = #tpu.pipeline_mode<synchronous>, transform_indices = @transform_22, window_bounds = array<i64: 32, 4096>}, {pipeline_mode = #tpu.pipeline_mode<synchronous>, transform_indices = @transform_23, window_bounds = array<i64: 32, 4096>}, {pipeline_mode = #tpu.pipeline_mode<synchronous>, transform_indices = @transform_24, window_bounds = array<i64: 32, 4096>}, {pipeline_mode = #tpu.pipeline_mode<synchronous>, transform_indices = @transform_25, window_bounds = array<i64: 1, 128>}, {pipeline_mode = #tpu.pipeline_mode<synchronous>, transform_indices = @transform_26, window_bounds = array<i64: 128, 32>}, {pipeline_mode = #tpu.pipeline_mode<synchronous>, transform_indices = @transform_27, window_bounds = array<i64: 1, 32>}, {pipeline_mode = #tpu.pipeline_mode<synchronous>, transform_indices = @transform_28, window_bounds = array<i64: 32, 32>}, {pipeline_mode = #tpu.pipeline_mode<synchronous>, transform_indices = @transform_29, window_bounds = array<i64: 1, 32>}, {pipeline_mode = #tpu.pipeline_mode<synchronous>, transform_indices = @transform_30, window_bounds = array<i64: 32, 32>}, {pipeline_mode = #tpu.pipeline_mode<synchronous>, transform_indices = @transform_31, window_bounds = array<i64: 1, 32>}, {pipeline_mode = #tpu.pipeline_mode<synchronous>, transform_indices = @transform_32, window_bounds = array<i64: 1, 32>}, {pipeline_mode = #tpu.pipeline_mode<synchronous>, transform_indices = @transform_33, window_bounds = array<i64: 1, 32>}, {transform_indices = @transform_34, window_bounds = array<i64: 8, 32>}, {transform_indices = @transform_35, window_bounds = array<i64: 8, 32>}, {transform_indices = @transform_36, window_bounds = array<i64: 8, 32>}, {transform_indices = @transform_37, window_bounds = array<i64: 8, 32>}]} {
    %c0 = arith.constant 0 : index
    %c0_0 = arith.constant 0 : index
    %0 = vector.load %arg2[%c0, %c0_0] : memref<8x32xf32, #tpu.memory_space<vmem>>, vector<8x32xf32>
    %1 = arith.truncf %0 : vector<8x32xf32> to vector<8x32xbf16>
    %c0_1 = arith.constant 0 : index
    %c0_2 = arith.constant 0 : index
    %2 = vector.load %arg5[%c0_1, %c0_2] : memref<32x16xbf16, #tpu.memory_space<vmem>>, vector<32x16xbf16>
    %cst = arith.constant dense<0.000000e+00> : vector<8x16xf32>
    %3 = tpu.matmul %1, %2, %cst {dimension_numbers = #tpu.dot_dimension_numbers<[1], [0], [0], [1], [0, 0, 1, 1], [], []>} : vector<8x32xbf16>, vector<32x16xbf16>, vector<8x16xf32> -> vector<8x16xf32>
    %cst_3 = arith.constant 0.000000e+00 : f32
    %4 = vector.broadcast %cst_3 : f32 to vector<8x16xf32>
    %5 = arith.maximumf %3, %4 : vector<8x16xf32>
    %6 = arith.truncf %5 : vector<8x16xf32> to vector<8x16xbf16>
    %c0_4 = arith.constant 0 : index
    %c0_5 = arith.constant 0 : index
    %7 = vector.load %arg6[%c0_4, %c0_5] : memref<16x8xbf16, #tpu.memory_space<vmem>>, vector<16x8xbf16>
    %cst_6 = arith.constant dense<0.000000e+00> : vector<8x8xf32>
    %8 = tpu.matmul %6, %7, %cst_6 {dimension_numbers = #tpu.dot_dimension_numbers<[1], [0], [0], [1], [0, 0, 1, 1], [], []>} : vector<8x16xbf16>, vector<16x8xbf16>, vector<8x8xf32> -> vector<8x8xf32>
    %cst_7 = arith.constant 0.000000e+00 : f32
    %9 = vector.broadcast %cst_7 : f32 to vector<8x8xf32>
    %10 = arith.maximumf %8, %9 : vector<8x8xf32>
    %11 = arith.truncf %10 : vector<8x8xf32> to vector<8x8xbf16>
    %c0_8 = arith.constant 0 : index
    %c0_9 = arith.constant 0 : index
    %12 = vector.load %arg7[%c0_8, %c0_9] : memref<8x32xbf16, #tpu.memory_space<vmem>>, vector<8x32xbf16>
    %cst_10 = arith.constant dense<0.000000e+00> : vector<8x32xf32>
    %13 = tpu.matmul %11, %12, %cst_10 {dimension_numbers = #tpu.dot_dimension_numbers<[1], [0], [0], [1], [0, 0, 1, 1], [], []>} : vector<8x8xbf16>, vector<8x32xbf16>, vector<8x32xf32> -> vector<8x32xf32>
    %c0_11 = arith.constant 0 : index
    %c0_12 = arith.constant 0 : index
    %14 = vector.load %arg8[%c0_11, %c0_12] : memref<1x32xf32, #tpu.memory_space<vmem>>, vector<1x32xf32>
    %15 = vector.broadcast %14 : vector<1x32xf32> to vector<8x32xf32>
    %16 = arith.addf %13, %15 : vector<8x32xf32>
    %c0_13 = arith.constant 0 : index
    %c0_14 = arith.constant 0 : index
    %17 = vector.load %arg9[%c0_13, %c0_14] : memref<1x32xf32, #tpu.memory_space<vmem>>, vector<1x32xf32>
    %c0_15 = arith.constant 0 : index
    %c0_16 = arith.constant 0 : index
    %18 = vector.load %arg10[%c0_15, %c0_16] : memref<1x32xf32, #tpu.memory_space<vmem>>, vector<1x32xf32>
    %cst_17 = arith.constant dense<0.000000e+00> : vector<8xf32>
    %19 = vector.multi_reduction <add>, %16, %cst_17 [1] : vector<8x32xf32> to vector<8xf32>
    %20 = vector.shape_cast %19 : vector<8xf32> to vector<8x1xf32>
    %cst_18 = arith.constant 3.200000e+01 : f32
    %21 = vector.broadcast %cst_18 : f32 to vector<8x1xf32>
    %22 = arith.divf %20, %21 : vector<8x1xf32>
    %23 = vector.broadcast %22 : vector<8x1xf32> to vector<8x32xf32>
    %24 = arith.subf %16, %23 : vector<8x32xf32>
    %25 = arith.mulf %24, %24 : vector<8x32xf32>
    %cst_19 = arith.constant dense<0.000000e+00> : vector<8xf32>
    %26 = vector.multi_reduction <add>, %25, %cst_19 [1] : vector<8x32xf32> to vector<8xf32>
    %27 = vector.shape_cast %26 : vector<8xf32> to vector<8x1xf32>
    %cst_20 = arith.constant 3.200000e+01 : f32
    %28 = vector.broadcast %cst_20 : f32 to vector<8x1xf32>
    %29 = arith.divf %27, %28 : vector<8x1xf32>
    %cst_21 = arith.constant 9.99999974E-6 : f32
    %30 = vector.broadcast %cst_21 : f32 to vector<8x1xf32>
    %31 = arith.addf %29, %30 : vector<8x1xf32>
    %32 = math.rsqrt %31 : vector<8x1xf32>
    %33 = vector.broadcast %32 : vector<8x1xf32> to vector<8x32xf32>
    %34 = arith.mulf %24, %33 : vector<8x32xf32>
    %35 = vector.broadcast %17 : vector<1x32xf32> to vector<8x32xf32>
    %36 = arith.mulf %34, %35 : vector<8x32xf32>
    %37 = vector.broadcast %18 : vector<1x32xf32> to vector<8x32xf32>
    %38 = arith.addf %36, %37 : vector<8x32xf32>
    %c0_22 = arith.constant 0 : index
    %c0_23 = arith.constant 0 : index
    %39 = vector.load %arg3[%c0_22, %c0_23] : memref<8x64xf32, #tpu.memory_space<vmem>>, vector<8x64xf32>
    %40 = arith.truncf %39 : vector<8x64xf32> to vector<8x64xbf16>
    %c0_24 = arith.constant 0 : index
    %c0_25 = arith.constant 0 : index
    %41 = vector.load %arg11[%c0_24, %c0_25] : memref<64x32xbf16, #tpu.memory_space<vmem>>, vector<64x32xbf16>
    %cst_26 = arith.constant dense<0.000000e+00> : vector<8x32xf32>
    %42 = tpu.matmul %40, %41, %cst_26 {dimension_numbers = #tpu.dot_dimension_numbers<[1], [0], [0], [1], [0, 0, 1, 1], [], []>} : vector<8x64xbf16>, vector<64x32xbf16>, vector<8x32xf32> -> vector<8x32xf32>
    %cst_27 = arith.constant 0.000000e+00 : f32
    %43 = vector.broadcast %cst_27 : f32 to vector<8x32xf32>
    %44 = arith.maximumf %42, %43 : vector<8x32xf32>
    %45 = arith.truncf %44 : vector<8x32xf32> to vector<8x32xbf16>
    %c0_28 = arith.constant 0 : index
    %c0_29 = arith.constant 0 : index
    %46 = vector.load %arg12[%c0_28, %c0_29] : memref<32x16xbf16, #tpu.memory_space<vmem>>, vector<32x16xbf16>
    %cst_30 = arith.constant dense<0.000000e+00> : vector<8x16xf32>
    %47 = tpu.matmul %45, %46, %cst_30 {dimension_numbers = #tpu.dot_dimension_numbers<[1], [0], [0], [1], [0, 0, 1, 1], [], []>} : vector<8x32xbf16>, vector<32x16xbf16>, vector<8x16xf32> -> vector<8x16xf32>
    %cst_31 = arith.constant 0.000000e+00 : f32
    %48 = vector.broadcast %cst_31 : f32 to vector<8x16xf32>
    %49 = arith.maximumf %47, %48 : vector<8x16xf32>
    %50 = arith.truncf %49 : vector<8x16xf32> to vector<8x16xbf16>
    %c0_32 = arith.constant 0 : index
    %c0_33 = arith.constant 0 : index
    %51 = vector.load %arg13[%c0_32, %c0_33] : memref<16x8xbf16, #tpu.memory_space<vmem>>, vector<16x8xbf16>
    %cst_34 = arith.constant dense<0.000000e+00> : vector<8x8xf32>
    %52 = tpu.matmul %50, %51, %cst_34 {dimension_numbers = #tpu.dot_dimension_numbers<[1], [0], [0], [1], [0, 0, 1, 1], [], []>} : vector<8x16xbf16>, vector<16x8xbf16>, vector<8x8xf32> -> vector<8x8xf32>
    %cst_35 = arith.constant 0.000000e+00 : f32
    %53 = vector.broadcast %cst_35 : f32 to vector<8x8xf32>
    %54 = arith.maximumf %52, %53 : vector<8x8xf32>
    %55 = arith.truncf %54 : vector<8x8xf32> to vector<8x8xbf16>
    %c0_36 = arith.constant 0 : index
    %c0_37 = arith.constant 0 : index
    %56 = vector.load %arg14[%c0_36, %c0_37] : memref<8x32xbf16, #tpu.memory_space<vmem>>, vector<8x32xbf16>
    %cst_38 = arith.constant dense<0.000000e+00> : vector<8x32xf32>
    %57 = tpu.matmul %55, %56, %cst_38 {dimension_numbers = #tpu.dot_dimension_numbers<[1], [0], [0], [1], [0, 0, 1, 1], [], []>} : vector<8x8xbf16>, vector<8x32xbf16>, vector<8x32xf32> -> vector<8x32xf32>
    %c0_39 = arith.constant 0 : index
    %c0_40 = arith.constant 0 : index
    %58 = vector.load %arg15[%c0_39, %c0_40] : memref<1x32xf32, #tpu.memory_space<vmem>>, vector<1x32xf32>
    %59 = vector.broadcast %58 : vector<1x32xf32> to vector<8x32xf32>
    %60 = arith.addf %57, %59 : vector<8x32xf32>
    %c0_41 = arith.constant 0 : index
    %c0_42 = arith.constant 0 : index
    %61 = vector.load %arg16[%c0_41, %c0_42] : memref<1x32xf32, #tpu.memory_space<vmem>>, vector<1x32xf32>
    %c0_43 = arith.constant 0 : index
    %c0_44 = arith.constant 0 : index
    %62 = vector.load %arg17[%c0_43, %c0_44] : memref<1x32xf32, #tpu.memory_space<vmem>>, vector<1x32xf32>
    %cst_45 = arith.constant dense<0.000000e+00> : vector<8xf32>
    %63 = vector.multi_reduction <add>, %60, %cst_45 [1] : vector<8x32xf32> to vector<8xf32>
    %64 = vector.shape_cast %63 : vector<8xf32> to vector<8x1xf32>
    %cst_46 = arith.constant 3.200000e+01 : f32
    %65 = vector.broadcast %cst_46 : f32 to vector<8x1xf32>
    %66 = arith.divf %64, %65 : vector<8x1xf32>
    %67 = vector.broadcast %66 : vector<8x1xf32> to vector<8x32xf32>
    %68 = arith.subf %60, %67 : vector<8x32xf32>
    %69 = arith.mulf %68, %68 : vector<8x32xf32>
    %cst_47 = arith.constant dense<0.000000e+00> : vector<8xf32>
    %70 = vector.multi_reduction <add>, %69, %cst_47 [1] : vector<8x32xf32> to vector<8xf32>
    %71 = vector.shape_cast %70 : vector<8xf32> to vector<8x1xf32>
    %cst_48 = arith.constant 3.200000e+01 : f32
    %72 = vector.broadcast %cst_48 : f32 to vector<8x1xf32>
    %73 = arith.divf %71, %72 : vector<8x1xf32>
    %cst_49 = arith.constant 9.99999974E-6 : f32
    %74 = vector.broadcast %cst_49 : f32 to vector<8x1xf32>
    %75 = arith.addf %73, %74 : vector<8x1xf32>
    %76 = math.rsqrt %75 : vector<8x1xf32>
    %77 = vector.broadcast %76 : vector<8x1xf32> to vector<8x32xf32>
    %78 = arith.mulf %68, %77 : vector<8x32xf32>
    %79 = vector.broadcast %61 : vector<1x32xf32> to vector<8x32xf32>
    %80 = arith.mulf %78, %79 : vector<8x32xf32>
    %81 = vector.broadcast %62 : vector<1x32xf32> to vector<8x32xf32>
    %82 = arith.addf %80, %81 : vector<8x32xf32>
    %c0_50 = arith.constant 0 : index
    %c0_51 = arith.constant 0 : index
    %83 = vector.load %arg4[%c0_50, %c0_51] : memref<8x16xf32, #tpu.memory_space<vmem>>, vector<8x16xf32>
    %84 = arith.truncf %83 : vector<8x16xf32> to vector<8x16xbf16>
    %c0_52 = arith.constant 0 : index
    %c0_53 = arith.constant 0 : index
    %85 = vector.load %arg18[%c0_52, %c0_53] : memref<16x8xbf16, #tpu.memory_space<vmem>>, vector<16x8xbf16>
    %cst_54 = arith.constant dense<0.000000e+00> : vector<8x8xf32>
    %86 = tpu.matmul %84, %85, %cst_54 {dimension_numbers = #tpu.dot_dimension_numbers<[1], [0], [0], [1], [0, 0, 1, 1], [], []>} : vector<8x16xbf16>, vector<16x8xbf16>, vector<8x8xf32> -> vector<8x8xf32>
    %cst_55 = arith.constant 0.000000e+00 : f32
    %87 = vector.broadcast %cst_55 : f32 to vector<8x8xf32>
    %88 = arith.maximumf %86, %87 : vector<8x8xf32>
    %89 = arith.truncf %88 : vector<8x8xf32> to vector<8x8xbf16>
    %c0_56 = arith.constant 0 : index
    %c0_57 = arith.constant 0 : index
    %90 = vector.load %arg19[%c0_56, %c0_57] : memref<8x32xbf16, #tpu.memory_space<vmem>>, vector<8x32xbf16>
    %cst_58 = arith.constant dense<0.000000e+00> : vector<8x32xf32>
    %91 = tpu.matmul %89, %90, %cst_58 {dimension_numbers = #tpu.dot_dimension_numbers<[1], [0], [0], [1], [0, 0, 1, 1], [], []>} : vector<8x8xbf16>, vector<8x32xbf16>, vector<8x32xf32> -> vector<8x32xf32>
    %c0_59 = arith.constant 0 : index
    %c0_60 = arith.constant 0 : index
    %92 = vector.load %arg20[%c0_59, %c0_60] : memref<1x32xf32, #tpu.memory_space<vmem>>, vector<1x32xf32>
    %93 = vector.broadcast %92 : vector<1x32xf32> to vector<8x32xf32>
    %94 = arith.addf %91, %93 : vector<8x32xf32>
    %c0_61 = arith.constant 0 : index
    %c0_62 = arith.constant 0 : index
    %95 = vector.load %arg21[%c0_61, %c0_62] : memref<1x32xf32, #tpu.memory_space<vmem>>, vector<1x32xf32>
    %c0_63 = arith.constant 0 : index
    %c0_64 = arith.constant 0 : index
    %96 = vector.load %arg22[%c0_63, %c0_64] : memref<1x32xf32, #tpu.memory_space<vmem>>, vector<1x32xf32>
    %cst_65 = arith.constant dense<0.000000e+00> : vector<8xf32>
    %97 = vector.multi_reduction <add>, %94, %cst_65 [1] : vector<8x32xf32> to vector<8xf32>
    %98 = vector.shape_cast %97 : vector<8xf32> to vector<8x1xf32>
    %cst_66 = arith.constant 3.200000e+01 : f32
    %99 = vector.broadcast %cst_66 : f32 to vector<8x1xf32>
    %100 = arith.divf %98, %99 : vector<8x1xf32>
    %101 = vector.broadcast %100 : vector<8x1xf32> to vector<8x32xf32>
    %102 = arith.subf %94, %101 : vector<8x32xf32>
    %103 = arith.mulf %102, %102 : vector<8x32xf32>
    %cst_67 = arith.constant dense<0.000000e+00> : vector<8xf32>
    %104 = vector.multi_reduction <add>, %103, %cst_67 [1] : vector<8x32xf32> to vector<8xf32>
    %105 = vector.shape_cast %104 : vector<8xf32> to vector<8x1xf32>
    %cst_68 = arith.constant 3.200000e+01 : f32
    %106 = vector.broadcast %cst_68 : f32 to vector<8x1xf32>
    %107 = arith.divf %105, %106 : vector<8x1xf32>
    %cst_69 = arith.constant 9.99999974E-6 : f32
    %108 = vector.broadcast %cst_69 : f32 to vector<8x1xf32>
    %109 = arith.addf %107, %108 : vector<8x1xf32>
    %110 = math.rsqrt %109 : vector<8x1xf32>
    %111 = vector.broadcast %110 : vector<8x1xf32> to vector<8x32xf32>
    %112 = arith.mulf %102, %111 : vector<8x32xf32>
    %113 = vector.broadcast %95 : vector<1x32xf32> to vector<8x32xf32>
    %114 = arith.mulf %112, %113 : vector<8x32xf32>
    %115 = vector.broadcast %96 : vector<1x32xf32> to vector<8x32xf32>
    %116 = arith.addf %114, %115 : vector<8x32xf32>
    %c0_70 = arith.constant 0 : index
    %c0_71 = arith.constant 0 : index
    %117 = vector.load %arg36[%c0_70, %c0_71] : memref<8x32xf32, #tpu.memory_space<vmem>>, vector<8x32xf32>
    tpu.vector_store %arg36[%c0_70, %c0_71], %38 {strides = array<i32>} : memref<8x32xf32, #tpu.memory_space<vmem>>, vector<8x32xf32>,
    %c0_72 = arith.constant 0 : index
    %c0_73 = arith.constant 0 : index
    %118 = vector.load %arg37[%c0_72, %c0_73] : memref<8x32xf32, #tpu.memory_space<vmem>>, vector<8x32xf32>
    tpu.vector_store %arg37[%c0_72, %c0_73], %82 {strides = array<i32>} : memref<8x32xf32, #tpu.memory_space<vmem>>, vector<8x32xf32>,
    %c0_74 = arith.constant 0 : index
    %c0_75 = arith.constant 0 : index
    %119 = vector.load %arg38[%c0_74, %c0_75] : memref<8x32xf32, #tpu.memory_space<vmem>>, vector<8x32xf32>
    tpu.vector_store %arg38[%c0_74, %c0_75], %116 {strides = array<i32>} : memref<8x32xf32, #tpu.memory_space<vmem>>, vector<8x32xf32>,
    %120 = arith.mulf %38, %38 : vector<8x32xf32>
    %cst_76 = arith.constant dense<0.000000e+00> : vector<8xf32>
    %121 = vector.multi_reduction <add>, %120, %cst_76 [1] : vector<8x32xf32> to vector<8xf32>
    %122 = vector.shape_cast %121 : vector<8xf32> to vector<8x1xf32>
    %cst_77 = arith.constant 1.000000e-24 : f32
    %123 = vector.broadcast %cst_77 : f32 to vector<8x1xf32>
    %124 = arith.maximumf %122, %123 : vector<8x1xf32>
    %125 = math.rsqrt %124 : vector<8x1xf32>
    %126 = vector.broadcast %125 : vector<8x1xf32> to vector<8x32xf32>
    %127 = arith.mulf %38, %126 : vector<8x32xf32>
    %128 = arith.mulf %82, %82 : vector<8x32xf32>
    %cst_78 = arith.constant dense<0.000000e+00> : vector<8xf32>
    %129 = vector.multi_reduction <add>, %128, %cst_78 [1] : vector<8x32xf32> to vector<8xf32>
    %130 = vector.shape_cast %129 : vector<8xf32> to vector<8x1xf32>
    %cst_79 = arith.constant 1.000000e-24 : f32
    %131 = vector.broadcast %cst_79 : f32 to vector<8x1xf32>
    %132 = arith.maximumf %130, %131 : vector<8x1xf32>
    %133 = math.rsqrt %132 : vector<8x1xf32>
    %134 = vector.broadcast %133 : vector<8x1xf32> to vector<8x32xf32>
    %135 = arith.mulf %82, %134 : vector<8x32xf32>
    %136 = arith.mulf %116, %116 : vector<8x32xf32>
    %cst_80 = arith.constant dense<0.000000e+00> : vector<8xf32>
    %137 = vector.multi_reduction <add>, %136, %cst_80 [1] : vector<8x32xf32> to vector<8xf32>
    %138 = vector.shape_cast %137 : vector<8xf32> to vector<8x1xf32>
    %cst_81 = arith.constant 1.000000e-24 : f32
    %139 = vector.broadcast %cst_81 : f32 to vector<8x1xf32>
    %140 = arith.maximumf %138, %139 : vector<8x1xf32>
    %141 = math.rsqrt %140 : vector<8x1xf32>
    %142 = vector.broadcast %141 : vector<8x1xf32> to vector<8x32xf32>
    %143 = arith.mulf %116, %142 : vector<8x32xf32>
    %c0_82 = arith.constant 0 : index
    %c1 = arith.constant 1 : index
    %144 = memref.load %arg1[%c0_82, %c1] : memref<3x3xf32, #tpu.memory_space<smem>>
    %c0_83 = arith.constant 0 : index
    %c2 = arith.constant 2 : index
    %145 = memref.load %arg1[%c0_83, %c2] : memref<3x3xf32, #tpu.memory_space<smem>>
    %c1_84 = arith.constant 1 : index
    %c2_85 = arith.constant 2 : index
    %146 = memref.load %arg1[%c1_84, %c2_85] : memref<3x3xf32, #tpu.memory_space<smem>>
    %cst_86 = arith.constant 0.000000e+00 : f32
    %147 = vector.broadcast %cst_86 : f32 to vector<8x128xf32>
    %148 = arith.truncf %127 : vector<8x32xf32> to vector<8x32xbf16>
    %c0_87 = arith.constant 0 : index
    %c0_88 = arith.constant 0 : index
    %149 = vector.load %arg23[%c0_87, %c0_88] : memref<32x4096xbf16, #tpu.memory_space<vmem>>, vector<32x4096xbf16>
    %cst_89 = arith.constant dense<0.000000e+00> : vector<8x4096xf32>
    %150 = tpu.matmul %148, %149, %cst_89 {dimension_numbers = #tpu.dot_dimension_numbers<[1], [0], [0], [1], [0, 0, 1, 1], [], []>} : vector<8x32xbf16>, vector<32x4096xbf16>, vector<8x4096xf32> -> vector<8x4096xf32>
    %151 = vector.broadcast %144 : f32 to vector<8x32xf32>
    %152 = arith.mulf %135, %151 : vector<8x32xf32>
    %153 = vector.extract_strided_slice %152 {offsets = [0, 0], sizes = [8, 1], strides = [1, 1]} : vector<8x32xf32> to vector<8x1xf32>
    %154 = vector.extract_strided_slice %150 {offsets = [0, 0], sizes = [8, 128], strides = [1, 1]} : vector<8x4096xf32> to vector<8x128xf32>
    %155 = vector.broadcast %153 : vector<8x1xf32> to vector<8x128xf32>
    %156 = arith.mulf %155, %154 : vector<8x128xf32>
    %157 = arith.addf %147, %156 : vector<8x128xf32>
    %158 = vector.extract_strided_slice %152 {offsets = [0, 1], sizes = [8, 1], strides = [1, 1]} : vector<8x32xf32> to vector<8x1xf32>
    %159 = vector.extract_strided_slice %150 {offsets = [0, 128], sizes = [8, 128], strides = [1, 1]} : vector<8x4096xf32> to vector<8x128xf32>
    %160 = vector.broadcast %158 : vector<8x1xf32> to vector<8x128xf32>
    %161 = arith.mulf %160, %159 : vector<8x128xf32>
    %162 = arith.addf %157, %161 : vector<8x128xf32>
    %163 = vector.extract_strided_slice %152 {offsets = [0, 2], sizes = [8, 1], strides = [1, 1]} : vector<8x32xf32> to vector<8x1xf32>
    %164 = vector.extract_strided_slice %150 {offsets = [0, 256], sizes = [8, 128], strides = [1, 1]} : vector<8x4096xf32> to vector<8x128xf32>
    %165 = vector.broadcast %163 : vector<8x1xf32> to vector<8x128xf32>
    %166 = arith.mulf %165, %164 : vector<8x128xf32>
    %167 = arith.addf %162, %166 : vector<8x128xf32>
    %168 = vector.extract_strided_slice %152 {offsets = [0, 3], sizes = [8, 1], strides = [1, 1]} : vector<8x32xf32> to vector<8x1xf32>
    %169 = vector.extract_strided_slice %150 {offsets = [0, 384], sizes = [8, 128], strides = [1, 1]} : vector<8x4096xf32> to vector<8x128xf32>
    %170 = vector.broadcast %168 : vector<8x1xf32> to vector<8x128xf32>
    %171 = arith.mulf %170, %169 : vector<8x128xf32>
    %172 = arith.addf %167, %171 : vector<8x128xf32>
    %173 = vector.extract_strided_slice %152 {offsets = [0, 4], sizes = [8, 1], strides = [1, 1]} : vector<8x32xf32> to vector<8x1xf32>
    %174 = vector.extract_strided_slice %150 {offsets = [0, 512], sizes = [8, 128], strides = [1, 1]} : vector<8x4096xf32> to vector<8x128xf32>
    %175 = vector.broadcast %173 : vector<8x1xf32> to vector<8x128xf32>
    %176 = arith.mulf %175, %174 : vector<8x128xf32>
    %177 = arith.addf %172, %176 : vector<8x128xf32>
    %178 = vector.extract_strided_slice %152 {offsets = [0, 5], sizes = [8, 1], strides = [1, 1]} : vector<8x32xf32> to vector<8x1xf32>
    %179 = vector.extract_strided_slice %150 {offsets = [0, 640], sizes = [8, 128], strides = [1, 1]} : vector<8x4096xf32> to vector<8x128xf32>
    %180 = vector.broadcast %178 : vector<8x1xf32> to vector<8x128xf32>
    %181 = arith.mulf %180, %179 : vector<8x128xf32>
    %182 = arith.addf %177, %181 : vector<8x128xf32>
    %183 = vector.extract_strided_slice %152 {offsets = [0, 6], sizes = [8, 1], strides = [1, 1]} : vector<8x32xf32> to vector<8x1xf32>
    %184 = vector.extract_strided_slice %150 {offsets = [0, 768], sizes = [8, 128], strides = [1, 1]} : vector<8x4096xf32> to vector<8x128xf32>
    %185 = vector.broadcast %183 : vector<8x1xf32> to vector<8x128xf32>
    %186 = arith.mulf %185, %184 : vector<8x128xf32>
    %187 = arith.addf %182, %186 : vector<8x128xf32>
    %188 = vector.extract_strided_slice %152 {offsets = [0, 7], sizes = [8, 1], strides = [1, 1]} : vector<8x32xf32> to vector<8x1xf32>
    %189 = vector.extract_strided_slice %150 {offsets = [0, 896], sizes = [8, 128], strides = [1, 1]} : vector<8x4096xf32> to vector<8x128xf32>
    %190 = vector.broadcast %188 : vector<8x1xf32> to vector<8x128xf32>
    %191 = arith.mulf %190, %189 : vector<8x128xf32>
    %192 = arith.addf %187, %191 : vector<8x128xf32>
    %193 = vector.extract_strided_slice %152 {offsets = [0, 8], sizes = [8, 1], strides = [1, 1]} : vector<8x32xf32> to vector<8x1xf32>
    %194 = vector.extract_strided_slice %150 {offsets = [0, 1024], sizes = [8, 128], strides = [1, 1]} : vector<8x4096xf32> to vector<8x128xf32>
    %195 = vector.broadcast %193 : vector<8x1xf32> to vector<8x128xf32>
    %196 = arith.mulf %195, %194 : vector<8x128xf32>
    %197 = arith.addf %192, %196 : vector<8x128xf32>
    %198 = vector.extract_strided_slice %152 {offsets = [0, 9], sizes = [8, 1], strides = [1, 1]} : vector<8x32xf32> to vector<8x1xf32>
    %199 = vector.extract_strided_slice %150 {offsets = [0, 1152], sizes = [8, 128], strides = [1, 1]} : vector<8x4096xf32> to vector<8x128xf32>
    %200 = vector.broadcast %198 : vector<8x1xf32> to vector<8x128xf32>
    %201 = arith.mulf %200, %199 : vector<8x128xf32>
    %202 = arith.addf %197, %201 : vector<8x128xf32>
    %203 = vector.extract_strided_slice %152 {offsets = [0, 10], sizes = [8, 1], strides = [1, 1]} : vector<8x32xf32> to vector<8x1xf32>
    %204 = vector.extract_strided_slice %150 {offsets = [0, 1280], sizes = [8, 128], strides = [1, 1]} : vector<8x4096xf32> to vector<8x128xf32>
    %205 = vector.broadcast %203 : vector<8x1xf32> to vector<8x128xf32>
    %206 = arith.mulf %205, %204 : vector<8x128xf32>
    %207 = arith.addf %202, %206 : vector<8x128xf32>
    %208 = vector.extract_strided_slice %152 {offsets = [0, 11], sizes = [8, 1], strides = [1, 1]} : vector<8x32xf32> to vector<8x1xf32>
    %209 = vector.extract_strided_slice %150 {offsets = [0, 1408], sizes = [8, 128], strides = [1, 1]} : vector<8x4096xf32> to vector<8x128xf32>
    %210 = vector.broadcast %208 : vector<8x1xf32> to vector<8x128xf32>
    %211 = arith.mulf %210, %209 : vector<8x128xf32>
    %212 = arith.addf %207, %211 : vector<8x128xf32>
    %213 = vector.extract_strided_slice %152 {offsets = [0, 12], sizes = [8, 1], strides = [1, 1]} : vector<8x32xf32> to vector<8x1xf32>
    %214 = vector.extract_strided_slice %150 {offsets = [0, 1536], sizes = [8, 128], strides = [1, 1]} : vector<8x4096xf32> to vector<8x128xf32>
    %215 = vector.broadcast %213 : vector<8x1xf32> to vector<8x128xf32>
    %216 = arith.mulf %215, %214 : vector<8x128xf32>
    %217 = arith.addf %212, %216 : vector<8x128xf32>
    %218 = vector.extract_strided_slice %152 {offsets = [0, 13], sizes = [8, 1], strides = [1, 1]} : vector<8x32xf32> to vector<8x1xf32>
    %219 = vector.extract_strided_slice %150 {offsets = [0, 1664], sizes = [8, 128], strides = [1, 1]} : vector<8x4096xf32> to vector<8x128xf32>
    %220 = vector.broadcast %218 : vector<8x1xf32> to vector<8x128xf32>
    %221 = arith.mulf %220, %219 : vector<8x128xf32>
    %222 = arith.addf %217, %221 : vector<8x128xf32>
    %223 = vector.extract_strided_slice %152 {offsets = [0, 14], sizes = [8, 1], strides = [1, 1]} : vector<8x32xf32> to vector<8x1xf32>
    %224 = vector.extract_strided_slice %150 {offsets = [0, 1792], sizes = [8, 128], strides = [1, 1]} : vector<8x4096xf32> to vector<8x128xf32>
    %225 = vector.broadcast %223 : vector<8x1xf32> to vector<8x128xf32>
    %226 = arith.mulf %225, %224 : vector<8x128xf32>
    %227 = arith.addf %222, %226 : vector<8x128xf32>
    %228 = vector.extract_strided_slice %152 {offsets = [0, 15], sizes = [8, 1], strides = [1, 1]} : vector<8x32xf32> to vector<8x1xf32>
    %229 = vector.extract_strided_slice %150 {offsets = [0, 1920], sizes = [8, 128], strides = [1, 1]} : vector<8x4096xf32> to vector<8x128xf32>
    %230 = vector.broadcast %228 : vector<8x1xf32> to vector<8x128xf32>
    %231 = arith.mulf %230, %229 : vector<8x128xf32>
    %232 = arith.addf %227, %231 : vector<8x128xf32>
    %233 = vector.extract_strided_slice %152 {offsets = [0, 16], sizes = [8, 1], strides = [1, 1]} : vector<8x32xf32> to vector<8x1xf32>
    %234 = vector.extract_strided_slice %150 {offsets = [0, 2048], sizes = [8, 128], strides = [1, 1]} : vector<8x4096xf32> to vector<8x128xf32>
    %235 = vector.broadcast %233 : vector<8x1xf32> to vector<8x128xf32>
    %236 = arith.mulf %235, %234 : vector<8x128xf32>
    %237 = arith.addf %232, %236 : vector<8x128xf32>
    %238 = vector.extract_strided_slice %152 {offsets = [0, 17], sizes = [8, 1], strides = [1, 1]} : vector<8x32xf32> to vector<8x1xf32>
    %239 = vector.extract_strided_slice %150 {offsets = [0, 2176], sizes = [8, 128], strides = [1, 1]} : vector<8x4096xf32> to vector<8x128xf32>
    %240 = vector.broadcast %238 : vector<8x1xf32> to vector<8x128xf32>
    %241 = arith.mulf %240, %239 : vector<8x128xf32>
    %242 = arith.addf %237, %241 : vector<8x128xf32>
    %243 = vector.extract_strided_slice %152 {offsets = [0, 18], sizes = [8, 1], strides = [1, 1]} : vector<8x32xf32> to vector<8x1xf32>
    %244 = vector.extract_strided_slice %150 {offsets = [0, 2304], sizes = [8, 128], strides = [1, 1]} : vector<8x4096xf32> to vector<8x128xf32>
    %245 = vector.broadcast %243 : vector<8x1xf32> to vector<8x128xf32>
    %246 = arith.mulf %245, %244 : vector<8x128xf32>
    %247 = arith.addf %242, %246 : vector<8x128xf32>
    %248 = vector.extract_strided_slice %152 {offsets = [0, 19], sizes = [8, 1], strides = [1, 1]} : vector<8x32xf32> to vector<8x1xf32>
    %249 = vector.extract_strided_slice %150 {offsets = [0, 2432], sizes = [8, 128], strides = [1, 1]} : vector<8x4096xf32> to vector<8x128xf32>
    %250 = vector.broadcast %248 : vector<8x1xf32> to vector<8x128xf32>
    %251 = arith.mulf %250, %249 : vector<8x128xf32>
    %252 = arith.addf %247, %251 : vector<8x128xf32>
    %253 = vector.extract_strided_slice %152 {offsets = [0, 20], sizes = [8, 1], strides = [1, 1]} : vector<8x32xf32> to vector<8x1xf32>
    %254 = vector.extract_strided_slice %150 {offsets = [0, 2560], sizes = [8, 128], strides = [1, 1]} : vector<8x4096xf32> to vector<8x128xf32>
    %255 = vector.broadcast %253 : vector<8x1xf32> to vector<8x128xf32>
    %256 = arith.mulf %255, %254 : vector<8x128xf32>
    %257 = arith.addf %252, %256 : vector<8x128xf32>
    %258 = vector.extract_strided_slice %152 {offsets = [0, 21], sizes = [8, 1], strides = [1, 1]} : vector<8x32xf32> to vector<8x1xf32>
    %259 = vector.extract_strided_slice %150 {offsets = [0, 2688], sizes = [8, 128], strides = [1, 1]} : vector<8x4096xf32> to vector<8x128xf32>
    %260 = vector.broadcast %258 : vector<8x1xf32> to vector<8x128xf32>
    %261 = arith.mulf %260, %259 : vector<8x128xf32>
    %262 = arith.addf %257, %261 : vector<8x128xf32>
    %263 = vector.extract_strided_slice %152 {offsets = [0, 22], sizes = [8, 1], strides = [1, 1]} : vector<8x32xf32> to vector<8x1xf32>
    %264 = vector.extract_strided_slice %150 {offsets = [0, 2816], sizes = [8, 128], strides = [1, 1]} : vector<8x4096xf32> to vector<8x128xf32>
    %265 = vector.broadcast %263 : vector<8x1xf32> to vector<8x128xf32>
    %266 = arith.mulf %265, %264 : vector<8x128xf32>
    %267 = arith.addf %262, %266 : vector<8x128xf32>
    %268 = vector.extract_strided_slice %152 {offsets = [0, 23], sizes = [8, 1], strides = [1, 1]} : vector<8x32xf32> to vector<8x1xf32>
    %269 = vector.extract_strided_slice %150 {offsets = [0, 2944], sizes = [8, 128], strides = [1, 1]} : vector<8x4096xf32> to vector<8x128xf32>
    %270 = vector.broadcast %268 : vector<8x1xf32> to vector<8x128xf32>
    %271 = arith.mulf %270, %269 : vector<8x128xf32>
    %272 = arith.addf %267, %271 : vector<8x128xf32>
    %273 = vector.extract_strided_slice %152 {offsets = [0, 24], sizes = [8, 1], strides = [1, 1]} : vector<8x32xf32> to vector<8x1xf32>
    %274 = vector.extract_strided_slice %150 {offsets = [0, 3072], sizes = [8, 128], strides = [1, 1]} : vector<8x4096xf32> to vector<8x128xf32>
    %275 = vector.broadcast %273 : vector<8x1xf32> to vector<8x128xf32>
    %276 = arith.mulf %275, %274 : vector<8x128xf32>
    %277 = arith.addf %272, %276 : vector<8x128xf32>
    %278 = vector.extract_strided_slice %152 {offsets = [0, 25], sizes = [8, 1], strides = [1, 1]} : vector<8x32xf32> to vector<8x1xf32>
    %279 = vector.extract_strided_slice %150 {offsets = [0, 3200], sizes = [8, 128], strides = [1, 1]} : vector<8x4096xf32> to vector<8x128xf32>
    %280 = vector.broadcast %278 : vector<8x1xf32> to vector<8x128xf32>
    %281 = arith.mulf %280, %279 : vector<8x128xf32>
    %282 = arith.addf %277, %281 : vector<8x128xf32>
    %283 = vector.extract_strided_slice %152 {offsets = [0, 26], sizes = [8, 1], strides = [1, 1]} : vector<8x32xf32> to vector<8x1xf32>
    %284 = vector.extract_strided_slice %150 {offsets = [0, 3328], sizes = [8, 128], strides = [1, 1]} : vector<8x4096xf32> to vector<8x128xf32>
    %285 = vector.broadcast %283 : vector<8x1xf32> to vector<8x128xf32>
    %286 = arith.mulf %285, %284 : vector<8x128xf32>
    %287 = arith.addf %282, %286 : vector<8x128xf32>
    %288 = vector.extract_strided_slice %152 {offsets = [0, 27], sizes = [8, 1], strides = [1, 1]} : vector<8x32xf32> to vector<8x1xf32>
    %289 = vector.extract_strided_slice %150 {offsets = [0, 3456], sizes = [8, 128], strides = [1, 1]} : vector<8x4096xf32> to vector<8x128xf32>
    %290 = vector.broadcast %288 : vector<8x1xf32> to vector<8x128xf32>
    %291 = arith.mulf %290, %289 : vector<8x128xf32>
    %292 = arith.addf %287, %291 : vector<8x128xf32>
    %293 = vector.extract_strided_slice %152 {offsets = [0, 28], sizes = [8, 1], strides = [1, 1]} : vector<8x32xf32> to vector<8x1xf32>
    %294 = vector.extract_strided_slice %150 {offsets = [0, 3584], sizes = [8, 128], strides = [1, 1]} : vector<8x4096xf32> to vector<8x128xf32>
    %295 = vector.broadcast %293 : vector<8x1xf32> to vector<8x128xf32>
    %296 = arith.mulf %295, %294 : vector<8x128xf32>
    %297 = arith.addf %292, %296 : vector<8x128xf32>
    %298 = vector.extract_strided_slice %152 {offsets = [0, 29], sizes = [8, 1], strides = [1, 1]} : vector<8x32xf32> to vector<8x1xf32>
    %299 = vector.extract_strided_slice %150 {offsets = [0, 3712], sizes = [8, 128], strides = [1, 1]} : vector<8x4096xf32> to vector<8x128xf32>
    %300 = vector.broadcast %298 : vector<8x1xf32> to vector<8x128xf32>
    %301 = arith.mulf %300, %299 : vector<8x128xf32>
    %302 = arith.addf %297, %301 : vector<8x128xf32>
    %303 = vector.extract_strided_slice %152 {offsets = [0, 30], sizes = [8, 1], strides = [1, 1]} : vector<8x32xf32> to vector<8x1xf32>
    %304 = vector.extract_strided_slice %150 {offsets = [0, 3840], sizes = [8, 128], strides = [1, 1]} : vector<8x4096xf32> to vector<8x128xf32>
    %305 = vector.broadcast %303 : vector<8x1xf32> to vector<8x128xf32>
    %306 = arith.mulf %305, %304 : vector<8x128xf32>
    %307 = arith.addf %302, %306 : vector<8x128xf32>
    %308 = vector.extract_strided_slice %152 {offsets = [0, 31], sizes = [8, 1], strides = [1, 1]} : vector<8x32xf32> to vector<8x1xf32>
    %309 = vector.extract_strided_slice %150 {offsets = [0, 3968], sizes = [8, 128], strides = [1, 1]} : vector<8x4096xf32> to vector<8x128xf32>
    %310 = vector.broadcast %308 : vector<8x1xf32> to vector<8x128xf32>
    %311 = arith.mulf %310, %309 : vector<8x128xf32>
    %312 = arith.addf %307, %311 : vector<8x128xf32>
    %313 = arith.truncf %127 : vector<8x32xf32> to vector<8x32xbf16>
    %c0_90 = arith.constant 0 : index
    %c0_91 = arith.constant 0 : index
    %314 = vector.load %arg24[%c0_90, %c0_91] : memref<32x4096xbf16, #tpu.memory_space<vmem>>, vector<32x4096xbf16>
    %cst_92 = arith.constant dense<0.000000e+00> : vector<8x4096xf32>
    %315 = tpu.matmul %313, %314, %cst_92 {dimension_numbers = #tpu.dot_dimension_numbers<[1], [0], [0], [1], [0, 0, 1, 1], [], []>} : vector<8x32xbf16>, vector<32x4096xbf16>, vector<8x4096xf32> -> vector<8x4096xf32>
    %316 = vector.broadcast %145 : f32 to vector<8x32xf32>
    %317 = arith.mulf %143, %316 : vector<8x32xf32>
    %318 = vector.extract_strided_slice %317 {offsets = [0, 0], sizes = [8, 1], strides = [1, 1]} : vector<8x32xf32> to vector<8x1xf32>
    %319 = vector.extract_strided_slice %315 {offsets = [0, 0], sizes = [8, 128], strides = [1, 1]} : vector<8x4096xf32> to vector<8x128xf32>
    %320 = vector.broadcast %318 : vector<8x1xf32> to vector<8x128xf32>
    %321 = arith.mulf %320, %319 : vector<8x128xf32>
    %322 = arith.addf %312, %321 : vector<8x128xf32>
    %323 = vector.extract_strided_slice %317 {offsets = [0, 1], sizes = [8, 1], strides = [1, 1]} : vector<8x32xf32> to vector<8x1xf32>
    %324 = vector.extract_strided_slice %315 {offsets = [0, 128], sizes = [8, 128], strides = [1, 1]} : vector<8x4096xf32> to vector<8x128xf32>
    %325 = vector.broadcast %323 : vector<8x1xf32> to vector<8x128xf32>
    %326 = arith.mulf %325, %324 : vector<8x128xf32>
    %327 = arith.addf %322, %326 : vector<8x128xf32>
    %328 = vector.extract_strided_slice %317 {offsets = [0, 2], sizes = [8, 1], strides = [1, 1]} : vector<8x32xf32> to vector<8x1xf32>
    %329 = vector.extract_strided_slice %315 {offsets = [0, 256], sizes = [8, 128], strides = [1, 1]} : vector<8x4096xf32> to vector<8x128xf32>
    %330 = vector.broadcast %328 : vector<8x1xf32> to vector<8x128xf32>
    %331 = arith.mulf %330, %329 : vector<8x128xf32>
    %332 = arith.addf %327, %331 : vector<8x128xf32>
    %333 = vector.extract_strided_slice %317 {offsets = [0, 3], sizes = [8, 1], strides = [1, 1]} : vector<8x32xf32> to vector<8x1xf32>
    %334 = vector.extract_strided_slice %315 {offsets = [0, 384], sizes = [8, 128], strides = [1, 1]} : vector<8x4096xf32> to vector<8x128xf32>
    %335 = vector.broadcast %333 : vector<8x1xf32> to vector<8x128xf32>
    %336 = arith.mulf %335, %334 : vector<8x128xf32>
    %337 = arith.addf %332, %336 : vector<8x128xf32>
    %338 = vector.extract_strided_slice %317 {offsets = [0, 4], sizes = [8, 1], strides = [1, 1]} : vector<8x32xf32> to vector<8x1xf32>
    %339 = vector.extract_strided_slice %315 {offsets = [0, 512], sizes = [8, 128], strides = [1, 1]} : vector<8x4096xf32> to vector<8x128xf32>
    %340 = vector.broadcast %338 : vector<8x1xf32> to vector<8x128xf32>
    %341 = arith.mulf %340, %339 : vector<8x128xf32>
    %342 = arith.addf %337, %341 : vector<8x128xf32>
    %343 = vector.extract_strided_slice %317 {offsets = [0, 5], sizes = [8, 1], strides = [1, 1]} : vector<8x32xf32> to vector<8x1xf32>
    %344 = vector.extract_strided_slice %315 {offsets = [0, 640], sizes = [8, 128], strides = [1, 1]} : vector<8x4096xf32> to vector<8x128xf32>
    %345 = vector.broadcast %343 : vector<8x1xf32> to vector<8x128xf32>
    %346 = arith.mulf %345, %344 : vector<8x128xf32>
    %347 = arith.addf %342, %346 : vector<8x128xf32>
    %348 = vector.extract_strided_slice %317 {offsets = [0, 6], sizes = [8, 1], strides = [1, 1]} : vector<8x32xf32> to vector<8x1xf32>
    %349 = vector.extract_strided_slice %315 {offsets = [0, 768], sizes = [8, 128], strides = [1, 1]} : vector<8x4096xf32> to vector<8x128xf32>
    %350 = vector.broadcast %348 : vector<8x1xf32> to vector<8x128xf32>
    %351 = arith.mulf %350, %349 : vector<8x128xf32>
    %352 = arith.addf %347, %351 : vector<8x128xf32>
    %353 = vector.extract_strided_slice %317 {offsets = [0, 7], sizes = [8, 1], strides = [1, 1]} : vector<8x32xf32> to vector<8x1xf32>
    %354 = vector.extract_strided_slice %315 {offsets = [0, 896], sizes = [8, 128], strides = [1, 1]} : vector<8x4096xf32> to vector<8x128xf32>
    %355 = vector.broadcast %353 : vector<8x1xf32> to vector<8x128xf32>
    %356 = arith.mulf %355, %354 : vector<8x128xf32>
    %357 = arith.addf %352, %356 : vector<8x128xf32>
    %358 = vector.extract_strided_slice %317 {offsets = [0, 8], sizes = [8, 1], strides = [1, 1]} : vector<8x32xf32> to vector<8x1xf32>
    %359 = vector.extract_strided_slice %315 {offsets = [0, 1024], sizes = [8, 128], strides = [1, 1]} : vector<8x4096xf32> to vector<8x128xf32>
    %360 = vector.broadcast %358 : vector<8x1xf32> to vector<8x128xf32>
    %361 = arith.mulf %360, %359 : vector<8x128xf32>
    %362 = arith.addf %357, %361 : vector<8x128xf32>
    %363 = vector.extract_strided_slice %317 {offsets = [0, 9], sizes = [8, 1], strides = [1, 1]} : vector<8x32xf32> to vector<8x1xf32>
    %364 = vector.extract_strided_slice %315 {offsets = [0, 1152], sizes = [8, 128], strides = [1, 1]} : vector<8x4096xf32> to vector<8x128xf32>
    %365 = vector.broadcast %363 : vector<8x1xf32> to vector<8x128xf32>
    %366 = arith.mulf %365, %364 : vector<8x128xf32>
    %367 = arith.addf %362, %366 : vector<8x128xf32>
    %368 = vector.extract_strided_slice %317 {offsets = [0, 10], sizes = [8, 1], strides = [1, 1]} : vector<8x32xf32> to vector<8x1xf32>
    %369 = vector.extract_strided_slice %315 {offsets = [0, 1280], sizes = [8, 128], strides = [1, 1]} : vector<8x4096xf32> to vector<8x128xf32>
    %370 = vector.broadcast %368 : vector<8x1xf32> to vector<8x128xf32>
    %371 = arith.mulf %370, %369 : vector<8x128xf32>
    %372 = arith.addf %367, %371 : vector<8x128xf32>
    %373 = vector.extract_strided_slice %317 {offsets = [0, 11], sizes = [8, 1], strides = [1, 1]} : vector<8x32xf32> to vector<8x1xf32>
    %374 = vector.extract_strided_slice %315 {offsets = [0, 1408], sizes = [8, 128], strides = [1, 1]} : vector<8x4096xf32> to vector<8x128xf32>
    %375 = vector.broadcast %373 : vector<8x1xf32> to vector<8x128xf32>
    %376 = arith.mulf %375, %374 : vector<8x128xf32>
    %377 = arith.addf %372, %376 : vector<8x128xf32>
    %378 = vector.extract_strided_slice %317 {offsets = [0, 12], sizes = [8, 1], strides = [1, 1]} : vector<8x32xf32> to vector<8x1xf32>
    %379 = vector.extract_strided_slice %315 {offsets = [0, 1536], sizes = [8, 128], strides = [1, 1]} : vector<8x4096xf32> to vector<8x128xf32>
    %380 = vector.broadcast %378 : vector<8x1xf32> to vector<8x128xf32>
    %381 = arith.mulf %380, %379 : vector<8x128xf32>
    %382 = arith.addf %377, %381 : vector<8x128xf32>
    %383 = vector.extract_strided_slice %317 {offsets = [0, 13], sizes = [8, 1], strides = [1, 1]} : vector<8x32xf32> to vector<8x1xf32>
    %384 = vector.extract_strided_slice %315 {offsets = [0, 1664], sizes = [8, 128], strides = [1, 1]} : vector<8x4096xf32> to vector<8x128xf32>
    %385 = vector.broadcast %383 : vector<8x1xf32> to vector<8x128xf32>
    %386 = arith.mulf %385, %384 : vector<8x128xf32>
    %387 = arith.addf %382, %386 : vector<8x128xf32>
    %388 = vector.extract_strided_slice %317 {offsets = [0, 14], sizes = [8, 1], strides = [1, 1]} : vector<8x32xf32> to vector<8x1xf32>
    %389 = vector.extract_strided_slice %315 {offsets = [0, 1792], sizes = [8, 128], strides = [1, 1]} : vector<8x4096xf32> to vector<8x128xf32>
    %390 = vector.broadcast %388 : vector<8x1xf32> to vector<8x128xf32>
    %391 = arith.mulf %390, %389 : vector<8x128xf32>
    %392 = arith.addf %387, %391 : vector<8x128xf32>
    %393 = vector.extract_strided_slice %317 {offsets = [0, 15], sizes = [8, 1], strides = [1, 1]} : vector<8x32xf32> to vector<8x1xf32>
    %394 = vector.extract_strided_slice %315 {offsets = [0, 1920], sizes = [8, 128], strides = [1, 1]} : vector<8x4096xf32> to vector<8x128xf32>
    %395 = vector.broadcast %393 : vector<8x1xf32> to vector<8x128xf32>
    %396 = arith.mulf %395, %394 : vector<8x128xf32>
    %397 = arith.addf %392, %396 : vector<8x128xf32>
    %398 = vector.extract_strided_slice %317 {offsets = [0, 16], sizes = [8, 1], strides = [1, 1]} : vector<8x32xf32> to vector<8x1xf32>
    %399 = vector.extract_strided_slice %315 {offsets = [0, 2048], sizes = [8, 128], strides = [1, 1]} : vector<8x4096xf32> to vector<8x128xf32>
    %400 = vector.broadcast %398 : vector<8x1xf32> to vector<8x128xf32>
    %401 = arith.mulf %400, %399 : vector<8x128xf32>
    %402 = arith.addf %397, %401 : vector<8x128xf32>
    %403 = vector.extract_strided_slice %317 {offsets = [0, 17], sizes = [8, 1], strides = [1, 1]} : vector<8x32xf32> to vector<8x1xf32>
    %404 = vector.extract_strided_slice %315 {offsets = [0, 2176], sizes = [8, 128], strides = [1, 1]} : vector<8x4096xf32> to vector<8x128xf32>
    %405 = vector.broadcast %403 : vector<8x1xf32> to vector<8x128xf32>
    %406 = arith.mulf %405, %404 : vector<8x128xf32>
    %407 = arith.addf %402, %406 : vector<8x128xf32>
    %408 = vector.extract_strided_slice %317 {offsets = [0, 18], sizes = [8, 1], strides = [1, 1]} : vector<8x32xf32> to vector<8x1xf32>
    %409 = vector.extract_strided_slice %315 {offsets = [0, 2304], sizes = [8, 128], strides = [1, 1]} : vector<8x4096xf32> to vector<8x128xf32>
    %410 = vector.broadcast %408 : vector<8x1xf32> to vector<8x128xf32>
    %411 = arith.mulf %410, %409 : vector<8x128xf32>
    %412 = arith.addf %407, %411 : vector<8x128xf32>
    %413 = vector.extract_strided_slice %317 {offsets = [0, 19], sizes = [8, 1], strides = [1, 1]} : vector<8x32xf32> to vector<8x1xf32>
    %414 = vector.extract_strided_slice %315 {offsets = [0, 2432], sizes = [8, 128], strides = [1, 1]} : vector<8x4096xf32> to vector<8x128xf32>
    %415 = vector.broadcast %413 : vector<8x1xf32> to vector<8x128xf32>
    %416 = arith.mulf %415, %414 : vector<8x128xf32>
    %417 = arith.addf %412, %416 : vector<8x128xf32>
    %418 = vector.extract_strided_slice %317 {offsets = [0, 20], sizes = [8, 1], strides = [1, 1]} : vector<8x32xf32> to vector<8x1xf32>
    %419 = vector.extract_strided_slice %315 {offsets = [0, 2560], sizes = [8, 128], strides = [1, 1]} : vector<8x4096xf32> to vector<8x128xf32>
    %420 = vector.broadcast %418 : vector<8x1xf32> to vector<8x128xf32>
    %421 = arith.mulf %420, %419 : vector<8x128xf32>
    %422 = arith.addf %417, %421 : vector<8x128xf32>
    %423 = vector.extract_strided_slice %317 {offsets = [0, 21], sizes = [8, 1], strides = [1, 1]} : vector<8x32xf32> to vector<8x1xf32>
    %424 = vector.extract_strided_slice %315 {offsets = [0, 2688], sizes = [8, 128], strides = [1, 1]} : vector<8x4096xf32> to vector<8x128xf32>
    %425 = vector.broadcast %423 : vector<8x1xf32> to vector<8x128xf32>
    %426 = arith.mulf %425, %424 : vector<8x128xf32>
    %427 = arith.addf %422, %426 : vector<8x128xf32>
    %428 = vector.extract_strided_slice %317 {offsets = [0, 22], sizes = [8, 1], strides = [1, 1]} : vector<8x32xf32> to vector<8x1xf32>
    %429 = vector.extract_strided_slice %315 {offsets = [0, 2816], sizes = [8, 128], strides = [1, 1]} : vector<8x4096xf32> to vector<8x128xf32>
    %430 = vector.broadcast %428 : vector<8x1xf32> to vector<8x128xf32>
    %431 = arith.mulf %430, %429 : vector<8x128xf32>
    %432 = arith.addf %427, %431 : vector<8x128xf32>
    %433 = vector.extract_strided_slice %317 {offsets = [0, 23], sizes = [8, 1], strides = [1, 1]} : vector<8x32xf32> to vector<8x1xf32>
    %434 = vector.extract_strided_slice %315 {offsets = [0, 2944], sizes = [8, 128], strides = [1, 1]} : vector<8x4096xf32> to vector<8x128xf32>
    %435 = vector.broadcast %433 : vector<8x1xf32> to vector<8x128xf32>
    %436 = arith.mulf %435, %434 : vector<8x128xf32>
    %437 = arith.addf %432, %436 : vector<8x128xf32>
    %438 = vector.extract_strided_slice %317 {offsets = [0, 24], sizes = [8, 1], strides = [1, 1]} : vector<8x32xf32> to vector<8x1xf32>
    %439 = vector.extract_strided_slice %315 {offsets = [0, 3072], sizes = [8, 128], strides = [1, 1]} : vector<8x4096xf32> to vector<8x128xf32>
    %440 = vector.broadcast %438 : vector<8x1xf32> to vector<8x128xf32>
    %441 = arith.mulf %440, %439 : vector<8x128xf32>
    %442 = arith.addf %437, %441 : vector<8x128xf32>
    %443 = vector.extract_strided_slice %317 {offsets = [0, 25], sizes = [8, 1], strides = [1, 1]} : vector<8x32xf32> to vector<8x1xf32>
    %444 = vector.extract_strided_slice %315 {offsets = [0, 3200], sizes = [8, 128], strides = [1, 1]} : vector<8x4096xf32> to vector<8x128xf32>
    %445 = vector.broadcast %443 : vector<8x1xf32> to vector<8x128xf32>
    %446 = arith.mulf %445, %444 : vector<8x128xf32>
    %447 = arith.addf %442, %446 : vector<8x128xf32>
    %448 = vector.extract_strided_slice %317 {offsets = [0, 26], sizes = [8, 1], strides = [1, 1]} : vector<8x32xf32> to vector<8x1xf32>
    %449 = vector.extract_strided_slice %315 {offsets = [0, 3328], sizes = [8, 128], strides = [1, 1]} : vector<8x4096xf32> to vector<8x128xf32>
    %450 = vector.broadcast %448 : vector<8x1xf32> to vector<8x128xf32>
    %451 = arith.mulf %450, %449 : vector<8x128xf32>
    %452 = arith.addf %447, %451 : vector<8x128xf32>
    %453 = vector.extract_strided_slice %317 {offsets = [0, 27], sizes = [8, 1], strides = [1, 1]} : vector<8x32xf32> to vector<8x1xf32>
    %454 = vector.extract_strided_slice %315 {offsets = [0, 3456], sizes = [8, 128], strides = [1, 1]} : vector<8x4096xf32> to vector<8x128xf32>
    %455 = vector.broadcast %453 : vector<8x1xf32> to vector<8x128xf32>
    %456 = arith.mulf %455, %454 : vector<8x128xf32>
    %457 = arith.addf %452, %456 : vector<8x128xf32>
    %458 = vector.extract_strided_slice %317 {offsets = [0, 28], sizes = [8, 1], strides = [1, 1]} : vector<8x32xf32> to vector<8x1xf32>
    %459 = vector.extract_strided_slice %315 {offsets = [0, 3584], sizes = [8, 128], strides = [1, 1]} : vector<8x4096xf32> to vector<8x128xf32>
    %460 = vector.broadcast %458 : vector<8x1xf32> to vector<8x128xf32>
    %461 = arith.mulf %460, %459 : vector<8x128xf32>
    %462 = arith.addf %457, %461 : vector<8x128xf32>
    %463 = vector.extract_strided_slice %317 {offsets = [0, 29], sizes = [8, 1], strides = [1, 1]} : vector<8x32xf32> to vector<8x1xf32>
    %464 = vector.extract_strided_slice %315 {offsets = [0, 3712], sizes = [8, 128], strides = [1, 1]} : vector<8x4096xf32> to vector<8x128xf32>
    %465 = vector.broadcast %463 : vector<8x1xf32> to vector<8x128xf32>
    %466 = arith.mulf %465, %464 : vector<8x128xf32>
    %467 = arith.addf %462, %466 : vector<8x128xf32>
    %468 = vector.extract_strided_slice %317 {offsets = [0, 30], sizes = [8, 1], strides = [1, 1]} : vector<8x32xf32> to vector<8x1xf32>
    %469 = vector.extract_strided_slice %315 {offsets = [0, 3840], sizes = [8, 128], strides = [1, 1]} : vector<8x4096xf32> to vector<8x128xf32>
    %470 = vector.broadcast %468 : vector<8x1xf32> to vector<8x128xf32>
    %471 = arith.mulf %470, %469 : vector<8x128xf32>
    %472 = arith.addf %467, %471 : vector<8x128xf32>
    %473 = vector.extract_strided_slice %317 {offsets = [0, 31], sizes = [8, 1], strides = [1, 1]} : vector<8x32xf32> to vector<8x1xf32>
    %474 = vector.extract_strided_slice %315 {offsets = [0, 3968], sizes = [8, 128], strides = [1, 1]} : vector<8x4096xf32> to vector<8x128xf32>
    %475 = vector.broadcast %473 : vector<8x1xf32> to vector<8x128xf32>
    %476 = arith.mulf %475, %474 : vector<8x128xf32>
    %477 = arith.addf %472, %476 : vector<8x128xf32>
    %478 = arith.truncf %135 : vector<8x32xf32> to vector<8x32xbf16>
    %c0_93 = arith.constant 0 : index
    %c0_94 = arith.constant 0 : index
    %479 = vector.load %arg25[%c0_93, %c0_94] : memref<32x4096xbf16, #tpu.memory_space<vmem>>, vector<32x4096xbf16>
    %cst_95 = arith.constant dense<0.000000e+00> : vector<8x4096xf32>
    %480 = tpu.matmul %478, %479, %cst_95 {dimension_numbers = #tpu.dot_dimension_numbers<[1], [0], [0], [1], [0, 0, 1, 1], [], []>} : vector<8x32xbf16>, vector<32x4096xbf16>, vector<8x4096xf32> -> vector<8x4096xf32>
    %481 = vector.broadcast %146 : f32 to vector<8x32xf32>
    %482 = arith.mulf %143, %481 : vector<8x32xf32>
    %483 = vector.extract_strided_slice %482 {offsets = [0, 0], sizes = [8, 1], strides = [1, 1]} : vector<8x32xf32> to vector<8x1xf32>
    %484 = vector.extract_strided_slice %480 {offsets = [0, 0], sizes = [8, 128], strides = [1, 1]} : vector<8x4096xf32> to vector<8x128xf32>
    %485 = vector.broadcast %483 : vector<8x1xf32> to vector<8x128xf32>
    %486 = arith.mulf %485, %484 : vector<8x128xf32>
    %487 = arith.addf %477, %486 : vector<8x128xf32>
    %488 = vector.extract_strided_slice %482 {offsets = [0, 1], sizes = [8, 1], strides = [1, 1]} : vector<8x32xf32> to vector<8x1xf32>
    %489 = vector.extract_strided_slice %480 {offsets = [0, 128], sizes = [8, 128], strides = [1, 1]} : vector<8x4096xf32> to vector<8x128xf32>
    %490 = vector.broadcast %488 : vector<8x1xf32> to vector<8x128xf32>
    %491 = arith.mulf %490, %489 : vector<8x128xf32>
    %492 = arith.addf %487, %491 : vector<8x128xf32>
    %493 = vector.extract_strided_slice %482 {offsets = [0, 2], sizes = [8, 1], strides = [1, 1]} : vector<8x32xf32> to vector<8x1xf32>
    %494 = vector.extract_strided_slice %480 {offsets = [0, 256], sizes = [8, 128], strides = [1, 1]} : vector<8x4096xf32> to vector<8x128xf32>
    %495 = vector.broadcast %493 : vector<8x1xf32> to vector<8x128xf32>
    %496 = arith.mulf %495, %494 : vector<8x128xf32>
    %497 = arith.addf %492, %496 : vector<8x128xf32>
    %498 = vector.extract_strided_slice %482 {offsets = [0, 3], sizes = [8, 1], strides = [1, 1]} : vector<8x32xf32> to vector<8x1xf32>
    %499 = vector.extract_strided_slice %480 {offsets = [0, 384], sizes = [8, 128], strides = [1, 1]} : vector<8x4096xf32> to vector<8x128xf32>
    %500 = vector.broadcast %498 : vector<8x1xf32> to vector<8x128xf32>
    %501 = arith.mulf %500, %499 : vector<8x128xf32>
    %502 = arith.addf %497, %501 : vector<8x128xf32>
    %503 = vector.extract_strided_slice %482 {offsets = [0, 4], sizes = [8, 1], strides = [1, 1]} : vector<8x32xf32> to vector<8x1xf32>
    %504 = vector.extract_strided_slice %480 {offsets = [0, 512], sizes = [8, 128], strides = [1, 1]} : vector<8x4096xf32> to vector<8x128xf32>
    %505 = vector.broadcast %503 : vector<8x1xf32> to vector<8x128xf32>
    %506 = arith.mulf %505, %504 : vector<8x128xf32>
    %507 = arith.addf %502, %506 : vector<8x128xf32>
    %508 = vector.extract_strided_slice %482 {offsets = [0, 5], sizes = [8, 1], strides = [1, 1]} : vector<8x32xf32> to vector<8x1xf32>
    %509 = vector.extract_strided_slice %480 {offsets = [0, 640], sizes = [8, 128], strides = [1, 1]} : vector<8x4096xf32> to vector<8x128xf32>
    %510 = vector.broadcast %508 : vector<8x1xf32> to vector<8x128xf32>
    %511 = arith.mulf %510, %509 : vector<8x128xf32>
    %512 = arith.addf %507, %511 : vector<8x128xf32>
    %513 = vector.extract_strided_slice %482 {offsets = [0, 6], sizes = [8, 1], strides = [1, 1]} : vector<8x32xf32> to vector<8x1xf32>
    %514 = vector.extract_strided_slice %480 {offsets = [0, 768], sizes = [8, 128], strides = [1, 1]} : vector<8x4096xf32> to vector<8x128xf32>
    %515 = vector.broadcast %513 : vector<8x1xf32> to vector<8x128xf32>
    %516 = arith.mulf %515, %514 : vector<8x128xf32>
    %517 = arith.addf %512, %516 : vector<8x128xf32>
    %518 = vector.extract_strided_slice %482 {offsets = [0, 7], sizes = [8, 1], strides = [1, 1]} : vector<8x32xf32> to vector<8x1xf32>
    %519 = vector.extract_strided_slice %480 {offsets = [0, 896], sizes = [8, 128], strides = [1, 1]} : vector<8x4096xf32> to vector<8x128xf32>
    %520 = vector.broadcast %518 : vector<8x1xf32> to vector<8x128xf32>
    %521 = arith.mulf %520, %519 : vector<8x128xf32>
    %522 = arith.addf %517, %521 : vector<8x128xf32>
    %523 = vector.extract_strided_slice %482 {offsets = [0, 8], sizes = [8, 1], strides = [1, 1]} : vector<8x32xf32> to vector<8x1xf32>
    %524 = vector.extract_strided_slice %480 {offsets = [0, 1024], sizes = [8, 128], strides = [1, 1]} : vector<8x4096xf32> to vector<8x128xf32>
    %525 = vector.broadcast %523 : vector<8x1xf32> to vector<8x128xf32>
    %526 = arith.mulf %525, %524 : vector<8x128xf32>
    %527 = arith.addf %522, %526 : vector<8x128xf32>
    %528 = vector.extract_strided_slice %482 {offsets = [0, 9], sizes = [8, 1], strides = [1, 1]} : vector<8x32xf32> to vector<8x1xf32>
    %529 = vector.extract_strided_slice %480 {offsets = [0, 1152], sizes = [8, 128], strides = [1, 1]} : vector<8x4096xf32> to vector<8x128xf32>
    %530 = vector.broadcast %528 : vector<8x1xf32> to vector<8x128xf32>
    %531 = arith.mulf %530, %529 : vector<8x128xf32>
    %532 = arith.addf %527, %531 : vector<8x128xf32>
    %533 = vector.extract_strided_slice %482 {offsets = [0, 10], sizes = [8, 1], strides = [1, 1]} : vector<8x32xf32> to vector<8x1xf32>
    %534 = vector.extract_strided_slice %480 {offsets = [0, 1280], sizes = [8, 128], strides = [1, 1]} : vector<8x4096xf32> to vector<8x128xf32>
    %535 = vector.broadcast %533 : vector<8x1xf32> to vector<8x128xf32>
    %536 = arith.mulf %535, %534 : vector<8x128xf32>
    %537 = arith.addf %532, %536 : vector<8x128xf32>
    %538 = vector.extract_strided_slice %482 {offsets = [0, 11], sizes = [8, 1], strides = [1, 1]} : vector<8x32xf32> to vector<8x1xf32>
    %539 = vector.extract_strided_slice %480 {offsets = [0, 1408], sizes = [8, 128], strides = [1, 1]} : vector<8x4096xf32> to vector<8x128xf32>
    %540 = vector.broadcast %538 : vector<8x1xf32> to vector<8x128xf32>
    %541 = arith.mulf %540, %539 : vector<8x128xf32>
    %542 = arith.addf %537, %541 : vector<8x128xf32>
    %543 = vector.extract_strided_slice %482 {offsets = [0, 12], sizes = [8, 1], strides = [1, 1]} : vector<8x32xf32> to vector<8x1xf32>
    %544 = vector.extract_strided_slice %480 {offsets = [0, 1536], sizes = [8, 128], strides = [1, 1]} : vector<8x4096xf32> to vector<8x128xf32>
    %545 = vector.broadcast %543 : vector<8x1xf32> to vector<8x128xf32>
    %546 = arith.mulf %545, %544 : vector<8x128xf32>
    %547 = arith.addf %542, %546 : vector<8x128xf32>
    %548 = vector.extract_strided_slice %482 {offsets = [0, 13], sizes = [8, 1], strides = [1, 1]} : vector<8x32xf32> to vector<8x1xf32>
    %549 = vector.extract_strided_slice %480 {offsets = [0, 1664], sizes = [8, 128], strides = [1, 1]} : vector<8x4096xf32> to vector<8x128xf32>
    %550 = vector.broadcast %548 : vector<8x1xf32> to vector<8x128xf32>
    %551 = arith.mulf %550, %549 : vector<8x128xf32>
    %552 = arith.addf %547, %551 : vector<8x128xf32>
    %553 = vector.extract_strided_slice %482 {offsets = [0, 14], sizes = [8, 1], strides = [1, 1]} : vector<8x32xf32> to vector<8x1xf32>
    %554 = vector.extract_strided_slice %480 {offsets = [0, 1792], sizes = [8, 128], strides = [1, 1]} : vector<8x4096xf32> to vector<8x128xf32>
    %555 = vector.broadcast %553 : vector<8x1xf32> to vector<8x128xf32>
    %556 = arith.mulf %555, %554 : vector<8x128xf32>
    %557 = arith.addf %552, %556 : vector<8x128xf32>
    %558 = vector.extract_strided_slice %482 {offsets = [0, 15], sizes = [8, 1], strides = [1, 1]} : vector<8x32xf32> to vector<8x1xf32>
    %559 = vector.extract_strided_slice %480 {offsets = [0, 1920], sizes = [8, 128], strides = [1, 1]} : vector<8x4096xf32> to vector<8x128xf32>
    %560 = vector.broadcast %558 : vector<8x1xf32> to vector<8x128xf32>
    %561 = arith.mulf %560, %559 : vector<8x128xf32>
    %562 = arith.addf %557, %561 : vector<8x128xf32>
    %563 = vector.extract_strided_slice %482 {offsets = [0, 16], sizes = [8, 1], strides = [1, 1]} : vector<8x32xf32> to vector<8x1xf32>
    %564 = vector.extract_strided_slice %480 {offsets = [0, 2048], sizes = [8, 128], strides = [1, 1]} : vector<8x4096xf32> to vector<8x128xf32>
    %565 = vector.broadcast %563 : vector<8x1xf32> to vector<8x128xf32>
    %566 = arith.mulf %565, %564 : vector<8x128xf32>
    %567 = arith.addf %562, %566 : vector<8x128xf32>
    %568 = vector.extract_strided_slice %482 {offsets = [0, 17], sizes = [8, 1], strides = [1, 1]} : vector<8x32xf32> to vector<8x1xf32>
    %569 = vector.extract_strided_slice %480 {offsets = [0, 2176], sizes = [8, 128], strides = [1, 1]} : vector<8x4096xf32> to vector<8x128xf32>
    %570 = vector.broadcast %568 : vector<8x1xf32> to vector<8x128xf32>
    %571 = arith.mulf %570, %569 : vector<8x128xf32>
    %572 = arith.addf %567, %571 : vector<8x128xf32>
    %573 = vector.extract_strided_slice %482 {offsets = [0, 18], sizes = [8, 1], strides = [1, 1]} : vector<8x32xf32> to vector<8x1xf32>
    %574 = vector.extract_strided_slice %480 {offsets = [0, 2304], sizes = [8, 128], strides = [1, 1]} : vector<8x4096xf32> to vector<8x128xf32>
    %575 = vector.broadcast %573 : vector<8x1xf32> to vector<8x128xf32>
    %576 = arith.mulf %575, %574 : vector<8x128xf32>
    %577 = arith.addf %572, %576 : vector<8x128xf32>
    %578 = vector.extract_strided_slice %482 {offsets = [0, 19], sizes = [8, 1], strides = [1, 1]} : vector<8x32xf32> to vector<8x1xf32>
    %579 = vector.extract_strided_slice %480 {offsets = [0, 2432], sizes = [8, 128], strides = [1, 1]} : vector<8x4096xf32> to vector<8x128xf32>
    %580 = vector.broadcast %578 : vector<8x1xf32> to vector<8x128xf32>
    %581 = arith.mulf %580, %579 : vector<8x128xf32>
    %582 = arith.addf %577, %581 : vector<8x128xf32>
    %583 = vector.extract_strided_slice %482 {offsets = [0, 20], sizes = [8, 1], strides = [1, 1]} : vector<8x32xf32> to vector<8x1xf32>
    %584 = vector.extract_strided_slice %480 {offsets = [0, 2560], sizes = [8, 128], strides = [1, 1]} : vector<8x4096xf32> to vector<8x128xf32>
    %585 = vector.broadcast %583 : vector<8x1xf32> to vector<8x128xf32>
    %586 = arith.mulf %585, %584 : vector<8x128xf32>
    %587 = arith.addf %582, %586 : vector<8x128xf32>
    %588 = vector.extract_strided_slice %482 {offsets = [0, 21], sizes = [8, 1], strides = [1, 1]} : vector<8x32xf32> to vector<8x1xf32>
    %589 = vector.extract_strided_slice %480 {offsets = [0, 2688], sizes = [8, 128], strides = [1, 1]} : vector<8x4096xf32> to vector<8x128xf32>
    %590 = vector.broadcast %588 : vector<8x1xf32> to vector<8x128xf32>
    %591 = arith.mulf %590, %589 : vector<8x128xf32>
    %592 = arith.addf %587, %591 : vector<8x128xf32>
    %593 = vector.extract_strided_slice %482 {offsets = [0, 22], sizes = [8, 1], strides = [1, 1]} : vector<8x32xf32> to vector<8x1xf32>
    %594 = vector.extract_strided_slice %480 {offsets = [0, 2816], sizes = [8, 128], strides = [1, 1]} : vector<8x4096xf32> to vector<8x128xf32>
    %595 = vector.broadcast %593 : vector<8x1xf32> to vector<8x128xf32>
    %596 = arith.mulf %595, %594 : vector<8x128xf32>
    %597 = arith.addf %592, %596 : vector<8x128xf32>
    %598 = vector.extract_strided_slice %482 {offsets = [0, 23], sizes = [8, 1], strides = [1, 1]} : vector<8x32xf32> to vector<8x1xf32>
    %599 = vector.extract_strided_slice %480 {offsets = [0, 2944], sizes = [8, 128], strides = [1, 1]} : vector<8x4096xf32> to vector<8x128xf32>
    %600 = vector.broadcast %598 : vector<8x1xf32> to vector<8x128xf32>
    %601 = arith.mulf %600, %599 : vector<8x128xf32>
    %602 = arith.addf %597, %601 : vector<8x128xf32>
    %603 = vector.extract_strided_slice %482 {offsets = [0, 24], sizes = [8, 1], strides = [1, 1]} : vector<8x32xf32> to vector<8x1xf32>
    %604 = vector.extract_strided_slice %480 {offsets = [0, 3072], sizes = [8, 128], strides = [1, 1]} : vector<8x4096xf32> to vector<8x128xf32>
    %605 = vector.broadcast %603 : vector<8x1xf32> to vector<8x128xf32>
    %606 = arith.mulf %605, %604 : vector<8x128xf32>
    %607 = arith.addf %602, %606 : vector<8x128xf32>
    %608 = vector.extract_strided_slice %482 {offsets = [0, 25], sizes = [8, 1], strides = [1, 1]} : vector<8x32xf32> to vector<8x1xf32>
    %609 = vector.extract_strided_slice %480 {offsets = [0, 3200], sizes = [8, 128], strides = [1, 1]} : vector<8x4096xf32> to vector<8x128xf32>
    %610 = vector.broadcast %608 : vector<8x1xf32> to vector<8x128xf32>
    %611 = arith.mulf %610, %609 : vector<8x128xf32>
    %612 = arith.addf %607, %611 : vector<8x128xf32>
    %613 = vector.extract_strided_slice %482 {offsets = [0, 26], sizes = [8, 1], strides = [1, 1]} : vector<8x32xf32> to vector<8x1xf32>
    %614 = vector.extract_strided_slice %480 {offsets = [0, 3328], sizes = [8, 128], strides = [1, 1]} : vector<8x4096xf32> to vector<8x128xf32>
    %615 = vector.broadcast %613 : vector<8x1xf32> to vector<8x128xf32>
    %616 = arith.mulf %615, %614 : vector<8x128xf32>
    %617 = arith.addf %612, %616 : vector<8x128xf32>
    %618 = vector.extract_strided_slice %482 {offsets = [0, 27], sizes = [8, 1], strides = [1, 1]} : vector<8x32xf32> to vector<8x1xf32>
    %619 = vector.extract_strided_slice %480 {offsets = [0, 3456], sizes = [8, 128], strides = [1, 1]} : vector<8x4096xf32> to vector<8x128xf32>
    %620 = vector.broadcast %618 : vector<8x1xf32> to vector<8x128xf32>
    %621 = arith.mulf %620, %619 : vector<8x128xf32>
    %622 = arith.addf %617, %621 : vector<8x128xf32>
    %623 = vector.extract_strided_slice %482 {offsets = [0, 28], sizes = [8, 1], strides = [1, 1]} : vector<8x32xf32> to vector<8x1xf32>
    %624 = vector.extract_strided_slice %480 {offsets = [0, 3584], sizes = [8, 128], strides = [1, 1]} : vector<8x4096xf32> to vector<8x128xf32>
    %625 = vector.broadcast %623 : vector<8x1xf32> to vector<8x128xf32>
    %626 = arith.mulf %625, %624 : vector<8x128xf32>
    %627 = arith.addf %622, %626 : vector<8x128xf32>
    %628 = vector.extract_strided_slice %482 {offsets = [0, 29], sizes = [8, 1], strides = [1, 1]} : vector<8x32xf32> to vector<8x1xf32>
    %629 = vector.extract_strided_slice %480 {offsets = [0, 3712], sizes = [8, 128], strides = [1, 1]} : vector<8x4096xf32> to vector<8x128xf32>
    %630 = vector.broadcast %628 : vector<8x1xf32> to vector<8x128xf32>
    %631 = arith.mulf %630, %629 : vector<8x128xf32>
    %632 = arith.addf %627, %631 : vector<8x128xf32>
    %633 = vector.extract_strided_slice %482 {offsets = [0, 30], sizes = [8, 1], strides = [1, 1]} : vector<8x32xf32> to vector<8x1xf32>
    %634 = vector.extract_strided_slice %480 {offsets = [0, 3840], sizes = [8, 128], strides = [1, 1]} : vector<8x4096xf32> to vector<8x128xf32>
    %635 = vector.broadcast %633 : vector<8x1xf32> to vector<8x128xf32>
    %636 = arith.mulf %635, %634 : vector<8x128xf32>
    %637 = arith.addf %632, %636 : vector<8x128xf32>
    %638 = vector.extract_strided_slice %482 {offsets = [0, 31], sizes = [8, 1], strides = [1, 1]} : vector<8x32xf32> to vector<8x1xf32>
    %639 = vector.extract_strided_slice %480 {offsets = [0, 3968], sizes = [8, 128], strides = [1, 1]} : vector<8x4096xf32> to vector<8x128xf32>
    %640 = vector.broadcast %638 : vector<8x1xf32> to vector<8x128xf32>
    %641 = arith.mulf %640, %639 : vector<8x128xf32>
    %642 = arith.addf %637, %641 : vector<8x128xf32>
    %c0_96 = arith.constant 0 : index
    %c0_97 = arith.constant 0 : index
    %643 = vector.load %arg26[%c0_96, %c0_97] : memref<1x128xf32, #tpu.memory_space<vmem>>, vector<1x128xf32>
    %644 = vector.broadcast %643 : vector<1x128xf32> to vector<8x128xf32>
    %645 = arith.addf %642, %644 : vector<8x128xf32>
    %cst_98 = arith.constant 0.000000e+00 : f32
    %646 = vector.broadcast %cst_98 : f32 to vector<8x128xf32>
    %647 = arith.maximumf %645, %646 : vector<8x128xf32>
    %648 = arith.truncf %647 : vector<8x128xf32> to vector<8x128xbf16>
    %c0_99 = arith.constant 0 : index
    %c0_100 = arith.constant 0 : index
    %649 = vector.load %arg27[%c0_99, %c0_100] : memref<128x32xbf16, #tpu.memory_space<vmem>>, vector<128x32xbf16>
    %cst_101 = arith.constant dense<0.000000e+00> : vector<8x32xf32>
    %650 = tpu.matmul %648, %649, %cst_101 {dimension_numbers = #tpu.dot_dimension_numbers<[1], [0], [0], [1], [0, 0, 1, 1], [], []>} : vector<8x128xbf16>, vector<128x32xbf16>, vector<8x32xf32> -> vector<8x32xf32>
    %c0_102 = arith.constant 0 : index
    %c0_103 = arith.constant 0 : index
    %651 = vector.load %arg28[%c0_102, %c0_103] : memref<1x32xf32, #tpu.memory_space<vmem>>, vector<1x32xf32>
    %652 = vector.broadcast %651 : vector<1x32xf32> to vector<8x32xf32>
    %653 = arith.addf %650, %652 : vector<8x32xf32>
    %654 = arith.truncf %653 : vector<8x32xf32> to vector<8x32xbf16>
    %c0_104 = arith.constant 0 : index
    %c0_105 = arith.constant 0 : index
    %655 = vector.load %arg29[%c0_104, %c0_105] : memref<32x32xbf16, #tpu.memory_space<vmem>>, vector<32x32xbf16>
    %cst_106 = arith.constant dense<0.000000e+00> : vector<8x32xf32>
    %656 = tpu.matmul %654, %655, %cst_106 {dimension_numbers = #tpu.dot_dimension_numbers<[1], [0], [0], [1], [0, 0, 1, 1], [], []>} : vector<8x32xbf16>, vector<32x32xbf16>, vector<8x32xf32> -> vector<8x32xf32>
    %c0_107 = arith.constant 0 : index
    %c0_108 = arith.constant 0 : index
    %657 = vector.load %arg30[%c0_107, %c0_108] : memref<1x32xf32, #tpu.memory_space<vmem>>, vector<1x32xf32>
    %658 = vector.broadcast %657 : vector<1x32xf32> to vector<8x32xf32>
    %659 = arith.addf %656, %658 : vector<8x32xf32>
    %cst_109 = arith.constant 0.000000e+00 : f32
    %660 = vector.broadcast %cst_109 : f32 to vector<8x32xf32>
    %661 = arith.maximumf %659, %660 : vector<8x32xf32>
    %662 = arith.truncf %661 : vector<8x32xf32> to vector<8x32xbf16>
    %c0_110 = arith.constant 0 : index
    %c0_111 = arith.constant 0 : index
    %663 = vector.load %arg31[%c0_110, %c0_111] : memref<32x32xbf16, #tpu.memory_space<vmem>>, vector<32x32xbf16>
    %cst_112 = arith.constant dense<0.000000e+00> : vector<8x32xf32>
    %664 = tpu.matmul %662, %663, %cst_112 {dimension_numbers = #tpu.dot_dimension_numbers<[1], [0], [0], [1], [0, 0, 1, 1], [], []>} : vector<8x32xbf16>, vector<32x32xbf16>, vector<8x32xf32> -> vector<8x32xf32>
    %c0_113 = arith.constant 0 : index
    %c0_114 = arith.constant 0 : index
    %665 = vector.load %arg32[%c0_113, %c0_114] : memref<1x32xf32, #tpu.memory_space<vmem>>, vector<1x32xf32>
    %666 = vector.broadcast %665 : vector<1x32xf32> to vector<8x32xf32>
    %667 = arith.addf %664, %666 : vector<8x32xf32>
    %c0_115 = arith.constant 0 : index
    %c0_116 = arith.constant 0 : index
    %668 = vector.load %arg33[%c0_115, %c0_116] : memref<1x32xf32, #tpu.memory_space<vmem>>, vector<1x32xf32>
    %c0_117 = arith.constant 0 : index
    %c0_118 = arith.constant 0 : index
    %669 = vector.load %arg34[%c0_117, %c0_118] : memref<1x32xf32, #tpu.memory_space<vmem>>, vector<1x32xf32>
    %cst_119 = arith.constant dense<0.000000e+00> : vector<8xf32>
    %670 = vector.multi_reduction <add>, %667, %cst_119 [1] : vector<8x32xf32> to vector<8xf32>
    %671 = vector.shape_cast %670 : vector<8xf32> to vector<8x1xf32>
    %cst_120 = arith.constant 3.200000e+01 : f32
    %672 = vector.broadcast %cst_120 : f32 to vector<8x1xf32>
    %673 = arith.divf %671, %672 : vector<8x1xf32>
    %674 = vector.broadcast %673 : vector<8x1xf32> to vector<8x32xf32>
    %675 = arith.subf %667, %674 : vector<8x32xf32>
    %676 = arith.mulf %675, %675 : vector<8x32xf32>
    %cst_121 = arith.constant dense<0.000000e+00> : vector<8xf32>
    %677 = vector.multi_reduction <add>, %676, %cst_121 [1] : vector<8x32xf32> to vector<8xf32>
    %678 = vector.shape_cast %677 : vector<8xf32> to vector<8x1xf32>
    %cst_122 = arith.constant 3.200000e+01 : f32
    %679 = vector.broadcast %cst_122 : f32 to vector<8x1xf32>
    %680 = arith.divf %678, %679 : vector<8x1xf32>
    %cst_123 = arith.constant 9.99999974E-6 : f32
    %681 = vector.broadcast %cst_123 : f32 to vector<8x1xf32>
    %682 = arith.addf %680, %681 : vector<8x1xf32>
    %683 = math.rsqrt %682 : vector<8x1xf32>
    %684 = vector.broadcast %683 : vector<8x1xf32> to vector<8x32xf32>
    %685 = arith.mulf %675, %684 : vector<8x32xf32>
    %686 = vector.broadcast %668 : vector<1x32xf32> to vector<8x32xf32>
    %687 = arith.mulf %685, %686 : vector<8x32xf32>
    %688 = vector.broadcast %669 : vector<1x32xf32> to vector<8x32xf32>
    %689 = arith.addf %687, %688 : vector<8x32xf32>
    %c0_124 = arith.constant 0 : index
    %c0_125 = arith.constant 0 : index
    %690 = vector.load %arg35[%c0_124, %c0_125] : memref<8x32xf32, #tpu.memory_space<vmem>>, vector<8x32xf32>
    tpu.vector_store %arg35[%c0_124, %c0_125], %689 {strides = array<i32>} : memref<8x32xf32, #tpu.memory_space<vmem>>, vector<8x32xf32>,
    return
  }
  func.func @transform_0(%arg0: i32) -> (i32, i32) {
    %c0_i32 = arith.constant 0 : i32
    %c0_i32_0 = arith.constant 0 : i32
    %c0_i32_1 = arith.constant 0 : i32
    return %c0_i32, %c0_i32_0 : i32, i32
  }
  func.func @transform_1(%arg0: i32) -> (i32, i32) {
    %c0_i32 = arith.constant 0 : i32
    %c0_i32_0 = arith.constant 0 : i32
    return %arg0, %c0_i32 : i32, i32
  }
  func.func @transform_2(%arg0: i32) -> (i32, i32) {
    %c0_i32 = arith.constant 0 : i32
    %c0_i32_0 = arith.constant 0 : i32
    return %arg0, %c0_i32 : i32, i32
  }
  func.func @transform_3(%arg0: i32) -> (i32, i32) {
    %c0_i32 = arith.constant 0 : i32
    %c0_i32_0 = arith.constant 0 : i32
    return %arg0, %c0_i32 : i32, i32
  }
  func.func @transform_4(%arg0: i32) -> (i32, i32) {
    %c0_i32 = arith.constant 0 : i32
    %c0_i32_0 = arith.constant 0 : i32
    %c0_i32_1 = arith.constant 0 : i32
    return %c0_i32, %c0_i32_0 : i32, i32
  }
  func.func @transform_5(%arg0: i32) -> (i32, i32) {
    %c0_i32 = arith.constant 0 : i32
    %c0_i32_0 = arith.constant 0 : i32
    %c0_i32_1 = arith.constant 0 : i32
    return %c0_i32, %c0_i32_0 : i32, i32
  }
  func.func @transform_6(%arg0: i32) -> (i32, i32) {
    %c0_i32 = arith.constant 0 : i32
    %c0_i32_0 = arith.constant 0 : i32
    %c0_i32_1 = arith.constant 0 : i32
    return %c0_i32, %c0_i32_0 : i32, i32
  }
  func.func @transform_7(%arg0: i32) -> (i32, i32) {
    %c0_i32 = arith.constant 0 : i32
    %c0_i32_0 = arith.constant 0 : i32
    %c0_i32_1 = arith.constant 0 : i32
    return %c0_i32, %c0_i32_0 : i32, i32
  }
  func.func @transform_8(%arg0: i32) -> (i32, i32) {
    %c0_i32 = arith.constant 0 : i32
    %c0_i32_0 = arith.constant 0 : i32
    %c0_i32_1 = arith.constant 0 : i32
    return %c0_i32, %c0_i32_0 : i32, i32
  }
  func.func @transform_9(%arg0: i32) -> (i32, i32) {
    %c0_i32 = arith.constant 0 : i32
    %c0_i32_0 = arith.constant 0 : i32
    %c0_i32_1 = arith.constant 0 : i32
    return %c0_i32, %c0_i32_0 : i32, i32
  }
  func.func @transform_10(%arg0: i32) -> (i32, i32) {
    %c0_i32 = arith.constant 0 : i32
    %c0_i32_0 = arith.constant 0 : i32
    %c0_i32_1 = arith.constant 0 : i32
    return %c0_i32, %c0_i32_0 : i32, i32
  }
  func.func @transform_11(%arg0: i32) -> (i32, i32) {
    %c0_i32 = arith.constant 0 : i32
    %c0_i32_0 = arith.constant 0 : i32
    %c0_i32_1 = arith.constant 0 : i32
    return %c0_i32, %c0_i32_0 : i32, i32
  }
  func.func @transform_12(%arg0: i32) -> (i32, i32) {
    %c0_i32 = arith.constant 0 : i32
    %c0_i32_0 = arith.constant 0 : i32
    %c0_i32_1 = arith.constant 0 : i32
    return %c0_i32, %c0_i32_0 : i32, i32
  }
  func.func @transform_13(%arg0: i32) -> (i32, i32) {
    %c0_i32 = arith.constant 0 : i32
    %c0_i32_0 = arith.constant 0 : i32
    %c0_i32_1 = arith.constant 0 : i32
    return %c0_i32, %c0_i32_0 : i32, i32
  }
  func.func @transform_14(%arg0: i32) -> (i32, i32) {
    %c0_i32 = arith.constant 0 : i32
    %c0_i32_0 = arith.constant 0 : i32
    %c0_i32_1 = arith.constant 0 : i32
    return %c0_i32, %c0_i32_0 : i32, i32
  }
  func.func @transform_15(%arg0: i32) -> (i32, i32) {
    %c0_i32 = arith.constant 0 : i32
    %c0_i32_0 = arith.constant 0 : i32
    %c0_i32_1 = arith.constant 0 : i32
    return %c0_i32, %c0_i32_0 : i32, i32
  }
  func.func @transform_16(%arg0: i32) -> (i32, i32) {
    %c0_i32 = arith.constant 0 : i32
    %c0_i32_0 = arith.constant 0 : i32
    %c0_i32_1 = arith.constant 0 : i32
    return %c0_i32, %c0_i32_0 : i32, i32
  }
  func.func @transform_17(%arg0: i32) -> (i32, i32) {
    %c0_i32 = arith.constant 0 : i32
    %c0_i32_0 = arith.constant 0 : i32
    %c0_i32_1 = arith.constant 0 : i32
    return %c0_i32, %c0_i32_0 : i32, i32
  }
  func.func @transform_18(%arg0: i32) -> (i32, i32) {
    %c0_i32 = arith.constant 0 : i32
    %c0_i32_0 = arith.constant 0 : i32
    %c0_i32_1 = arith.constant 0 : i32
    return %c0_i32, %c0_i32_0 : i32, i32
  }
  func.func @transform_19(%arg0: i32) -> (i32, i32) {
    %c0_i32 = arith.constant 0 : i32
    %c0_i32_0 = arith.constant 0 : i32
    %c0_i32_1 = arith.constant 0 : i32
    return %c0_i32, %c0_i32_0 : i32, i32
  }
  func.func @transform_20(%arg0: i32) -> (i32, i32) {
    %c0_i32 = arith.constant 0 : i32
    %c0_i32_0 = arith.constant 0 : i32
    %c0_i32_1 = arith.constant 0 : i32
    return %c0_i32, %c0_i32_0 : i32, i32
  }
  func.func @transform_21(%arg0: i32) -> (i32, i32) {
    %c0_i32 = arith.constant 0 : i32
    %c0_i32_0 = arith.constant 0 : i32
    %c0_i32_1 = arith.constant 0 : i32
    return %c0_i32, %c0_i32_0 : i32, i32
  }
  func.func @transform_22(%arg0: i32) -> (i32, i32) {
    %c0_i32 = arith.constant 0 : i32
    %c0_i32_0 = arith.constant 0 : i32
    %c0_i32_1 = arith.constant 0 : i32
    return %c0_i32, %c0_i32_0 : i32, i32
  }
  func.func @transform_23(%arg0: i32) -> (i32, i32) {
    %c0_i32 = arith.constant 0 : i32
    %c0_i32_0 = arith.constant 0 : i32
    %c0_i32_1 = arith.constant 0 : i32
    return %c0_i32, %c0_i32_0 : i32, i32
  }
  func.func @transform_24(%arg0: i32) -> (i32, i32) {
    %c0_i32 = arith.constant 0 : i32
    %c0_i32_0 = arith.constant 0 : i32
    %c0_i32_1 = arith.constant 0 : i32
    return %c0_i32, %c0_i32_0 : i32, i32
  }
  func.func @transform_25(%arg0: i32) -> (i32, i32) {
    %c0_i32 = arith.constant 0 : i32
    %c0_i32_0 = arith.constant 0 : i32
    %c0_i32_1 = arith.constant 0 : i32
    return %c0_i32, %c0_i32_0 : i32, i32
  }
  func.func @transform_26(%arg0: i32) -> (i32, i32) {
    %c0_i32 = arith.constant 0 : i32
    %c0_i32_0 = arith.constant 0 : i32
    %c0_i32_1 = arith.constant 0 : i32
    return %c0_i32, %c0_i32_0 : i32, i32
  }
  func.func @transform_27(%arg0: i32) -> (i32, i32) {
    %c0_i32 = arith.constant 0 : i32
    %c0_i32_0 = arith.constant 0 : i32
    %c0_i32_1 = arith.constant 0 : i32
    return %c0_i32, %c0_i32_0 : i32, i32
  }
  func.func @transform_28(%arg0: i32) -> (i32, i32) {
    %c0_i32 = arith.constant 0 : i32
    %c0_i32_0 = arith.constant 0 : i32
    %c0_i32_1 = arith.constant 0 : i32
    return %c0_i32, %c0_i32_0 : i32, i32
  }
  func.func @transform_29(%arg0: i32) -> (i32, i32) {
    %c0_i32 = arith.constant 0 : i32
    %c0_i32_0 = arith.constant 0 : i32
    %c0_i32_1 = arith.constant 0 : i32
    return %c0_i32, %c0_i32_0 : i32, i32
  }
  func.func @transform_30(%arg0: i32) -> (i32, i32) {
    %c0_i32 = arith.constant 0 : i32
    %c0_i32_0 = arith.constant 0 : i32
    %c0_i32_1 = arith.constant 0 : i32
    return %c0_i32, %c0_i32_0 : i32, i32
  }
  func.func @transform_31(%arg0: i32) -> (i32, i32) {
    %c0_i32 = arith.constant 0 : i32
    %c0_i32_0 = arith.constant 0 : i32
    %c0_i32_1 = arith.constant 0 : i32
    return %c0_i32, %c0_i32_0 : i32, i32
  }
  func.func @transform_32(%arg0: i32) -> (i32, i32) {
    %c0_i32 = arith.constant 0 : i32
    %c0_i32_0 = arith.constant 0 : i32
    %c0_i32_1 = arith.constant 0 : i32
    return %c0_i32, %c0_i32_0 : i32, i32
  }
  func.func @transform_33(%arg0: i32) -> (i32, i32) {
    %c0_i32 = arith.constant 0 : i32
    %c0_i32_0 = arith.constant 0 : i32
    %c0_i32_1 = arith.constant 0 : i32
    return %c0_i32, %c0_i32_0 : i32, i32
  }
  func.func @transform_34(%arg0: i32) -> (i32, i32) {
    %c0_i32 = arith.constant 0 : i32
    %c0_i32_0 = arith.constant 0 : i32
    return %arg0, %c0_i32 : i32, i32
  }
  func.func @transform_35(%arg0: i32) -> (i32, i32) {
    %c0_i32 = arith.constant 0 : i32
    %c0_i32_0 = arith.constant 0 : i32
    return %arg0, %c0_i32 : i32, i32
  }
  func.func @transform_36(%arg0: i32) -> (i32, i32) {
    %c0_i32 = arith.constant 0 : i32
    %c0_i32_0 = arith.constant 0 : i32
    return %arg0, %c0_i32 : i32, i32
  }
  func.func @transform_37(%arg0: i32) -> (i32, i32) {
    %c0_i32 = arith.constant 0 : i32
    %c0_i32_0 = arith.constant 0 : i32
    return %arg0, %c0_i32 : i32, i32
  }
}

</mosaic_0001>

<bundles_post_ra>
// kernel: tpu_custom_call.1
= control target key start
LH: loop header
LB: loop body
LE: loop exit
PB: predicated region body
PF: predicated region fallthrough
CT: control target
= control target key end

     0   :  { %s5756_s6 = smov 1   ;;  %s5757_s10 = smov 2   ;;  %s6863_s0 = inlined_call_operand.smem [shape: u32[38], index: -1, kind: input, shape index: {}] }
   0x1   :  { %s5845_s5 = sld [smem:[%s6863_s0]]   ;;  %s5758_s14 = smov 3  }
   0x2   :  { %s5850_s9 = sld [smem:[%s6863_s0 + %s5756_s6]]   ;;  %s5759_s18 = smov 4  }
   0x3   :  { %s5855_s13 = sld [smem:[%s6863_s0 + %s5757_s10]]   ;;  %s5760_s22 = smov 5  }
   0x4   :  { %s5860_s17 = sld [smem:[%s6863_s0 + %s5758_s14]]   ;;  %s5761_s26 = smov 6  }
   0x5   :  { %s5865_s21 = sld [smem:[%s6863_s0 + %s5759_s18]]   ;;  %s5762_s30 = smov 7  }
   0x6   :  { %s5870_s25 = sld [smem:[%s6863_s0 + %s5760_s22]]   ;;  %s5763_s4 = smov 8  }
   0x7   :  { %s5875_s29 = sld [smem:[%s6863_s0 + %s5761_s26]]   ;;  %s5764_s10 = smov 9  }
   0x8   :  { %s5880_s3 = sld [smem:[%s6863_s0 + %s5762_s30]]   ;;  %s5765_s15 = smov 10  }
   0x9   :  { %s5885_s8 = sld [smem:[%s6863_s0 + %s5763_s4]]   ;;  %s5766_s20 = smov 11  }
   0xa   :  { %6916 = sst [smem:[#allocation22_spill]] %s5860_s17  ;;  %s5767_s26 = smov 12  }
   0xb   :  { %s5890_s14 = sld [smem:[%s6863_s0 + %s5764_s10]]   ;;  %s5768_s1 = smov 13  }
   0xc   :  { %s5895_s19 = sld [smem:[%s6863_s0 + %s5765_s15]]   ;;  %s5769_s7 = smov 14  }
   0xd   :  { %s5900_s24 = sld [smem:[%s6863_s0 + %s5766_s20]]   ;;  %s5770_s15 = smov 15  }
   0xe   :  { %s5905_s30 = sld [smem:[%s6863_s0 + %s5767_s26]]   ;;  %s5771_s22 = smov 16  }
   0xf   :  { %6917 = sst [smem:[#allocation23_spill]] %s5885_s8  ;;  %s5772_s28 = smov 17  }
  0x10   :  { %s5910_s6 = sld [smem:[%s6863_s0 + %s5768_s1]]  }
  0x11   :  { %6918 = sst [smem:[#allocation24_spill]] %s5890_s14 }
  0x12   :  { %s5915_s12 = sld [smem:[%s6863_s0 + %s5769_s7]]   ;;  %s5773_s7 = smov 18  }
  0x13   :  { %s5920_s20 = sld [smem:[%s6863_s0 + %s5770_s15]]   ;;  %s5774_s15 = smov 19  }
  0x14   :  { %s5925_s27 = sld [smem:[%s6863_s0 + %s5771_s22]]   ;;  %s5775_s22 = smov 20  }
  0x15   :  { %s5930_s4 = sld [smem:[%s6863_s0 + %s5772_s28]]   ;;  %s5776_s28 = smov 21  }
  0x16   :  { %6919 = sst [smem:[#allocation25_spill]] %s5910_s6 }
  0x17   :  { %s5950_s14 = sld [smem:[%s6863_s0 + %s5776_s28]]   ;;  %s5780_s28 = smov 25  }
  0x18   :  { %6920 = sst [smem:[#allocation26_spill]] %s5915_s12 }
  0x19   :  { %6921 = sst [smem:[#allocation27_spill]] %s5920_s20 }
  0x1a   :  { %6922 = sst [smem:[#allocation28_spill]] %s5925_s27 }
  0x1b   :  { %s5935_s12 = sld [smem:[%s6863_s0 + %s5773_s7]]   ;;  %s5777_s7 = smov 22  }
  0x1c   :  { %s5940_s20 = sld [smem:[%s6863_s0 + %s5774_s15]]   ;;  %s5778_s15 = smov 23  }
  0x1d   :  { %s5945_s27 = sld [smem:[%s6863_s0 + %s5775_s22]]   ;;  %s5779_s22 = smov 24  }
  0x1e   :  { %6926 = sst [smem:[#allocation32_spill]] %s5950_s14 }
  0x1f   :  { %s5955_s8 = sld [smem:[%s6863_s0 + %s5777_s7]]   ;;  %s5781_s7 = smov 26  }
  0x20   :  { %s5970_s14 = sld [smem:[%s6863_s0 + %s5780_s28]]   ;;  %s5784_s28 = smov 29  }
  0x21   :  { %6923 = sst [smem:[#allocation29_spill]] %s5935_s12 }
  0x22   :  { %6924 = sst [smem:[#allocation30_spill]] %s5940_s20 }
  0x23   :  { %6925 = sst [smem:[#allocation31_spill]] %s5945_s27 }
  0x24   :  { %s5960_s20 = sld [smem:[%s6863_s0 + %s5778_s15]]   ;;  %s5782_s15 = smov 27  }
  0x25   :  { %s5965_s27 = sld [smem:[%s6863_s0 + %s5779_s22]]   ;;  %s5783_s22 = smov 28  }
  0x26   :  { %6927 = sst [smem:[#allocation33_spill]] %s5970_s14 }
  0x27   :  { %s5975_s12 = sld [smem:[%s6863_s0 + %s5781_s7]]   ;;  %s5785_s7 = smov 30  }
  0x28   :  { %s5980_s17 = sld [smem:[%s6863_s0 + %s5782_s15]]   ;;  %s5786_s15 = smov 31  }
  0x29   :  { %s5985_s6 = sld [smem:[%s6863_s0 + %s5783_s22]]   ;;  %s5787_s22 = smov 32  }
  0x2a   :  { %s5990_s14 = sld [smem:[%s6863_s0 + %s5784_s28]]   ;;  %s5788_s28 = smov 33  }
  0x2d   :  { %6928 = sst [smem:[#allocation34_spill]] %s5975_s12 }
  0x2e   :  { %6929 = sst [smem:[#allocation35_spill]] %s5980_s17 }
  0x2f   :  { %6930 = sst [smem:[#allocation36_spill]] %s5985_s6 }
  0x30   :  { %6931 = sst [smem:[#allocation37_spill]] %s5990_s14 }
  0x31   :  { %s5995_s12 = sld [smem:[%s6863_s0 + %s5785_s7]]   ;;  %s5789_s7 = smov 34  }
  0x32   :  { %s6000_s17 = sld [smem:[%s6863_s0 + %s5786_s15]]   ;;  %s5790_s15 = smov 35  }
  0x33   :  { %s6005_s6 = sld [smem:[%s6863_s0 + %s5787_s22]]   ;;  %s5791_s22 = smov 36  }
  0x34   :  { %s6010_s14 = sld [smem:[%s6863_s0 + %s5788_s28]]   ;;  %s5792_s28 = smov 37  }
  0x37   :  { %6932 = sst [smem:[#allocation38_spill]] %s5995_s12 }
  0x38   :  { %6933 = sst [smem:[#allocation39_spill]] %s6000_s17 }
  0x39   :  { %6934 = sst [smem:[#allocation40_spill]] %s6005_s6 }
  0x3a   :  { %6935 = sst [smem:[#allocation41_spill]] %s6010_s14 }
  0x3b   :  { %s6015_s12 = sld [smem:[%s6863_s0 + %s5789_s7]]  }
  0x3c   :  { %s6020_s17 = sld [smem:[%s6863_s0 + %s5790_s15]]  }
  0x3d   :  { %s6025_s6 = sld [smem:[%s6863_s0 + %s5791_s22]]  }
  0x3e   :  { %s6030_s14 = sld [smem:[%s6863_s0 + %s5792_s28]]  }
  0x3f   :  { %81 = vsyncpa [#allocation5], 0 }
  0x40   :  { %82 = vsyncpa [#allocation3], 0 }
  0x41   :  { %83 = vsyncpa [#allocation8], 0 }
  0x42   :  { %84 = vsyncpa [#allocation4], 0 }
  0x43   :  { %85 = vsyncpa [#allocation12], 0 }
  0x44   :  { %86 = vsyncpa [#allocation15], 0  ;;  %s93_s7 = sshll.u32 %s5845_s5, 4  ;;  %s5793_s10 = smov [#allocation7]   ;;  %s94_s7 = int_to_ptr.vmem [resolvable:$true] %s93_s7 }
  0x45   :  { %s156_s11 = sshll.u32 %s5793_s10, 4  ;;  %s157_s11 = int_to_ptr.vmem [resolvable:$true] %s156_s11 }
  0x46   :  { %s5600_s15 = scalar_lea.vmem %s157_s11, 8192  ;;  %p5605_p1 = scmp.lt.s32.totalorder %s157_s11, %s157_s11 }
  0x47   :  { %p5601_p0 = scmp.ne.s32.totalorder %s157_s11, %s5600_s15  ;;  %p5606_p2 = scmp.lt.s32.totalorder %s5600_s15, %s5600_s15 }
  0x49   :  { %p5607_p3 = por %p5606_p2, %p5605_p1 }
  0x4b   :  { %p5608_p4 = pnand %p5607_p3, %p5601_p0 }
  0x4d   :  { %5611 = shalt.err (!%p5608_p4)
}
  0x4e   :  { %s5794_s0 = smov 2048   ;;  %s5795_s16 = smov 128  }
  0x4f   :  { %162 = dma.hbm_to_vmem [thread:$0]  %s5960_s20, 8192, %s157_s11, [#allocation8], %s5794_s0, %s5794_s0, %s5795_s16  }
  0x50   :  { %s5612_s18 = scalar_lea.vmem %s94_s7, 64  ;;  %p5617_p6 = scmp.lt.s32.totalorder %s94_s7, %s94_s7 }
  0x51   :  { %p5613_p5 = scmp.ne.s32.totalorder %s94_s7, %s5612_s18  ;;  %p5618_p7 = scmp.lt.s32.totalorder %s5612_s18, %s5612_s18 }
  0x53   :  { %p5619_p8 = por %p5618_p7, %p5617_p6 }
  0x55   :  { %p5620_p9 = pnand %p5619_p8, %p5613_p5 }
  0x57   :  { %5623 = shalt.err (!%p5620_p9)
}
  0x58   :  { %s5796_s5 = smov [#allocation2]   ;;  %s5797_s22 = smov [#allocation6]  }
  0x59   :  { %96 = dma.vmem_to_smem %s94_s7, 64, %s5796_s5, [#allocation5]  }
  0x5a   :  { %s144_s23 = sshll.u32 %s5797_s22, 4  ;;  %s5798_s26 = smov [#allocation9]   ;;  %s145_s23 = int_to_ptr.vmem [resolvable:$true] %s144_s23 }
  0x5b   :  { %s168_s28 = sshll.u32 %s5798_s26, 4  ;;  %s5632_s1 = scalar_lea.vmem %s145_s23, 8192  ;;  %s169_s28 = int_to_ptr.vmem [resolvable:$true] %s168_s28 }
  0x5c   :  { %p5633_p10 = scmp.ne.s32.totalorder %s145_s23, %s5632_s1  ;;  %p5637_p11 = scmp.lt.s32.totalorder %s145_s23, %s145_s23 }
  0x5d   :  { %p5638_p12 = scmp.lt.s32.totalorder %s5632_s1, %s5632_s1 }
  0x5f   :  { %p5639_p13 = por %p5638_p12, %p5637_p11 }
  0x61   :  { %p5640_p0 = pnand %p5639_p13, %p5633_p10 }
  0x63   :  { %5643 = shalt.err (!%p5640_p0)
}
  0x64   :  { %150 = dma.hbm_to_vmem [thread:$0]  %s5955_s8, 8192, %s145_s23, [#allocation3], %s5794_s0, %s5794_s0, %s5795_s16  }
  0x65   :  { %s5652_s20 = scalar_lea.vmem %s169_s28, 8192  ;;  %p5657_p2 = scmp.lt.s32.totalorder %s169_s28, %s169_s28 }
  0x66   :  { %p5653_p1 = scmp.ne.s32.totalorder %s169_s28, %s5652_s20  ;;  %p5658_p3 = scmp.lt.s32.totalorder %s5652_s20, %s5652_s20 }
  0x68   :  { %p5659_p4 = por %p5658_p3, %p5657_p2 }
  0x6a   :  { %p5660_p5 = pnand %p5659_p4, %p5653_p1 }
  0x6c   :  { %5663 = shalt.err (!%p5660_p5)
}
  0x6d   :  { %174 = dma.hbm_to_vmem [thread:$0]  %s5965_s27, 8192, %s169_s28, [#allocation8], %s5794_s0, %s5794_s0, %s5795_s16  }
  0x6e   :  { %5744 = dma.done.wait [#allocation5], 64  }
  0x6f   :  { %5745 = vsyncadd [#allocation5], 4294967232 }
  0x70   :  { %5746 = dma.done.wait [#allocation3], 8192  }
  0x71   :  { %5747 = vsyncadd [#allocation3], 4294959104 }
  0x72   :  { %5748 = dma.done.wait [#allocation8], 16384  }
  0x73   :  { %5749 = vsyncadd [#allocation8], 4294950912 }
  0x74   :  { %205 = sfence }
  0x75   :  { %v5555_v0 = vld [vmem:[%s5865_s21 + $0x8] sm:$0xff]   ;;  %v6869_v1 = vmov 0.0   ;;  %v5556_v2 = vld [vmem:[%s5865_s21] sm:$0xff]   ;;  %vm5800_vm0 = vmmov 0   ;;  %vm225_vm1 = vcmask 261120   ;;  %vm279_vm2 = vcmask 130048  }
  0x76   :  { %5277 = vmatprep.subr.bf16.mxu0 %v6869_v1  ;;  %5291 = vmatprep.subr.bf16.mxu1 %v6869_v1  ;;  %v207_v3 = vld [vmem:[%s5850_s9] sm:$0xff]  ;;  %v5558_v9 = vld [vmem:[%s5895_s19 + $0x18] sm:$0xff]   ;;  %v5559_v13 = vld [vmem:[%s5895_s19 + $0x10] sm:$0xff]   ;;  %vm445_vm3 = vcmask 523264   ;;  %vm337_vm4 = vcmask 1043456   ;;  %vm333_vm5 = vcmask 64512  }
  0x77   :  { %5278 = vmatpush3.bf16.msra.mxu0 %v5555_v0  ;;  %5281 = vmatprep.mubr.msk.bf16.mxu0 %vm5800_vm0, %v6869_v1  ;;  %v5557_v4 = vld [vmem:[%s5870_s25] sm:$0xff]   ;;  %v208_v5 = vpack.c.bf16 %v207_v3, %v207_v3  ;;  %v5560_v14 = vld [vmem:[%s5895_s19 + $0x8] sm:$0xff]   ;;  %s6936_s9 = sld [smem:[#allocation25_spill]]  ;;  %s5833_s22 = smov [#allocation11]  }
  0x78   :  { %5279 = vmatprep.subr.bf16.mxu0 %v6869_v1  ;;  %5293 = vmatprep.mubr.msk.bf16.mxu1 %vm5800_vm0, %v6869_v1  ;;  %v5561_v15 = vld [vmem:[%s5895_s19] sm:$0xff]   ;;  %v5562_v23 = vld [vmem:[%s5900_s24 + $0x8] sm:$0xff]   ;;  %s6938_s21 = sld [smem:[#allocation29_spill]]  ;;  %s4868_s23 = sshll.u32 %s5833_s22, 4  ;;  %s4869_s23 = int_to_ptr.vmem [resolvable:$true] %s4868_s23 }
  0x79   :  { %v411_v16 = vld [vmem:[%s5855_s13] sm:$0xff]  ;;  %s6937_s13 = sld [smem:[#allocation22_spill]]  ;;  %s5834_s26 = smov [#allocation13]  }
  0x7a   :  { %v412_v17 = vpack.c.bf16 %v411_v16, %v411_v16  ;;  %v325_v18 = vld [vmem:[%s5875_s29] sm:$0xf]  ;;  %s6939_s25 = sld [smem:[#allocation23_spill]]  ;;  %s4878_s28 = sshll.u32 %s5834_s26, 4  ;;  %s4879_s28 = int_to_ptr.vmem [resolvable:$true] %s4878_s28 }
  0x7b   :  { %5280 = vmatpush3.bf16.msra.mxu0 %v5556_v2  ;;  %v339_v19 = vsel %vm337_vm4, %v325_v18, 0  ;;  %v5563_v27 = vld [vmem:[%s5900_s24] sm:$0xff]   ;;  %s6940_s29 = sld [smem:[#allocation24_spill]]  ;;  %s5664_s1 = scalar_lea.vmem %s4869_s23, 128 }
  0x7c   :  { %5285 = vmatprep.subr.bf16.mxu0 %v6869_v1  ;;  %5292 = vmatpush3.bf16.msra.mxu1 %v339_v19  ;;  %v5564_v34 = vld [vmem:[%s5905_s30] sm:$0xff]   ;;  %s6942_s8 = sld [smem:[#allocation30_spill]]  ;;  %p5665_p6 = scmp.ne.s32.totalorder %s4869_s23, %s5664_s1 }
  0x7d   :  { %5309 = vmatprep.subr.bf16.mxu1 %v6869_v1  ;;  %v4952_v35 = vld [vmem:[%s5880_s3] ss:$0 sm:$0xff]  ;;  %s6941_s3 = sld [smem:[#allocation26_spill]]  ;;  %p5669_p7 = scmp.lt.s32.totalorder %s4869_s23, %s4869_s23 }
  0x7e   :  { %5282 = vmatmul.mubr.msk.bf16.vlgmr.msra.gmra.mxu0 %vm225_vm1, %v208_v5  ;;  %v5565_v45 = vld [vmem:[%s5930_s4] sm:$0xff]   ;;  %s6943_s19 = sld [smem:[#allocation27_spill]]  ;;  %p5670_p8 = scmp.lt.s32.totalorder %s5664_s1, %s5664_s1 }
  0x7f   :  { %5286 = vmatpush3.bf16.msra.mxu0 %v5557_v4  ;;  %5287 = vmatprep.mubr.msk.bf16.mxu0 %vm5800_vm0, %v6869_v1  ;;  %v605_v48 = vld [vmem:[%s6936_s9] sm:$0xf]  ;;  %s6944_s24 = sld [smem:[#allocation28_spill]] }
  0x80   :  { %5297 = vmatprep.subr.bf16.mxu0 %v6869_v1  ;;  %v688_v50 = vld [vmem:[%s6937_s13] sm:$0xff]  ;;  %v617_v51 = vsel %vm337_vm4, %v605_v48, 0  ;;  %s6945_s30 = sld [smem:[#allocation31_spill]]  ;;  %p5671_p9 = por %p5670_p8, %p5669_p7 }
  0x81   :  { %v689_v52 = vpack.c.bf16 %v688_v50, %v688_v50  ;;  %v743_v59 = vld [vmem:[%s6938_s21] sm:$0xf]  ;;  %v888_v50 = vld [vmem:[#allocation6 + $0x110] sm:$0xff]  ;;  %s6946_s27 = sld [smem:[#allocation32_spill]] }
  0x82   :  { %v755_v63 = vsel %vm337_vm4, %v743_v59, 0  ;;  %s4976_s4 = sld [smem:[#allocation2 + $0x1]]  ;;  %p5672_p10 = pnand %p5671_p9, %p5665_p6 }
  0x83   :  { %v4966_v18 = vld [vmem:[%s6941_s3] ss:$0 sm:$0xff]  ;;  %s6465_s2 = sld [smem:[#allocation2 + $0x2]] }
  0x84   :  { %s4978_s7 = sld [smem:[#allocation2 + $0x82]] }
  0x85   :  { %s7010_s10 = sld [smem:[#allocation34_spill]] }
  0x86   :  { %s7025_s11 = sld [smem:[#allocation36_spill]] }
  0x87   :  { %s7029_s15 = sld [smem:[#allocation33_spill]] }
  0x88   :  { %s7030_s0 = sld [smem:[#allocation35_spill]] }
  0x89   :  { %s7031_s16 = sld [smem:[#allocation38_spill]] }
  0x8a   :  { %s7032_s18 = sld [smem:[#allocation37_spill]] }
  0x8b   :  { %s7033_s5 = sld [smem:[#allocation39_spill]] }
 0x13e   :  { %v263_v6 = vpop.f32.mrf.mxu0 }
 0x13f   :  { %v269_v7 = vmax.f32 %v263_v6, 0.0 }
 0x140   :  { %v5283_v8 = vpop.f32.mrf.mxu0 }
 0x141   :  { %v270_v10 = vpack.c.bf16 %v269_v7, %v269_v7 }
 0x142   :  { %v266_v11 = vpop.f32.mrf.mxu0 }
 0x143   :  { %5288 = vmatmul.mubr.msk.bf16.vlgmr.msra.gmra.mxu0 %vm279_vm2, %v270_v10 }
 0x144   :  { %5298 = vmatpush3.bf16.msra.mxu0 %v5558_v9  ;;  %v5284_v12 = vpop.f32.mrf.mxu0  ;;  %5305 = vmatprep.mubr.msk.bf16.mxu0 %vm5800_vm0, %v6869_v1 }
 0x145   :  { %5299 = vmatprep.subr.bf16.mxu0 %v6869_v1 }
 0x148   :  { %5300 = vmatpush3.bf16.msra.mxu0 %v5559_v13  ;;  %v4954_v13 = vld [vmem:[%s6939_s25] ss:$0 sm:$0xff] }
 0x149   :  { %5301 = vmatprep.subr.bf16.mxu0 %v6869_v1 }
 0x14c   :  { %5302 = vmatpush3.bf16.msra.mxu0 %v5560_v14 }
 0x14d   :  { %5303 = vmatprep.subr.bf16.mxu0 %v6869_v1 }
 0x150   :  { %5304 = vmatpush3.bf16.msra.mxu0 %v5561_v15  ;;  %v4955_v15 = vld [vmem:[%s6940_s29] ss:$0 sm:$0xff] }
 0x151   :  { %5323 = vmatprep.subr.bf16.mxu0 %v6869_v1 }
 0x153   :  { %5306 = vmatmul.mubr.msk.bf16.vlgmr.msra.gmra.mxu0 %vm445_vm3, %v412_v17 }
 0x154   :  { %5325 = vmatprep.mubr.msk.bf16.mxu0 %vm5800_vm0, %v6869_v1  ;;  %5324 = vmatpush3.bf16.msra.mxu0 %v617_v51  ;;  %v904_v51 = vld [vmem:[#allocation6 + $0x190] sm:$0xff] }
 0x155   :  { %5335 = vmatprep.subr.bf16.mxu0 %v6869_v1 }
 0x203   :  { %v317_v20 = vpop.f32.mrf.mxu0 }
 0x204   :  { %v323_v21 = vmax.f32 %v317_v20, 0.0 }
 0x205   :  { %v5289_v22 = vpop.f32.mrf.mxu0 }
 0x206   :  { %v324_v24 = vpack.c.bf16 %v323_v21, %v323_v21 }
 0x207   :  { %v320_v25 = vpop.f32.mrf.mxu0 }
 0x208   :  { %5294 = vmatmul.mubr.msk.bf16.vlgmr.msra.gmra.mxu1 %vm333_vm5, %v324_v24 }
 0x209   :  { %v5290_v26 = vpop.f32.mrf.mxu0  ;;  %5310 = vmatpush3.bf16.msra.mxu1 %v5562_v23  ;;  %5313 = vmatprep.mubr.msk.bf16.mxu1 %vm5800_vm0, %v6869_v1 }
 0x20a   :  { %5311 = vmatprep.subr.bf16.mxu1 %v6869_v1  ;;  %v4972_v26 = vld [vmem:[%s6942_s8] ss:$0 sm:$0xff] }
 0x20d   :  { %5312 = vmatpush3.bf16.msra.mxu1 %v5563_v27 }
 0x20e   :  { %5317 = vmatprep.subr.bf16.mxu1 %v6869_v1 }
 0x213   :  { %v483_v28 = vpop.f32.mrf.mxu0 }
 0x214   :  { %v489_v29 = vmax.f32 %v483_v28, 0.0 }
 0x215   :  { %v5307_v30 = vpop.f32.mrf.mxu0 }
 0x216   :  { %v490_v31 = vpack.c.bf16 %v489_v29, %v489_v29 }
 0x217   :  { %v486_v32 = vpop.f32.mrf.mxu0 }
 0x218   :  { %5314 = vmatmul.mubr.msk.bf16.vlgmr.msra.gmra.mxu1 %vm225_vm1, %v490_v31 }
 0x219   :  { %v5308_v33 = vpop.f32.mrf.mxu0  ;;  %5319 = vmatprep.mubr.msk.bf16.mxu1 %vm5800_vm0, %v6869_v1  ;;  %5318 = vmatpush3.bf16.msra.mxu1 %v5564_v34  ;;  %v886_v34 = vld [vmem:[#allocation6 + $0x100] sm:$0xff] }
 0x21a   :  { %5329 = vmatprep.subr.bf16.mxu1 %v6869_v1 }
 0x2c8   :  { %v375_v36 = vpop.f32.mrf.mxu1 }
 0x2c9   :  { %v376_v37 = vadd.f32 %v4952_v35, %v375_v36  ;;  %v902_v35 = vld [vmem:[#allocation6 + $0x180] sm:$0xff]  ;;  %v887_v36 = vld [vmem:[#allocation6 + $0x108] sm:$0xff] }
 0x2ca   :  { %v5295_v38 = vpop.f32.mrf.mxu1 }
 0x2cb   :  { %v383_v39 = vsel %vm225_vm1, %v376_v37, 0.0  ;;  %v903_v38 = vld [vmem:[#allocation6 + $0x188] sm:$0xff] }
 0x2cc   :  { %384 = vadd.xlane.f32.xlu0 %v383_v39  ;;  %v378_v40 = vpop.f32.mrf.mxu1  ;;  %v5011_v39 = vcombine.low %v886_v34, %v902_v35 }
 0x2cd   :  { %v5013_v40 = vcombine.low %v887_v36, %v903_v38 }
 0x2ce   :  { %v5296_v41 = vpop.f32.mrf.mxu1 }
 0x2cf   :  { %v5014_v41 = vcombine.high %v887_v36, %v903_v38  ;;  %v909_v36 = vld [vmem:[#allocation6 + $0x1b8] sm:$0xff] }
 0x2d8   :  { %v544_v42 = vpop.f32.mrf.mxu1 }
 0x2d9   :  { %v550_v43 = vmax.f32 %v544_v42, 0.0  ;;  %v854_v42 = vld [vmem:[#allocation6] sm:$0xff] }
 0x2da   :  { %v5315_v44 = vpop.f32.mrf.mxu1 }
 0x2db   :  { %v551_v46 = vpack.c.bf16 %v550_v43, %v550_v43  ;;  %v870_v43 = vld [vmem:[#allocation6 + $0x80] sm:$0xff]  ;;  %v855_v44 = vld [vmem:[#allocation6 + $0x8] sm:$0xff] }
 0x2dc   :  { %v547_v47 = vpop.f32.mrf.mxu1 }
 0x2dd   :  { %5320 = vmatmul.mubr.msk.bf16.vlgmr.msra.gmra.mxu1 %vm279_vm2, %v551_v46  ;;  %v871_v46 = vld [vmem:[#allocation6 + $0x88] sm:$0xff]  ;;  %v4979_v47 = vcombine.low %v854_v42, %v870_v43 }
 0x2de   :  { %v5316_v49 = vpop.f32.mrf.mxu1  ;;  %5330 = vmatpush3.bf16.msra.mxu1 %v5565_v45  ;;  %5331 = vmatprep.mubr.msk.bf16.mxu1 %vm5800_vm0, %v6869_v1  ;;  %v4980_v45 = vcombine.high %v854_v42, %v870_v43  ;;  %v4981_v48 = vcombine.low %v855_v44, %v871_v46  ;;  %v876_v42 = vld [vmem:[#allocation6 + $0xb0] sm:$0xff]  ;;  %v861_v43 = vld [vmem:[#allocation6 + $0x38] sm:$0xff] }
 0x2df   :  { %v4982_v49 = vcombine.high %v855_v44, %v871_v46  ;;  %v877_v44 = vld [vmem:[#allocation6 + $0xb8] sm:$0xff] }
 0x2e5   :  { %5332 = vmatmul.mubr.msk.bf16.vlgmr.msra.gmra.mxu1 %vm279_vm2, %v689_v52  ;;  %v889_v52 = vld [vmem:[#allocation6 + $0x118] sm:$0xff] }
 0x355   :  { %v385_v53 = vpop.xlane.xlu0 %384 }
 0x356   :  { %v387_v54 = vmul.f32 0.03125, %v385_v53  ;;  %v5016_v53 = vcombine.high %v888_v50, %v904_v51 }
 0x358   :  { %v388_v55 = vsub.f32 %v376_v37, %v387_v54  ;;  %v5012_v37 = vcombine.high %v886_v34, %v902_v35  ;;  %v905_v54 = vld [vmem:[#allocation6 + $0x198] sm:$0xff]  ;;  %v908_v34 = vld [vmem:[#allocation6 + $0x1b0] sm:$0xff] }
 0x359   :  { %v893_v35 = vld [vmem:[#allocation6 + $0x138] sm:$0xff] }
 0x35a   :  { %v389_v56 = vmul.f32 %v388_v55, %v388_v55  ;;  %1253 = vmatprep.subr.bf16.mxu1 %v5012_v37  ;;  %v5025_v46 = vcombine.low %v893_v35, %v909_v36 }
 0x35b   :  { %1254 = vmatpush1.bf16.msra.mxu1 %v5011_v39 }
 0x35c   :  { %v390_v57 = vsel %vm225_vm1, %v389_v56, 0.0  ;;  %1255 = vmatprep.subr.bf16.mxu1 %v4980_v45  ;;  %v5015_v56 = vcombine.low %v888_v50, %v904_v51  ;;  %v910_v50 = vld [vmem:[#allocation6 + $0x1c0] sm:$0xff]  ;;  %v895_v51 = vld [vmem:[#allocation6 + $0x148] sm:$0xff] }
 0x35d   :  { %391 = vadd.xlane.f32.xlu0 %v390_v57  ;;  %v5017_v57 = vcombine.low %v889_v52, %v905_v54 }
 0x35f   :  { %1256 = vmatpush1.bf16.msra.mxu1 %v4979_v47 }
 0x360   :  { %1335 = vmatprep.subr.bf16.mxu1 %v5016_v53 }
 0x39d   :  { %v597_v58 = vpop.f32.mrf.mxu1 }
 0x39e   :  { %v603_v60 = vmax.f32 %v597_v58, 0.0  ;;  %v5018_v58 = vcombine.high %v889_v52, %v905_v54  ;;  %v911_v52 = vld [vmem:[#allocation6 + $0x1c8] sm:$0xff]  ;;  %v4993_v54 = vcombine.low %v861_v43, %v877_v44 }
 0x39f   :  { %v5321_v61 = vpop.f32.mrf.mxu1 }
 0x3a0   :  { %v604_v62 = vpack.c.bf16 %v603_v60, %v603_v60 }
 0x3a1   :  { %v600_v0 = vpop.f32.mrf.mxu1 }
 0x3a2   :  { %5326 = vmatmul.mubr.msk.bf16.vlgmr.msra.gmra.mxu0 %vm333_vm5, %v604_v62 }
 0x3a3   :  { %v5322_v2 = vpop.f32.mrf.mxu1  ;;  %5336 = vmatpush3.bf16.msra.mxu0 %v755_v63  ;;  %5337 = vmatprep.mubr.msk.bf16.mxu0 %vm5800_vm0, %v6869_v1 }
 0x3a4   :  { %1294 = vmatprep.subr.bf16.mxu0 %v5014_v41  ;;  %v860_v41 = vld [vmem:[#allocation6 + $0x30] sm:$0xff] }
 0x3a5   :  { %v735_v3 = vpop.f32.mrf.mxu1  ;;  %v4992_v47 = vcombine.high %v860_v41, %v876_v42  ;;  %v4991_v53 = vcombine.low %v860_v41, %v876_v42  ;;  %v917_v41 = vld [vmem:[#allocation6 + $0x1f8] sm:$0xff] }
 0x3a6   :  { %v741_v4 = vmax.f32 %v735_v3, 0.0 }
 0x3a7   :  { %v5333_v5 = vpop.f32.mrf.mxu1 }
 0x3a8   :  { %v742_v6 = vpack.c.bf16 %v741_v4, %v741_v4 }
 0x3a9   :  { %v738_v7 = vpop.f32.mrf.mxu1 }
 0x3aa   :  { %5338 = vmatmul.mubr.msk.bf16.vlgmr.msra.gmra.mxu0 %vm333_vm5, %v742_v6 }
 0x3ab   :  { %v5334_v8 = vpop.f32.mrf.mxu1  ;;  %1295 = vmatpush1.bf16.msra.mxu0 %v5013_v40  ;;  %v5026_v40 = vcombine.high %v893_v35, %v909_v36 }
 0x3ac   :  { %1296 = vmatprep.subr.bf16.mxu0 %v4982_v49  ;;  %v856_v8 = vld [vmem:[#allocation6 + $0x10] sm:$0xff]  ;;  %v894_v49 = vld [vmem:[#allocation6 + $0x140] sm:$0xff] }
 0x3af   :  { %1297 = vmatpush1.bf16.msra.mxu0 %v4981_v48  ;;  %v4994_v48 = vcombine.high %v861_v43, %v877_v44 }
 0x3b0   :  { %1376 = vmatprep.subr.bf16.mxu0 %v5018_v58  ;;  %v862_v58 = vld [vmem:[#allocation6 + $0x40] sm:$0xff] }
 0x3e6   :  { %v392_v9 = vpop.xlane.xlu0 %391 }
 0x3e7   :  { %v393_v10 = vmul.f32 0.03125, %v392_v9 }
 0x3e9   :  { %v394_v11 = vadd.f32 1e-05, %v393_v10  ;;  %v872_v10 = vld [vmem:[#allocation6 + $0x90] sm:$0xff] }
 0x3eb   :  { %5578 = vrsqrt.f32 %v394_v11  ;;  %v857_v11 = vld [vmem:[#allocation6 + $0x18] sm:$0xff] }
 0x3f8   :  { %v5579_v12 = vpop.eup %5578 }
 0x3f9   :  { %v396_v14 = vmul.f32 %v5579_v12, %v388_v55  ;;  %v6871_v55 = vmov 0   ;;  %v873_v12 = vld [vmem:[#allocation6 + $0x98] sm:$0xff] }
 0x3fa   :  { %1273 = vmatprep.mubr.bf16.mxu1 %v6871_v55  ;;  %1314 = vmatprep.mubr.bf16.mxu0 %v6871_v55 }
 0x3fb   :  { %v403_v16 = vmul.f32 %v4954_v13, %v396_v14  ;;  %5458 = vset.pattern.permute.xlu1 %v6871_v55 }
 0x3fd   :  { %v6110_v17 = vadd.f32 %v4955_v15, %v403_v16  ;;  %v4984_v15 = vcombine.high %v856_v8, %v872_v10  ;;  %v4986_v16 = vcombine.high %v857_v11, %v873_v12 }
 0x3ff   :  { %826 = vst.msk [vmem:[#allocation11] sm:$0xff] %vm225_vm1, %v6110_v17  ;;  %v829_v23 = vmul.f32 %v6110_v17, %v6110_v17 }
 0x401   :  { %v830_v27 = vsel %vm225_vm1, %v829_v23, 0.0  ;;  %v4985_v23 = vcombine.low %v857_v11, %v873_v12 }
 0x462   :  { %v653_v19 = vpop.f32.mrf.mxu0 }
 0x463   :  { %v654_v20 = vadd.f32 %v4966_v18, %v653_v19  ;;  %v890_v18 = vld [vmem:[#allocation6 + $0x120] sm:$0xff] }
 0x464   :  { %v5327_v21 = vpop.f32.mrf.mxu0  ;;  %v906_v19 = vld [vmem:[#allocation6 + $0x1a0] sm:$0xff] }
 0x465   :  { %v661_v22 = vsel %vm225_vm1, %v654_v20, 0.0  ;;  %v907_v21 = vld [vmem:[#allocation6 + $0x1a8] sm:$0xff] }
 0x466   :  { %662 = vadd.xlane.f32.xlu1 %v661_v22  ;;  %v656_v24 = vpop.f32.mrf.mxu0  ;;  %v4983_v22 = vcombine.low %v856_v8, %v872_v10  ;;  %v913_v8 = vld [vmem:[#allocation6 + $0x1d8] sm:$0xff] }
 0x468   :  { %v5328_v25 = vpop.f32.mrf.mxu0 }
 0x469   :  { %v858_v25 = vld [vmem:[#allocation6 + $0x20] sm:$0xff] }
 0x46a   :  { %831 = vadd.xlane.f32.xlu1 %v830_v27  ;;  %v791_v28 = vpop.f32.mrf.mxu0  ;;  %v859_v27 = vld [vmem:[#allocation6 + $0x28] sm:$0xff] }
 0x46b   :  { %v792_v29 = vadd.f32 %v4972_v26, %v791_v28  ;;  %v874_v26 = vld [vmem:[#allocation6 + $0xa0] sm:$0xff]  ;;  %v875_v28 = vld [vmem:[#allocation6 + $0xa8] sm:$0xff] }
 0x46c   :  { %v5339_v30 = vpop.f32.mrf.mxu0  ;;  %v4987_v37 = vcombine.low %v858_v25, %v874_v26  ;;  %v4989_v38 = vcombine.low %v859_v27, %v875_v28 }
 0x46d   :  { %v799_v31 = vsel %vm225_vm1, %v792_v29, 0.0 }
 0x46e   :  { %800 = vadd.xlane.f32.xlu0 %v799_v31  ;;  %v794_v32 = vpop.f32.mrf.mxu0  ;;  %v4988_v31 = vcombine.high %v858_v25, %v874_v26  ;;  %v915_v25 = vld [vmem:[#allocation6 + $0x1e8] sm:$0xff] }
 0x46f   :  { %v4990_v32 = vcombine.high %v859_v27, %v875_v28 }
 0x470   :  { %v5340_v33 = vpop.f32.mrf.mxu0 }
 0x471   :  { %v892_v33 = vld [vmem:[#allocation6 + $0x130] sm:$0xff] }
 0x472   :  { %v5024_v39 = vcombine.high %v892_v33, %v908_v34  ;;  %v5023_v45 = vcombine.low %v892_v33, %v908_v34  ;;  %v883_v33 = vld [vmem:[#allocation6 + $0xe8] sm:$0xff] }
 0x4ef   :  { %v663_v59 = vpop.xlane.xlu1 %662 }
 0x4f0   :  { %v664_v60 = vmul.f32 0.03125, %v663_v59  ;;  %v878_v59 = vld [vmem:[#allocation6 + $0xc0] sm:$0xff] }
 0x4f2   :  { %v6124_v61 = vsub.f32 %v654_v20, %v664_v60  ;;  %v891_v20 = vld [vmem:[#allocation6 + $0x128] sm:$0xff] }
 0x4f3   :  { %v832_v62 = vpop.xlane.xlu1 %831  ;;  %v5022_v24 = vcombine.high %v891_v20, %v907_v21  ;;  %v5021_v30 = vcombine.low %v891_v20, %v907_v21  ;;  %v863_v60 = vld [vmem:[#allocation6 + $0x48] sm:$0xff] }
 0x4f4   :  { %v833_v63 = vmax.f32 %v832_v62, 1e-24  ;;  %v666_v0 = vmul.f32 %v6124_v61, %v6124_v61  ;;  %v879_v62 = vld [vmem:[#allocation6 + $0xc8] sm:$0xff] }
 0x4f5   :  { %v4997_v10 = vcombine.low %v863_v60, %v879_v62 }
 0x4f6   :  { %5580 = vrsqrt.f32 %v833_v63  ;;  %v667_v2 = vsel %vm225_vm1, %v666_v0, 0.0  ;;  %v5027_v63 = vcombine.low %v894_v49, %v910_v50  ;;  %v5029_v0 = vcombine.low %v895_v51, %v911_v52 }
 0x4f7   :  { %668 = vadd.xlane.f32.xlu1 %v667_v2  ;;  %v801_v3 = vpop.xlane.xlu0 %800  ;;  %v4996_v2 = vcombine.high %v862_v58, %v878_v59 }
 0x4f8   :  { %v802_v4 = vmul.f32 0.03125, %v801_v3  ;;  %v4998_v3 = vcombine.high %v863_v60, %v879_v62 }
 0x4fa   :  { %v6129_v5 = vsub.f32 %v792_v29, %v802_v4  ;;  %v5019_v29 = vcombine.low %v890_v18, %v906_v19  ;;  %v896_v4 = vld [vmem:[#allocation6 + $0x150] sm:$0xff] }
 0x4fc   :  { %v804_v6 = vmul.f32 %v6129_v5, %v6129_v5 }
 0x4fe   :  { %v805_v7 = vsel %vm225_vm1, %v804_v6, 0.0  ;;  %v912_v6 = vld [vmem:[#allocation6 + $0x1d0] sm:$0xff] }
 0x4ff   :  { %806 = vadd.xlane.f32.xlu0 %v805_v7  ;;  %v897_v7 = vld [vmem:[#allocation6 + $0x158] sm:$0xff]  ;;  %v5032_v11 = vcombine.high %v896_v4, %v912_v6 }
 0x500   :  { %v5034_v12 = vcombine.high %v897_v7, %v913_v8  ;;  %v5033_v20 = vcombine.low %v897_v7, %v913_v8 }
 0x503   :  { %v5581_v9 = vpop.eup %5580 }
 0x504   :  { %v835_v13 = vmul.f32 %v5581_v9, %v6110_v17  ;;  %v5020_v17 = vcombine.high %v890_v18, %v906_v19  ;;  %v4995_v9 = vcombine.low %v862_v58, %v878_v59  ;;  %v881_v18 = vld [vmem:[#allocation6 + $0xd8] sm:$0xff]  ;;  %v5031_v19 = vcombine.low %v896_v4, %v912_v6  ;;  %v2141_v58 = vld [vmem:[#allocation7 + $0x188] sm:$0xff] }
 0x505   :  { %v2109_v4 = vld [vmem:[#allocation7 + $0x88] sm:$0xff] }
 0x506   :  { %v6135_v14 = vpack.c.bf16 %v835_v13, %v835_v13  ;;  %v864_v13 = vld [vmem:[#allocation6 + $0x50] sm:$0xff] }
 0x508   :  { %5043 = vmatmul.mubr.msk.bf16.vlgmr.msra.gmra.mxu1 %vm225_vm1, %v6135_v14  ;;  %5044 = vmatmul.mubr.msk.bf16.vlgmr.msra.gmra.mxu0 %vm225_vm1, %v6135_v14 }
 0x509   :  { %1336 = vmatpush1.bf16.msra.mxu1 %v5015_v56  ;;  %1377 = vmatpush1.bf16.msra.mxu0 %v5017_v57  ;;  %v5028_v56 = vcombine.high %v894_v49, %v910_v50  ;;  %v5030_v57 = vcombine.high %v895_v51, %v911_v52  ;;  %v885_v49 = vld [vmem:[#allocation6 + $0xf8] sm:$0xff] }
 0x50a   :  { %1337 = vmatprep.subr.bf16.mxu1 %v4984_v15  ;;  %1378 = vmatprep.subr.bf16.mxu0 %v4986_v16  ;;  %v880_v15 = vld [vmem:[#allocation6 + $0xd0] sm:$0xff]  ;;  %v865_v16 = vld [vmem:[#allocation6 + $0x58] sm:$0xff] }
 0x50b   :  { %1355 = vmatprep.mubr.bf16.mxu1 %v6871_v55  ;;  %1396 = vmatprep.mubr.bf16.mxu0 %v6871_v55  ;;  %v5000_v21 = vcombine.high %v864_v13, %v880_v15  ;;  %v4999_v26 = vcombine.low %v864_v13, %v880_v15  ;;  %v5001_v27 = vcombine.low %v865_v16, %v881_v18  ;;  %v2143_v13 = vld [vmem:[#allocation7 + $0x198] sm:$0xff] }
 0x50d   :  { %1338 = vmatpush1.bf16.msra.mxu1 %v4983_v22  ;;  %1379 = vmatpush1.bf16.msra.mxu0 %v4985_v23  ;;  %v5002_v22 = vcombine.high %v865_v16, %v881_v18  ;;  %v898_v23 = vld [vmem:[#allocation6 + $0x160] sm:$0xff] }
 0x50e   :  { %1417 = vmatprep.subr.bf16.mxu1 %v5020_v17  ;;  %1458 = vmatprep.subr.bf16.mxu0 %v5022_v24  ;;  %v914_v17 = vld [vmem:[#allocation6 + $0x1e0] sm:$0xff]  ;;  %v899_v24 = vld [vmem:[#allocation6 + $0x168] sm:$0xff] }
 0x50f   :  { %v5036_v28 = vcombine.high %v898_v23, %v914_v17  ;;  %v5035_v34 = vcombine.low %v898_v23, %v914_v17  ;;  %v5037_v35 = vcombine.low %v899_v24, %v915_v25  ;;  %v2111_v23 = vld [vmem:[#allocation7 + $0x98] sm:$0xff] }
 0x510   :  { %5045 = vmatmul.mubr.msk.bf16.vlgmr.msra.gmra.mxu1 %vm225_vm1, %v6135_v14  ;;  %5046 = vmatmul.mubr.msk.bf16.vlgmr.msra.gmra.mxu0 %vm225_vm1, %v6135_v14 }
 0x511   :  { %1418 = vmatpush1.bf16.msra.mxu1 %v5019_v29  ;;  %1459 = vmatpush1.bf16.msra.mxu0 %v5021_v30  ;;  %v5038_v29 = vcombine.high %v899_v24, %v915_v25  ;;  %v866_v30 = vld [vmem:[#allocation6 + $0x60] sm:$0xff] }
 0x512   :  { %1419 = vmatprep.subr.bf16.mxu1 %v4988_v31  ;;  %1460 = vmatprep.subr.bf16.mxu0 %v4990_v32  ;;  %v882_v31 = vld [vmem:[#allocation6 + $0xe0] sm:$0xff]  ;;  %v867_v32 = vld [vmem:[#allocation6 + $0x68] sm:$0xff] }
 0x513   :  { %1437 = vmatprep.mubr.bf16.mxu1 %v6871_v55  ;;  %1478 = vmatprep.mubr.bf16.mxu0 %v6871_v55  ;;  %v5004_v36 = vcombine.high %v866_v30, %v882_v31  ;;  %v5003_v42 = vcombine.low %v866_v30, %v882_v31  ;;  %v5005_v43 = vcombine.low %v867_v32, %v883_v33  ;;  %v2145_v30 = vld [vmem:[#allocation7 + $0x1a8] sm:$0xff] }
 0x515   :  { %1420 = vmatpush1.bf16.msra.mxu1 %v4987_v37  ;;  %1461 = vmatpush1.bf16.msra.mxu0 %v4989_v38  ;;  %v5006_v37 = vcombine.high %v867_v32, %v883_v33  ;;  %v900_v38 = vld [vmem:[#allocation6 + $0x170] sm:$0xff] }
 0x516   :  { %1499 = vmatprep.subr.bf16.mxu1 %v5024_v39  ;;  %1540 = vmatprep.subr.bf16.mxu0 %v5026_v40  ;;  %v916_v39 = vld [vmem:[#allocation6 + $0x1f0] sm:$0xff]  ;;  %v901_v40 = vld [vmem:[#allocation6 + $0x178] sm:$0xff] }
 0x517   :  { %v5040_v44 = vcombine.high %v900_v38, %v916_v39  ;;  %v5039_v50 = vcombine.low %v900_v38, %v916_v39  ;;  %v5041_v51 = vcombine.low %v901_v40, %v917_v41  ;;  %v2113_v38 = vld [vmem:[#allocation7 + $0xa8] sm:$0xff] }
 0x518   :  { %5047 = vmatmul.mubr.msk.bf16.vlgmr.msra.gmra.mxu1 %vm225_vm1, %v6135_v14  ;;  %5048 = vmatmul.mubr.msk.bf16.vlgmr.msra.gmra.mxu0 %vm225_vm1, %v6135_v14 }
 0x519   :  { %1500 = vmatpush1.bf16.msra.mxu1 %v5023_v45  ;;  %1541 = vmatpush1.bf16.msra.mxu0 %v5025_v46  ;;  %v5042_v45 = vcombine.high %v901_v40, %v917_v41  ;;  %v868_v46 = vld [vmem:[#allocation6 + $0x70] sm:$0xff] }
 0x51a   :  { %1501 = vmatprep.subr.bf16.mxu1 %v4992_v47  ;;  %1542 = vmatprep.subr.bf16.mxu0 %v4994_v48  ;;  %v884_v47 = vld [vmem:[#allocation6 + $0xf0] sm:$0xff]  ;;  %v869_v48 = vld [vmem:[#allocation6 + $0x78] sm:$0xff] }
 0x51b   :  { %1519 = vmatprep.mubr.bf16.mxu1 %v6871_v55  ;;  %1560 = vmatprep.mubr.bf16.mxu0 %v6871_v55  ;;  %v5008_v52 = vcombine.high %v868_v46, %v884_v47  ;;  %v5007_v59 = vcombine.low %v868_v46, %v884_v47  ;;  %v5009_v60 = vcombine.low %v869_v48, %v885_v49  ;;  %v2147_v46 = vld [vmem:[#allocation7 + $0x1b8] sm:$0xff] }
 0x51d   :  { %1502 = vmatpush1.bf16.msra.mxu1 %v4991_v53  ;;  %1543 = vmatpush1.bf16.msra.mxu0 %v4993_v54  ;;  %v5010_v53 = vcombine.high %v869_v48, %v885_v49  ;;  %v2124_v54 = vld [vmem:[#allocation7 + $0x100] sm:$0xff] }
 0x51e   :  { %1581 = vmatprep.subr.bf16.mxu1 %v5028_v56  ;;  %1622 = vmatprep.subr.bf16.mxu0 %v5030_v57  ;;  %v2140_v56 = vld [vmem:[#allocation7 + $0x180] sm:$0xff]  ;;  %v2125_v57 = vld [vmem:[#allocation7 + $0x108] sm:$0xff] }
 0x51f   :  { %v5092_v62 = vcombine.high %v2124_v54, %v2140_v56  ;;  %v5091_v6 = vcombine.low %v2124_v54, %v2140_v56  ;;  %v5093_v7 = vcombine.low %v2125_v57, %v2141_v58  ;;  %v2115_v54 = vld [vmem:[#allocation7 + $0xb8] sm:$0xff] }
 0x520   :  { %5049 = vmatmul.mubr.msk.bf16.vlgmr.msra.gmra.mxu1 %vm225_vm1, %v6135_v14  ;;  %5050 = vmatmul.mubr.msk.bf16.vlgmr.msra.gmra.mxu0 %vm225_vm1, %v6135_v14 }
 0x521   :  { %1582 = vmatpush1.bf16.msra.mxu1 %v5027_v63  ;;  %1623 = vmatpush1.bf16.msra.mxu0 %v5029_v0  ;;  %v5094_v63 = vcombine.high %v2125_v57, %v2141_v58  ;;  %v2092_v0 = vld [vmem:[#allocation7] sm:$0xff] }
 0x522   :  { %1583 = vmatprep.subr.bf16.mxu1 %v4996_v2  ;;  %1624 = vmatprep.subr.bf16.mxu0 %v4998_v3  ;;  %v2108_v2 = vld [vmem:[#allocation7 + $0x80] sm:$0xff]  ;;  %v2093_v3 = vld [vmem:[#allocation7 + $0x8] sm:$0xff] }
 0x523   :  { %1601 = vmatprep.mubr.bf16.mxu1 %v6871_v55  ;;  %1642 = vmatprep.mubr.bf16.mxu0 %v6871_v55  ;;  %v5060_v8 = vcombine.high %v2092_v0, %v2108_v2  ;;  %v5059_v15 = vcombine.low %v2092_v0, %v2108_v2  ;;  %v5061_v16 = vcombine.low %v2093_v3, %v2109_v4  ;;  %v2149_v0 = vld [vmem:[#allocation7 + $0x1c8] sm:$0xff] }
 0x525   :  { %1584 = vmatpush1.bf16.msra.mxu1 %v4995_v9  ;;  %1625 = vmatpush1.bf16.msra.mxu0 %v4997_v10  ;;  %v5062_v9 = vcombine.high %v2093_v3, %v2109_v4  ;;  %v2126_v10 = vld [vmem:[#allocation7 + $0x110] sm:$0xff] }
 0x526   :  { %1663 = vmatprep.subr.bf16.mxu1 %v5032_v11  ;;  %1704 = vmatprep.subr.bf16.mxu0 %v5034_v12  ;;  %v2142_v11 = vld [vmem:[#allocation7 + $0x190] sm:$0xff]  ;;  %v2127_v12 = vld [vmem:[#allocation7 + $0x118] sm:$0xff] }
 0x527   :  { %v5096_v18 = vcombine.high %v2126_v10, %v2142_v11  ;;  %v5095_v17 = vcombine.low %v2126_v10, %v2142_v11  ;;  %v5097_v24 = vcombine.low %v2127_v12, %v2143_v13  ;;  %v2117_v10 = vld [vmem:[#allocation7 + $0xc8] sm:$0xff] }
 0x528   :  { %5051 = vmatmul.mubr.msk.bf16.vlgmr.msra.gmra.mxu1 %vm225_vm1, %v6135_v14  ;;  %5052 = vmatmul.mubr.msk.bf16.vlgmr.msra.gmra.mxu0 %vm225_vm1, %v6135_v14 }
 0x529   :  { %1664 = vmatpush1.bf16.msra.mxu1 %v5031_v19  ;;  %1705 = vmatpush1.bf16.msra.mxu0 %v5033_v20  ;;  %v5098_v19 = vcombine.high %v2127_v12, %v2143_v13  ;;  %v2094_v20 = vld [vmem:[#allocation7 + $0x10] sm:$0xff] }
 0x52a   :  { %1665 = vmatprep.subr.bf16.mxu1 %v5000_v21  ;;  %1706 = vmatprep.subr.bf16.mxu0 %v5002_v22  ;;  %v2110_v21 = vld [vmem:[#allocation7 + $0x90] sm:$0xff]  ;;  %v2095_v22 = vld [vmem:[#allocation7 + $0x18] sm:$0xff] }
 0x52b   :  { %1683 = vmatprep.mubr.bf16.mxu1 %v6871_v55  ;;  %1724 = vmatprep.mubr.bf16.mxu0 %v6871_v55  ;;  %v5064_v25 = vcombine.high %v2094_v20, %v2110_v21  ;;  %v5063_v31 = vcombine.low %v2094_v20, %v2110_v21  ;;  %v5065_v32 = vcombine.low %v2095_v22, %v2111_v23  ;;  %v2151_v20 = vld [vmem:[#allocation7 + $0x1d8] sm:$0xff] }
 0x52d   :  { %1666 = vmatpush1.bf16.msra.mxu1 %v4999_v26  ;;  %1707 = vmatpush1.bf16.msra.mxu0 %v5001_v27  ;;  %v5066_v26 = vcombine.high %v2095_v22, %v2111_v23  ;;  %v2128_v27 = vld [vmem:[#allocation7 + $0x120] sm:$0xff] }
 0x52e   :  { %1745 = vmatprep.subr.bf16.mxu1 %v5036_v28  ;;  %1786 = vmatprep.subr.bf16.mxu0 %v5038_v29  ;;  %v2144_v28 = vld [vmem:[#allocation7 + $0x1a0] sm:$0xff]  ;;  %v2129_v29 = vld [vmem:[#allocation7 + $0x128] sm:$0xff] }
 0x52f   :  { %v5100_v33 = vcombine.high %v2128_v27, %v2144_v28  ;;  %v5099_v39 = vcombine.low %v2128_v27, %v2144_v28  ;;  %v5101_v40 = vcombine.low %v2129_v29, %v2145_v30  ;;  %v2119_v27 = vld [vmem:[#allocation7 + $0xd8] sm:$0xff] }
 0x530   :  { %5053 = vmatmul.mubr.msk.bf16.vlgmr.msra.gmra.mxu1 %vm225_vm1, %v6135_v14  ;;  %5054 = vmatmul.mubr.msk.bf16.vlgmr.msra.gmra.mxu0 %vm225_vm1, %v6135_v14 }
 0x531   :  { %1746 = vmatpush1.bf16.msra.mxu1 %v5035_v34  ;;  %1787 = vmatpush1.bf16.msra.mxu0 %v5037_v35  ;;  %v5102_v34 = vcombine.high %v2129_v29, %v2145_v30  ;;  %v2096_v35 = vld [vmem:[#allocation7 + $0x20] sm:$0xff] }
 0x532   :  { %1747 = vmatprep.subr.bf16.mxu1 %v5004_v36  ;;  %1788 = vmatprep.subr.bf16.mxu0 %v5006_v37  ;;  %v2112_v36 = vld [vmem:[#allocation7 + $0xa0] sm:$0xff]  ;;  %v2097_v37 = vld [vmem:[#allocation7 + $0x28] sm:$0xff] }
 0x533   :  { %1765 = vmatprep.mubr.bf16.mxu1 %v6871_v55  ;;  %1806 = vmatprep.mubr.bf16.mxu0 %v6871_v55  ;;  %v5068_v41 = vcombine.high %v2096_v35, %v2112_v36  ;;  %v5067_v47 = vcombine.low %v2096_v35, %v2112_v36  ;;  %v5069_v48 = vcombine.low %v2097_v37, %v2113_v38  ;;  %v2153_v35 = vld [vmem:[#allocation7 + $0x1e8] sm:$0xff] }
 0x535   :  { %1748 = vmatpush1.bf16.msra.mxu1 %v5003_v42  ;;  %1789 = vmatpush1.bf16.msra.mxu0 %v5005_v43  ;;  %v5070_v42 = vcombine.high %v2097_v37, %v2113_v38  ;;  %v2130_v43 = vld [vmem:[#allocation7 + $0x130] sm:$0xff] }
 0x536   :  { %1827 = vmatprep.subr.bf16.mxu1 %v5040_v44  ;;  %1868 = vmatprep.subr.bf16.mxu0 %v5042_v45  ;;  %v2146_v44 = vld [vmem:[#allocation7 + $0x1b0] sm:$0xff]  ;;  %v2131_v45 = vld [vmem:[#allocation7 + $0x138] sm:$0xff] }
 0x537   :  { %v5104_v49 = vcombine.high %v2130_v43, %v2146_v44  ;;  %v5103_v56 = vcombine.low %v2130_v43, %v2146_v44  ;;  %v5105_v57 = vcombine.low %v2131_v45, %v2147_v46  ;;  %v2121_v43 = vld [vmem:[#allocation7 + $0xe8] sm:$0xff] }
 0x538   :  { %5055 = vmatmul.mubr.msk.bf16.vlgmr.msra.gmra.mxu1 %vm225_vm1, %v6135_v14  ;;  %5056 = vmatmul.mubr.msk.bf16.vlgmr.msra.gmra.mxu0 %vm225_vm1, %v6135_v14 }
 0x539   :  { %1828 = vmatpush1.bf16.msra.mxu1 %v5039_v50  ;;  %1869 = vmatpush1.bf16.msra.mxu0 %v5041_v51  ;;  %v5106_v50 = vcombine.high %v2131_v45, %v2147_v46  ;;  %v2098_v51 = vld [vmem:[#allocation7 + $0x30] sm:$0xff] }
 0x53a   :  { %1829 = vmatprep.subr.bf16.mxu1 %v5008_v52  ;;  %1870 = vmatprep.subr.bf16.mxu0 %v5010_v53  ;;  %v2114_v52 = vld [vmem:[#allocation7 + $0xb0] sm:$0xff]  ;;  %v2099_v53 = vld [vmem:[#allocation7 + $0x38] sm:$0xff] }
 0x53b   :  { %1847 = vmatprep.mubr.bf16.mxu1 %v6871_v55  ;;  %1888 = vmatprep.mubr.bf16.mxu0 %v6871_v55  ;;  %v5072_v58 = vcombine.high %v2098_v51, %v2114_v52  ;;  %v5071_v2 = vcombine.low %v2098_v51, %v2114_v52  ;;  %v5073_v3 = vcombine.low %v2099_v53, %v2115_v54  ;;  %v2155_v51 = vld [vmem:[#allocation7 + $0x1f8] sm:$0xff] }
 0x53d   :  { %1830 = vmatpush1.bf16.msra.mxu1 %v5007_v59  ;;  %1871 = vmatpush1.bf16.msra.mxu0 %v5009_v60  ;;  %v5074_v59 = vcombine.high %v2099_v53, %v2115_v54  ;;  %v2132_v60 = vld [vmem:[#allocation7 + $0x140] sm:$0xff] }
 0x53e   :  { %2488 = vmatprep.subr.bf16.mxu1 %v5092_v62  ;;  %2529 = vmatprep.subr.bf16.mxu0 %v5094_v63  ;;  %v2148_v62 = vld [vmem:[#allocation7 + $0x1c0] sm:$0xff]  ;;  %v2133_v63 = vld [vmem:[#allocation7 + $0x148] sm:$0xff] }
 0x53f   :  { %v5108_v4 = vcombine.high %v2132_v60, %v2148_v62  ;;  %v5107_v11 = vcombine.low %v2132_v60, %v2148_v62  ;;  %v5109_v12 = vcombine.low %v2133_v63, %v2149_v0  ;;  %v2123_v60 = vld [vmem:[#allocation7 + $0xf8] sm:$0xff] }
 0x540   :  { %5057 = vmatmul.mubr.msk.bf16.vlgmr.msra.gmra.mxu1 %vm225_vm1, %v6135_v14  ;;  %5058 = vmatmul.mubr.msk.bf16.vlgmr.msra.gmra.mxu0 %vm225_vm1, %v6135_v14 }
 0x541   :  { %2489 = vmatpush1.bf16.msra.mxu1 %v5091_v6  ;;  %2530 = vmatpush1.bf16.msra.mxu0 %v5093_v7  ;;  %v5110_v6 = vcombine.high %v2133_v63, %v2149_v0  ;;  %v2100_v7 = vld [vmem:[#allocation7 + $0x40] sm:$0xff] }
 0x542   :  { %2490 = vmatprep.subr.bf16.mxu1 %v5060_v8  ;;  %2531 = vmatprep.subr.bf16.mxu0 %v5062_v9  ;;  %v2116_v8 = vld [vmem:[#allocation7 + $0xc0] sm:$0xff]  ;;  %v2101_v9 = vld [vmem:[#allocation7 + $0x48] sm:$0xff] }
 0x543   :  { %2508 = vmatprep.mubr.bf16.mxu1 %v6871_v55  ;;  %2549 = vmatprep.mubr.bf16.mxu0 %v6871_v55  ;;  %v5076_v13 = vcombine.high %v2100_v7, %v2116_v8  ;;  %v5075_v21 = vcombine.low %v2100_v7, %v2116_v8  ;;  %v5077_v22 = vcombine.low %v2101_v9, %v2117_v10 }
 0x545   :  { %2491 = vmatpush1.bf16.msra.mxu1 %v5059_v15  ;;  %2532 = vmatpush1.bf16.msra.mxu0 %v5061_v16  ;;  %v5078_v15 = vcombine.high %v2101_v9, %v2117_v10  ;;  %v2134_v16 = vld [vmem:[#allocation7 + $0x150] sm:$0xff] }
 0x546   :  { %2570 = vmatprep.subr.bf16.mxu1 %v5096_v18  ;;  %2611 = vmatprep.subr.bf16.mxu0 %v5098_v19  ;;  %v2150_v18 = vld [vmem:[#allocation7 + $0x1d0] sm:$0xff]  ;;  %v2135_v19 = vld [vmem:[#allocation7 + $0x158] sm:$0xff] }
 0x547   :  { %v5112_v23 = vcombine.high %v2134_v16, %v2150_v18  ;;  %v5111_v28 = vcombine.low %v2134_v16, %v2150_v18  ;;  %v5113_v29 = vcombine.low %v2135_v19, %v2151_v20  ;;  %v4969_v16 = vld [vmem:[%s6944_s24] ss:$0 sm:$0xff] }
 0x548   :  { %5123 = vmatmul.mubr.msk.bf16.vlgmr.msra.gmra.mxu1 %vm225_vm1, %v6135_v14  ;;  %5124 = vmatmul.mubr.msk.bf16.vlgmr.msra.gmra.mxu0 %vm225_vm1, %v6135_v14 }
 0x549   :  { %2571 = vmatpush1.bf16.msra.mxu1 %v5095_v17  ;;  %2612 = vmatpush1.bf16.msra.mxu0 %v5097_v24  ;;  %v5114_v17 = vcombine.high %v2135_v19, %v2151_v20  ;;  %v2102_v24 = vld [vmem:[#allocation7 + $0x50] sm:$0xff] }
 0x54a   :  { %2572 = vmatprep.subr.bf16.mxu1 %v5064_v25  ;;  %2613 = vmatprep.subr.bf16.mxu0 %v5066_v26  ;;  %v2118_v25 = vld [vmem:[#allocation7 + $0xd0] sm:$0xff]  ;;  %v2103_v26 = vld [vmem:[#allocation7 + $0x58] sm:$0xff] }
 0x54b   :  { %2590 = vmatprep.mubr.bf16.mxu1 %v6871_v55  ;;  %2631 = vmatprep.mubr.bf16.mxu0 %v6871_v55  ;;  %v5080_v30 = vcombine.high %v2102_v24, %v2118_v25  ;;  %v5079_v36 = vcombine.low %v2102_v24, %v2118_v25  ;;  %v5081_v37 = vcombine.low %v2103_v26, %v2119_v27 }
 0x54d   :  { %2573 = vmatpush1.bf16.msra.mxu1 %v5063_v31  ;;  %2614 = vmatpush1.bf16.msra.mxu0 %v5065_v32  ;;  %v5082_v31 = vcombine.high %v2103_v26, %v2119_v27  ;;  %v2136_v32 = vld [vmem:[#allocation7 + $0x160] sm:$0xff] }
 0x54e   :  { %2652 = vmatprep.subr.bf16.mxu1 %v5100_v33  ;;  %2693 = vmatprep.subr.bf16.mxu0 %v5102_v34  ;;  %v2152_v33 = vld [vmem:[#allocation7 + $0x1e0] sm:$0xff]  ;;  %v2137_v34 = vld [vmem:[#allocation7 + $0x168] sm:$0xff] }
 0x54f   :  { %v5116_v38 = vcombine.high %v2136_v32, %v2152_v33  ;;  %v5115_v44 = vcombine.low %v2136_v32, %v2152_v33  ;;  %v5117_v45 = vcombine.low %v2137_v34, %v2153_v35  ;;  %v3360_v27 = vld [vmem:[#allocation9 + $0x100] sm:$0xff] }
 0x550   :  { %5125 = vmatmul.mubr.msk.bf16.vlgmr.msra.gmra.mxu1 %vm225_vm1, %v6135_v14  ;;  %5126 = vmatmul.mubr.msk.bf16.vlgmr.msra.gmra.mxu0 %vm225_vm1, %v6135_v14 }
 0x551   :  { %2653 = vmatpush1.bf16.msra.mxu1 %v5099_v39  ;;  %2694 = vmatpush1.bf16.msra.mxu0 %v5101_v40  ;;  %v5118_v39 = vcombine.high %v2137_v34, %v2153_v35  ;;  %v2104_v40 = vld [vmem:[#allocation7 + $0x60] sm:$0xff] }
 0x552   :  { %2654 = vmatprep.subr.bf16.mxu1 %v5068_v41  ;;  %2695 = vmatprep.subr.bf16.mxu0 %v5070_v42  ;;  %v2120_v41 = vld [vmem:[#allocation7 + $0xe0] sm:$0xff]  ;;  %v2105_v42 = vld [vmem:[#allocation7 + $0x68] sm:$0xff] }
 0x553   :  { %2672 = vmatprep.mubr.bf16.mxu1 %v6871_v55  ;;  %2713 = vmatprep.mubr.bf16.mxu0 %v6871_v55  ;;  %v5084_v46 = vcombine.high %v2104_v40, %v2120_v41  ;;  %v5083_v52 = vcombine.low %v2104_v40, %v2120_v41  ;;  %v5085_v53 = vcombine.low %v2105_v42, %v2121_v43  ;;  %v3328_v34 = vld [vmem:[#allocation9] sm:$0xff] }
 0x554   :  { %v3344_v35 = vld [vmem:[#allocation9 + $0x80] sm:$0xff] }
 0x555   :  { %2655 = vmatpush1.bf16.msra.mxu1 %v5067_v47  ;;  %2696 = vmatpush1.bf16.msra.mxu0 %v5069_v48  ;;  %v5086_v47 = vcombine.high %v2105_v42, %v2121_v43  ;;  %v2138_v48 = vld [vmem:[#allocation7 + $0x170] sm:$0xff] }
 0x556   :  { %2734 = vmatprep.subr.bf16.mxu1 %v5104_v49  ;;  %2775 = vmatprep.subr.bf16.mxu0 %v5106_v50  ;;  %v2154_v49 = vld [vmem:[#allocation7 + $0x1f0] sm:$0xff]  ;;  %v2139_v50 = vld [vmem:[#allocation7 + $0x178] sm:$0xff] }
 0x557   :  { %v5120_v54 = vcombine.high %v2138_v48, %v2154_v49  ;;  %v5119_v62 = vcombine.low %v2138_v48, %v2154_v49  ;;  %v5121_v63 = vcombine.low %v2139_v50, %v2155_v51  ;;  %v6253_v42 = vld [vmem:[#allocation9 + $0x110] sm:$0xff] }
 0x558   :  { %5127 = vmatmul.mubr.msk.bf16.vlgmr.msra.gmra.mxu1 %vm225_vm1, %v6135_v14  ;;  %5128 = vmatmul.mubr.msk.bf16.vlgmr.msra.gmra.mxu0 %vm225_vm1, %v6135_v14  ;;  %v6255_v43 = vld [vmem:[#allocation9 + $0x190] sm:$0xff] }
 0x559   :  { %2735 = vmatpush1.bf16.msra.mxu1 %v5103_v56  ;;  %2776 = vmatpush1.bf16.msra.mxu0 %v5105_v57  ;;  %v5122_v56 = vcombine.high %v2139_v50, %v2155_v51  ;;  %v2106_v57 = vld [vmem:[#allocation7 + $0x70] sm:$0xff] }
 0x55a   :  { %2736 = vmatprep.subr.bf16.mxu1 %v5072_v58  ;;  %2777 = vmatprep.subr.bf16.mxu0 %v5074_v59  ;;  %v2122_v58 = vld [vmem:[#allocation7 + $0xf0] sm:$0xff]  ;;  %v2107_v59 = vld [vmem:[#allocation7 + $0x78] sm:$0xff] }
 0x55b   :  { %2754 = vmatprep.mubr.bf16.mxu1 %v6871_v55  ;;  %2795 = vmatprep.mubr.bf16.mxu0 %v6871_v55  ;;  %v5088_v0 = vcombine.high %v2106_v57, %v2122_v58 }
 0x55d   :  { %2737 = vmatpush1.bf16.msra.mxu1 %v5071_v2  ;;  %2778 = vmatpush1.bf16.msra.mxu0 %v5073_v3  ;;  %v5090_v2 = vcombine.high %v2107_v59, %v2123_v60  ;;  %v5087_v3 = vcombine.low %v2106_v57, %v2122_v58 }
 0x55e   :  { %2816 = vmatprep.subr.bf16.mxu1 %v5108_v4  ;;  %2857 = vmatprep.subr.bf16.mxu0 %v5110_v6  ;;  %v5089_v4 = vcombine.low %v2107_v59, %v2123_v60 }
 0x560   :  { %5129 = vmatmul.mubr.msk.bf16.vlgmr.msra.gmra.mxu1 %vm225_vm1, %v6135_v14  ;;  %5130 = vmatmul.mubr.msk.bf16.vlgmr.msra.gmra.mxu0 %vm225_vm1, %v6135_v14 }
 0x561   :  { %2817 = vmatpush1.bf16.msra.mxu1 %v5107_v11  ;;  %2858 = vmatpush1.bf16.msra.mxu0 %v5109_v12 }
 0x562   :  { %2818 = vmatprep.subr.bf16.mxu1 %v5076_v13  ;;  %2859 = vmatprep.subr.bf16.mxu0 %v5078_v15  ;;  %v4968_v13 = vld [vmem:[%s6943_s19] ss:$0 sm:$0xff] }
 0x563   :  { %2836 = vmatprep.mubr.bf16.mxu1 %v6871_v55  ;;  %2877 = vmatprep.mubr.bf16.mxu0 %v6871_v55 }
 0x565   :  { %2819 = vmatpush1.bf16.msra.mxu1 %v5075_v21  ;;  %2860 = vmatpush1.bf16.msra.mxu0 %v5077_v22  ;;  %v4974_v21 = vld [vmem:[%s6945_s30] ss:$0 sm:$0xff] }
 0x566   :  { %2898 = vmatprep.subr.bf16.mxu1 %v5112_v23  ;;  %2939 = vmatprep.subr.bf16.mxu0 %v5114_v17  ;;  %v4975_v17 = vld [vmem:[%s6946_s27] ss:$0 sm:$0xff] }
 0x568   :  { %5131 = vmatmul.mubr.msk.bf16.vlgmr.msra.gmra.mxu1 %vm225_vm1, %v6135_v14  ;;  %5132 = vmatmul.mubr.msk.bf16.vlgmr.msra.gmra.mxu0 %vm225_vm1, %v6135_v14 }
 0x569   :  { %2899 = vmatpush1.bf16.msra.mxu1 %v5111_v28  ;;  %2940 = vmatpush1.bf16.msra.mxu0 %v5113_v29  ;;  %v3376_v28 = vld [vmem:[#allocation9 + $0x180] sm:$0xff]  ;;  %v3361_v29 = vld [vmem:[#allocation9 + $0x108] sm:$0xff] }
 0x56a   :  { %2900 = vmatprep.subr.bf16.mxu1 %v5080_v30  ;;  %2941 = vmatprep.subr.bf16.mxu0 %v5082_v31  ;;  %v5172_v30 = vcombine.high %v3360_v27, %v3376_v28  ;;  %v3377_v31 = vld [vmem:[#allocation9 + $0x188] sm:$0xff] }
 0x56b   :  { %2918 = vmatprep.mubr.bf16.mxu1 %v6871_v55  ;;  %2959 = vmatprep.mubr.bf16.mxu0 %v6871_v55  ;;  %v5173_v32 = vcombine.low %v3361_v29, %v3377_v31  ;;  %v5174_v33 = vcombine.high %v3361_v29, %v3377_v31 }
 0x56d   :  { %2901 = vmatpush1.bf16.msra.mxu1 %v5079_v36  ;;  %2942 = vmatpush1.bf16.msra.mxu0 %v5081_v37  ;;  %v3329_v36 = vld [vmem:[#allocation9 + $0x8] sm:$0xff]  ;;  %v5140_v37 = vcombine.high %v3328_v34, %v3344_v35 }
 0x56e   :  { %2980 = vmatprep.subr.bf16.mxu1 %v5116_v38  ;;  %3021 = vmatprep.subr.bf16.mxu0 %v5118_v39  ;;  %v3345_v38 = vld [vmem:[#allocation9 + $0x88] sm:$0xff]  ;;  %v5139_v39 = vcombine.low %v3328_v34, %v3344_v35 }
 0x56f   :  { %v5141_v40 = vcombine.low %v3329_v36, %v3345_v38  ;;  %v5142_v41 = vcombine.high %v3329_v36, %v3345_v38 }
 0x570   :  { %5133 = vmatmul.mubr.msk.bf16.vlgmr.msra.gmra.mxu1 %vm225_vm1, %v6135_v14  ;;  %5134 = vmatmul.mubr.msk.bf16.vlgmr.msra.gmra.mxu0 %vm225_vm1, %v6135_v14 }
 0x571   :  { %2981 = vmatpush1.bf16.msra.mxu1 %v5115_v44  ;;  %3022 = vmatpush1.bf16.msra.mxu0 %v5117_v45  ;;  %v6257_v44 = vld [vmem:[#allocation9 + $0x118] sm:$0xff]  ;;  %v5176_v45 = vcombine.high %v6253_v42, %v6255_v43 }
 0x572   :  { %2982 = vmatprep.subr.bf16.mxu1 %v5084_v46  ;;  %3023 = vmatprep.subr.bf16.mxu0 %v5086_v47  ;;  %v6261_v46 = vld [vmem:[#allocation9 + $0x198] sm:$0xff]  ;;  %v6867_v47 = vmov 1  }
 0x573   :  { %3000 = vmatprep.mubr.bf16.mxu1 %v6871_v55  ;;  %3041 = vmatprep.mubr.bf16.mxu0 %v6871_v55  ;;  %v5178_v50 = vcombine.high %v6257_v44, %v6261_v46 }
 0x574   :  { %5459 = vset.pattern.permute.xlu0 %v6867_v47 }
 0x575   :  { %2983 = vmatpush1.bf16.msra.mxu1 %v5083_v52  ;;  %3024 = vmatpush1.bf16.msra.mxu0 %v5085_v53 }
 0x576   :  { %3062 = vmatprep.subr.bf16.mxu1 %v5120_v54  ;;  %3103 = vmatprep.subr.bf16.mxu0 %v5122_v56 }
 0x578   :  { %5135 = vmatmul.mubr.msk.bf16.vlgmr.msra.gmra.mxu1 %vm225_vm1, %v6135_v14  ;;  %5136 = vmatmul.mubr.msk.bf16.vlgmr.msra.gmra.mxu0 %vm225_vm1, %v6135_v14 }
 0x579   :  { %3063 = vmatpush1.bf16.msra.mxu1 %v5119_v62  ;;  %3104 = vmatpush1.bf16.msra.mxu0 %v5121_v63 }
 0x57a   :  { %3064 = vmatprep.subr.bf16.mxu1 %v5088_v0  ;;  %3105 = vmatprep.subr.bf16.mxu0 %v5090_v2 }
 0x57b   :  { %3082 = vmatprep.mubr.bf16.mxu1 %v6871_v55  ;;  %3123 = vmatprep.mubr.bf16.mxu0 %v6871_v55 }
 0x57d   :  { %3065 = vmatpush1.bf16.msra.mxu1 %v5087_v3  ;;  %3106 = vmatpush1.bf16.msra.mxu0 %v5089_v4 }
 0x57e   :  { %3727 = vmatprep.subr.bf16.mxu1 %v5172_v30  ;;  %3768 = vmatprep.subr.bf16.mxu0 %v5174_v33 }
 0x580   :  { %5137 = vmatmul.mubr.msk.bf16.vlgmr.msra.gmra.mxu1 %vm225_vm1, %v6135_v14  ;;  %5138 = vmatmul.mubr.msk.bf16.vlgmr.msra.gmra.mxu0 %vm225_vm1, %v6135_v14  ;;  %v669_v6 = vpop.xlane.xlu1 %668 }
 0x581   :  { %v670_v7 = vmul.f32 0.03125, %v669_v6  ;;  %3747 = vmatprep.mubr.bf16.mxu1 %v6871_v55  ;;  %3788 = vmatprep.mubr.bf16.mxu0 %v6871_v55 }
 0x582   :  { %3769 = vmatpush1.bf16.msra.mxu0 %v5173_v32 }
 0x583   :  { %v671_v8 = vadd.f32 1e-05, %v670_v7  ;;  %3770 = vmatprep.subr.bf16.mxu0 %v5142_v41 }
 0x585   :  { %5582 = vrsqrt.f32 %v671_v8 }
 0x586   :  { %3771 = vmatpush1.bf16.msra.mxu0 %v5141_v40 }
 0x587   :  { %3850 = vmatprep.subr.bf16.mxu0 %v5178_v50 }
 0x588   :  { %v807_v9 = vpop.xlane.xlu0 %806 }
 0x589   :  { %v808_v10 = vmul.f32 0.03125, %v807_v9 }
 0x58b   :  { %v809_v11 = vadd.f32 1e-05, %v808_v10 }
 0x58d   :  { %5584 = vrsqrt.f32 %v809_v11 }
 0x592   :  { %v5583_v12 = vpop.eup %5582 }
 0x593   :  { %v673_v15 = vmul.f32 %v5583_v12, %v6124_v61 }
 0x595   :  { %v680_v14 = vmul.f32 %v4968_v13, %v673_v15 }
 0x597   :  { %v6236_v18 = vadd.f32 %v4969_v16, %v680_v14 }
 0x599   :  { %v836_v19 = vmul.f32 %v6236_v18, %v6236_v18  ;;  %827 = vst.msk [vmem:[#allocation13] sm:$0xff] %vm225_vm1, %v6236_v18 }
 0x59a   :  { %v5585_v20 = vpop.eup %5584 }
 0x59b   :  { %v837_v22 = vsel %vm225_vm1, %v836_v19, 0.0  ;;  %v811_v23 = vmul.f32 %v5585_v20, %v6129_v5  ;;  %v5171_v5 = vcombine.low %v3360_v27, %v3376_v28 }
 0x59c   :  { %838 = vadd.xlane.f32.xlu1 %v837_v22 }
 0x59d   :  { %v818_v24 = vmul.f32 %v4974_v21, %v811_v23  ;;  %3728 = vmatpush1.bf16.msra.mxu1 %v5171_v5 }
 0x59e   :  { %3729 = vmatprep.subr.bf16.mxu1 %v5140_v37 }
 0x59f   :  { %v6246_v61 = vadd.f32 %v4975_v17, %v818_v24 }
 0x5a1   :  { %v843_v25 = vmul.f32 %v6246_v61, %v6246_v61  ;;  %828 = vst.msk [vmem:[#allocation14] sm:$0xff] %vm225_vm1, %v6246_v61  ;;  %3730 = vmatpush1.bf16.msra.mxu1 %v5139_v39 }
 0x5a2   :  { %3809 = vmatprep.subr.bf16.mxu1 %v5176_v45 }
 0x5a3   :  { %v844_v26 = vsel %vm225_vm1, %v843_v25, 0.0 }
 0x5a4   :  { %845 = vadd.xlane.f32.xlu0 %v844_v26 }
 0x5c8   :  { %v6270_v51 = vpop.f32.mrf.mxu1  ;;  %v6272_v52 = vpop.f32.mrf.mxu0 }
 0x5ca   :  { %v6274_v53 = vpop.f32.mrf.mxu1  ;;  %v6276_v54 = vpop.f32.mrf.mxu0 }
 0x5cc   :  { %v1279_v56 = vpop.f32.mrf.mxu1  ;;  %v1320_v57 = vpop.f32.mrf.mxu0 }
 0x5ce   :  { %v1280_v58 = vpop.f32.mrf.mxu1  ;;  %v1321_v59 = vpop.f32.mrf.mxu0 }
 0x5d0   :  { %v6278_v60 = vpop.f32.mrf.mxu1  ;;  %v6280_v62 = vpop.f32.mrf.mxu0 }
 0x5d2   :  { %v6282_v63 = vpop.f32.mrf.mxu1  ;;  %v6284_v0 = vpop.f32.mrf.mxu0 }
 0x5d4   :  { %v1361_v2 = vpop.f32.mrf.mxu1  ;;  %v1402_v3 = vpop.f32.mrf.mxu0 }
 0x5d6   :  { %v1362_v4 = vpop.f32.mrf.mxu1  ;;  %v1403_v6 = vpop.f32.mrf.mxu0 }
 0x5d8   :  { %v6286_v7 = vpop.f32.mrf.mxu1  ;;  %v6288_v8 = vpop.f32.mrf.mxu0 }
 0x5da   :  { %v6290_v9 = vpop.f32.mrf.mxu1  ;;  %v6292_v10 = vpop.f32.mrf.mxu0 }
 0x5dc   :  { %v1443_v11 = vpop.f32.mrf.mxu1  ;;  %v1484_v12 = vpop.f32.mrf.mxu0 }
 0x5de   :  { %v1444_v13 = vpop.f32.mrf.mxu1  ;;  %v1485_v15 = vpop.f32.mrf.mxu0 }
 0x5e0   :  { %v6294_v16 = vpop.f32.mrf.mxu1  ;;  %v6296_v14 = vpop.f32.mrf.mxu0 }
 0x5e2   :  { %v6298_v19 = vpop.f32.mrf.mxu1  ;;  %v6300_v20 = vpop.f32.mrf.mxu0 }
 0x5e4   :  { %v1525_v21 = vpop.f32.mrf.mxu1  ;;  %v1566_v22 = vpop.f32.mrf.mxu0 }
 0x5e6   :  { %v1526_v23 = vpop.f32.mrf.mxu1  ;;  %v1567_v17 = vpop.f32.mrf.mxu0 }
 0x5e8   :  { %v6302_v24 = vpop.f32.mrf.mxu1  ;;  %v6304_v25 = vpop.f32.mrf.mxu0 }
 0x5ea   :  { %v6306_v26 = vpop.f32.mrf.mxu1  ;;  %v6308_v27 = vpop.f32.mrf.mxu0 }
 0x5ec   :  { %v1607_v28 = vpop.f32.mrf.mxu1  ;;  %v1648_v29 = vpop.f32.mrf.mxu0 }
 0x5ee   :  { %v1608_v30 = vpop.f32.mrf.mxu1  ;;  %v1649_v31 = vpop.f32.mrf.mxu0 }
 0x5f0   :  { %v6310_v5 = vpop.f32.mrf.mxu1  ;;  %v6312_v32 = vpop.f32.mrf.mxu0 }
 0x5f2   :  { %v6314_v33 = vpop.f32.mrf.mxu1  ;;  %v6316_v34 = vpop.f32.mrf.mxu0 }
 0x5f4   :  { %v1689_v35 = vpop.f32.mrf.mxu1  ;;  %v1730_v36 = vpop.f32.mrf.mxu0 }
 0x5f6   :  { %v1690_v37 = vpop.f32.mrf.mxu1  ;;  %v1731_v38 = vpop.f32.mrf.mxu0 }
 0x5f8   :  { %v6318_v39 = vpop.f32.mrf.mxu1  ;;  %v6320_v40 = vpop.f32.mrf.mxu0 }
 0x5fa   :  { %v6322_v41 = vpop.f32.mrf.mxu1  ;;  %v6324_v45 = vpop.f32.mrf.mxu0 }
 0x5fc   :  { %v1771_v50 = vpop.f32.mrf.mxu1  ;;  %v1812_v56 = vpop.f32.mrf.mxu0 }
 0x5fe   :  { %v1772_v57 = vpop.f32.mrf.mxu1  ;;  %v1813_v58 = vpop.f32.mrf.mxu0 }
 0x600   :  { %v6326_v59 = vpop.f32.mrf.mxu1  ;;  %v6328_v2 = vpop.f32.mrf.mxu0 }
 0x602   :  { %v6330_v3 = vpop.f32.mrf.mxu1  ;;  %v6332_v4 = vpop.f32.mrf.mxu0 }
 0x604   :  { %v1853_v6 = vpop.f32.mrf.mxu1  ;;  %v1894_v11 = vpop.f32.mrf.mxu0 }
 0x606   :  { %v1854_v12 = vpop.f32.mrf.mxu1  ;;  %v1895_v13 = vpop.f32.mrf.mxu0 }
 0x608   :  { %v6334_v15 = vpop.f32.mrf.mxu1  ;;  %v6336_v21 = vpop.f32.mrf.mxu0 }
 0x60a   :  { %v6338_v22 = vpop.f32.mrf.mxu1  ;;  %v6340_v23 = vpop.f32.mrf.mxu0 }
 0x60c   :  { %v2514_v17 = vpop.f32.mrf.mxu1  ;;  %v2555_v28 = vpop.f32.mrf.mxu0 }
 0x60e   :  { %v2515_v29 = vpop.f32.mrf.mxu1  ;;  %v2556_v30 = vpop.f32.mrf.mxu0 }
 0x610   :  { %v6342_v31 = vpop.f32.mrf.mxu1  ;;  %v6344_v35 = vpop.f32.mrf.mxu0 }
 0x611   :  { %6947 = vst [vmem:[#allocation42_spill] sm:$0xff] %v6342_v31  ;;  %6948 = vst [vmem:[#allocation43_spill] sm:$0xff] %v6344_v35  ;;  %v6973_v35 = vmov 0  }
 0x612   :  { %v6346_v36 = vpop.f32.mrf.mxu1  ;;  %v6348_v37 = vpop.f32.mrf.mxu0 }
 0x613   :  { %6949 = vst [vmem:[#allocation44_spill] sm:$0xff] %v6346_v36  ;;  %6950 = vst [vmem:[#allocation45_spill] sm:$0xff] %v6348_v37 }
 0x614   :  { %v2596_v38 = vpop.f32.mrf.mxu1  ;;  %v2637_v50 = vpop.f32.mrf.mxu0 }
 0x616   :  { %v2597_v56 = vpop.f32.mrf.mxu1  ;;  %v2638_v57 = vpop.f32.mrf.mxu0 }
 0x618   :  { %v6350_v58 = vpop.f32.mrf.mxu1  ;;  %v6352_v6 = vpop.f32.mrf.mxu0 }
 0x619   :  { %6951 = vst [vmem:[#allocation46_spill] sm:$0xff] %v6350_v58  ;;  %6952 = vst [vmem:[#allocation47_spill] sm:$0xff] %v6352_v6 }
 0x61a   :  { %v6354_v11 = vpop.f32.mrf.mxu1  ;;  %v6356_v12 = vpop.f32.mrf.mxu0 }
 0x61b   :  { %6953 = vst [vmem:[#allocation48_spill] sm:$0xff] %v6354_v11  ;;  %6954 = vst [vmem:[#allocation49_spill] sm:$0xff] %v6356_v12 }
 0x61c   :  { %v2678_v13 = vpop.f32.mrf.mxu1  ;;  %v2719_v17 = vpop.f32.mrf.mxu0 }
 0x61e   :  { %v2679_v28 = vpop.f32.mrf.mxu1  ;;  %v2720_v29 = vpop.f32.mrf.mxu0 }
 0x620   :  { %v6358_v30 = vpop.f32.mrf.mxu1  ;;  %v6360_v47 = vpop.f32.mrf.mxu0 }
 0x621   :  { %6955 = vst [vmem:[#allocation50_spill] sm:$0xff] %v6358_v30  ;;  %6956 = vst [vmem:[#allocation51_spill] sm:$0xff] %v6360_v47  ;;  %v3346_v30 = vld [vmem:[#allocation9 + $0x90] sm:$0xff] }
 0x622   :  { %v6362_v38 = vpop.f32.mrf.mxu1  ;;  %v6364_v50 = vpop.f32.mrf.mxu0 }
 0x623   :  { %6957 = vst [vmem:[#allocation52_spill] sm:$0xff] %v6362_v38  ;;  %6958 = vst [vmem:[#allocation53_spill] sm:$0xff] %v6364_v50 }
 0x624   :  { %v2760_v56 = vpop.f32.mrf.mxu1  ;;  %v2801_v57 = vpop.f32.mrf.mxu0 }
 0x625   :  { %v839_v1 = vpop.xlane.xlu1 %838 }
 0x626   :  { %v840_v55 = vmax.f32 %v839_v1, 1e-24  ;;  %v2761_v49 = vpop.f32.mrf.mxu1  ;;  %v2802_v48 = vpop.f32.mrf.mxu0 }
 0x628   :  { %5586 = vrsqrt.f32 %v840_v55  ;;  %v6366_v12 = vpop.f32.mrf.mxu1  ;;  %v6368_v13 = vpop.f32.mrf.mxu0 }
 0x629   :  { %6959 = vst [vmem:[#allocation54_spill] sm:$0xff] %v6366_v12  ;;  %6960 = vst [vmem:[#allocation55_spill] sm:$0xff] %v6368_v13  ;;  %v1897_v12 = vstv %s4976_s4 }
 0x62a   :  { %v6370_v17 = vpop.f32.mrf.mxu1  ;;  %v6372_v28 = vpop.f32.mrf.mxu0 }
 0x62b   :  { %6961 = vst [vmem:[#allocation56_spill] sm:$0xff] %v6370_v17  ;;  %6962 = vst [vmem:[#allocation57_spill] sm:$0xff] %v6372_v28  ;;  %v3330_v17 = vld [vmem:[#allocation9 + $0x10] sm:$0xff] }
 0x62c   :  { %v2842_v29 = vpop.f32.mrf.mxu1  ;;  %v2883_v47 = vpop.f32.mrf.mxu0  ;;  %v5143_v11 = vcombine.low %v3330_v17, %v3346_v30 }
 0x62e   :  { %v2843_v38 = vpop.f32.mrf.mxu1  ;;  %v2884_v50 = vpop.f32.mrf.mxu0 }
 0x62f   :  { %v3331_v38 = vld [vmem:[#allocation9 + $0x18] sm:$0xff] }
 0x630   :  { %v6374_v56 = vpop.f32.mrf.mxu1  ;;  %v6376_v57 = vpop.f32.mrf.mxu0  ;;  %v3347_v50 = vld [vmem:[#allocation9 + $0x98] sm:$0xff] }
 0x631   :  { %6963 = vst [vmem:[#allocation58_spill] sm:$0xff] %v6374_v56  ;;  %6964 = vst [vmem:[#allocation59_spill] sm:$0xff] %v6376_v57 }
 0x632   :  { %v6378_v1 = vpop.f32.mrf.mxu1  ;;  %v6380_v55 = vpop.f32.mrf.mxu0 }
 0x633   :  { %6965 = vst [vmem:[#allocation60_spill] sm:$0xff] %v6378_v1  ;;  %6966 = vst [vmem:[#allocation61_spill] sm:$0xff] %v6380_v55 }
 0x634   :  { %v2924_v48 = vpop.f32.mrf.mxu1  ;;  %v2965_v49 = vpop.f32.mrf.mxu0 }
 0x635   :  { %v5587_v13 = vpop.eup %5586  ;;  %v5144_v48 = vcombine.high %v3330_v17, %v3346_v30  ;;  %v5146_v49 = vcombine.high %v3331_v38, %v3347_v50  ;;  %v3348_v17 = vld [vmem:[#allocation9 + $0xa0] sm:$0xff] }
 0x636   :  { %v842_v28 = vmul.f32 %v5587_v13, %v6236_v18  ;;  %v2925_v29 = vpop.f32.mrf.mxu1  ;;  %v2966_v47 = vpop.f32.mrf.mxu0  ;;  %v3380_v13 = vld [vmem:[#allocation9 + $0x1a0] sm:$0xff] }
 0x637   :  { %v3381_v29 = vld [vmem:[#allocation9 + $0x1a8] sm:$0xff]  ;;  %v6971_v47 = vcombine.low %v6253_v42, %v6255_v43  ;;  %v6883_v42 = vmov 2   ;;  %v6875_v43 = vmov 10  }
 0x638   :  { %v6383_v6 = vmul.f32 %v1897_v12, %v842_v28  ;;  %v6385_v56 = vpack.c.bf16 %v842_v28, %v842_v28  ;;  %v6387_v57 = vpop.f32.mrf.mxu1  ;;  %v6389_v1 = vpop.f32.mrf.mxu0  ;;  %v3364_v12 = vld [vmem:[#allocation9 + $0x120] sm:$0xff]  ;;  %v3365_v28 = vld [vmem:[#allocation9 + $0x128] sm:$0xff] }
 0x639   :  { %6967 = vst [vmem:[#allocation62_spill] sm:$0xff] %v6387_v57  ;;  %6968 = vst [vmem:[#allocation63_spill] sm:$0xff] %v6389_v1  ;;  %v6972_v1 = vcombine.low %v6257_v44, %v6261_v46  ;;  %v5180_v36 = vcombine.high %v3364_v12, %v3380_v13  ;;  %v5182_v31 = vcombine.high %v3365_v28, %v3381_v29  ;;  %v3332_v44 = vld [vmem:[#allocation9 + $0x20] sm:$0xff] }
 0x63a   :  { %v6391_v55 = vpop.f32.mrf.mxu1  ;;  %5203 = vmatmul.mubr.msk.bf16.vlgmr.msra.gmra.mxu1 %vm225_vm1, %v6385_v56  ;;  %5204 = vmatmul.mubr.msk.bf16.vlgmr.msra.gmra.mxu0 %vm225_vm1, %v6385_v56  ;;  %v6397_v18 = vpop.f32.mrf.mxu0 }
 0x63b   :  { %6969 = vst [vmem:[#allocation64_spill] sm:$0xff] %v6391_v55  ;;  %6970 = vst [vmem:[#allocation65_spill] sm:$0xff] %v6397_v18  ;;  %1901 = vperm.xlu1 %5458, %v6383_v6   ;;  %1907 = vperm.xlu0 %5459, %v6383_v6   ;;  %v5145_v18 = vcombine.low %v3331_v38, %v3347_v50 }
 0x63c   :  { %3810 = vmatpush1.bf16.msra.mxu1 %v6971_v47  ;;  %3851 = vmatpush1.bf16.msra.mxu0 %v6972_v1  ;;  %v3006_v55 = vpop.f32.mrf.mxu1  ;;  %v3047_v57 = vpop.f32.mrf.mxu0  ;;  %v3349_v1 = vld [vmem:[#allocation9 + $0xa8] sm:$0xff]  ;;  %v3382_v47 = vld [vmem:[#allocation9 + $0x1b0] sm:$0xff] }
 0x63d   :  { %3811 = vmatprep.subr.bf16.mxu1 %v5144_v48  ;;  %3852 = vmatprep.subr.bf16.mxu0 %v5146_v49  ;;  %v3333_v57 = vld [vmem:[#allocation9 + $0x28] sm:$0xff] }
 0x63e   :  { %v3007_v58 = vpop.f32.mrf.mxu1  ;;  %v3048_v37 = vpop.f32.mrf.mxu0  ;;  %3829 = vmatprep.mubr.bf16.mxu1 %v6973_v35  ;;  %3870 = vmatprep.mubr.bf16.mxu0 %v6973_v35  ;;  %v5150_v50 = vcombine.high %v3333_v57, %v3349_v1 }
 0x63f   :  { %5460 = vset.pattern.permute.xlu1 %v6883_v42  ;;  %5468 = vset.pattern.permute.xlu0 %v6875_v43  ;;  %v5179_v37 = vcombine.low %v3364_v12, %v3380_v13  ;;  %v5181_v58 = vcombine.low %v3365_v28, %v3381_v29  ;;  %v5149_v12 = vcombine.low %v3333_v57, %v3349_v1  ;;  %v6881_v13 = vmov 3   ;;  %v3350_v1 = vld [vmem:[#allocation9 + $0xb0] sm:$0xff]  ;;  %v3384_v43 = vld [vmem:[#allocation9 + $0x1c0] sm:$0xff] }
 0x640   :  { %3812 = vmatpush1.bf16.msra.mxu1 %v5143_v11  ;;  %3853 = vmatpush1.bf16.msra.mxu0 %v5145_v18  ;;  %v6411_v46 = vpop.f32.mrf.mxu1  ;;  %v6413_v30 = vpop.f32.mrf.mxu0  ;;  %v5148_v11 = vcombine.high %v3332_v44, %v3348_v17  ;;  %v5147_v18 = vcombine.low %v3332_v44, %v3348_v17  ;;  %v6873_v28 = vmov 13   ;;  %v3334_v44 = vld [vmem:[#allocation9 + $0x30] sm:$0xff] }
 0x641   :  { %1913 = vperm.xlu1 %5460, %v6383_v6   ;;  %1961 = vperm.xlu0 %5468, %v6383_v6  }
 0x642   :  { %v6417_v55 = vpop.f32.mrf.mxu1  ;;  %v6419_v38 = vpop.f32.mrf.mxu0  ;;  %3891 = vmatprep.subr.bf16.mxu1 %v5180_v36  ;;  %3932 = vmatprep.subr.bf16.mxu0 %v5182_v31  ;;  %v3366_v31 = vld [vmem:[#allocation9 + $0x130] sm:$0xff] }
 0x643   :  { %5205 = vmatmul.mubr.msk.bf16.vlgmr.msra.gmra.mxu1 %vm225_vm1, %v6385_v56  ;;  %5206 = vmatmul.mubr.msk.bf16.vlgmr.msra.gmra.mxu0 %vm225_vm1, %v6385_v56  ;;  %v5184_v17 = vcombine.high %v3366_v31, %v3382_v47 }
 0x644   :  { %3892 = vmatpush1.bf16.msra.mxu1 %v5179_v37  ;;  %3933 = vmatpush1.bf16.msra.mxu0 %v5181_v58  ;;  %v3088_v48 = vpop.f32.mrf.mxu1  ;;  %v3129_v49 = vpop.f32.mrf.mxu0  ;;  %v3367_v37 = vld [vmem:[#allocation9 + $0x138] sm:$0xff] }
 0x645   :  { %5461 = vset.pattern.permute.xlu1 %v6881_v13  ;;  %5471 = vset.pattern.permute.xlu0 %v6873_v28  ;;  %v3383_v58 = vld [vmem:[#allocation9 + $0x1b8] sm:$0xff]  ;;  %v6877_v28 = vmov 4  }
 0x646   :  { %1919 = vperm.xlu1 %5461, %v6383_v6   ;;  %1979 = vperm.xlu0 %5471, %v6383_v6   ;;  %v3089_v36 = vpop.f32.mrf.mxu1  ;;  %v3130_v29 = vpop.f32.mrf.mxu0  ;;  %v5186_v57 = vcombine.high %v3367_v37, %v3383_v58  ;;  %v3335_v48 = vld [vmem:[#allocation9 + $0x38] sm:$0xff] }
 0x647   :  { %3893 = vmatprep.subr.bf16.mxu1 %v5148_v11  ;;  %3934 = vmatprep.subr.bf16.mxu0 %v5150_v50  ;;  %v3351_v49 = vld [vmem:[#allocation9 + $0xb8] sm:$0xff]  ;;  %v6879_v36 = vmov 16   ;;  %v5183_v11 = vcombine.low %v3366_v31, %v3382_v47  ;;  %v5185_v50 = vcombine.low %v3367_v37, %v3383_v58  ;;  %v3368_v29 = vld [vmem:[#allocation9 + $0x140] sm:$0xff]  ;;  %v5151_v31 = vcombine.low %v3334_v44, %v3350_v1 }
 0x648   :  { %3894 = vmatpush1.bf16.msra.mxu1 %v5147_v18  ;;  %3935 = vmatpush1.bf16.msra.mxu0 %v5149_v12  ;;  %v5152_v18 = vcombine.high %v3334_v44, %v3350_v1  ;;  %v5154_v12 = vcombine.high %v3335_v48, %v3351_v49  ;;  %v5153_v47 = vcombine.low %v3335_v48, %v3351_v49  ;;  %v6903_v37 = vmov 5   ;;  %v3352_v44 = vld [vmem:[#allocation9 + $0xc0] sm:$0xff]  ;;  %v3337_v1 = vld [vmem:[#allocation9 + $0x48] sm:$0xff] }
 0x649   :  { %3911 = vmatprep.mubr.bf16.mxu1 %v6973_v35  ;;  %3952 = vmatprep.mubr.bf16.mxu0 %v6973_v35  ;;  %v6889_v58 = vmov 19   ;;  %v5188_v13 = vcombine.high %v3368_v29, %v3384_v43  ;;  %v3353_v48 = vld [vmem:[#allocation9 + $0xc8] sm:$0xff]  ;;  %v5187_v49 = vcombine.low %v3368_v29, %v3384_v43  ;;  %v3387_v29 = vld [vmem:[#allocation9 + $0x1d8] sm:$0xff] }
 0x64a   :  { %5462 = vset.pattern.permute.xlu1 %v6877_v28  ;;  %5474 = vset.pattern.permute.xlu0 %v6879_v36  ;;  %v3369_v28 = vld [vmem:[#allocation9 + $0x148] sm:$0xff] }
 0x64b   :  { %1925 = vperm.xlu1 %5462, %v6383_v6   ;;  %1997 = vperm.xlu0 %5474, %v6383_v6   ;;  %v3385_v36 = vld [vmem:[#allocation9 + $0x1c8] sm:$0xff] }
 0x64c   :  { %5207 = vmatmul.mubr.msk.bf16.vlgmr.msra.gmra.mxu1 %vm225_vm1, %v6385_v56  ;;  %5208 = vmatmul.mubr.msk.bf16.vlgmr.msra.gmra.mxu0 %vm225_vm1, %v6385_v56  ;;  %v5190_v42 = vcombine.high %v3369_v28, %v3385_v36 }
 0x64d   :  { %3973 = vmatprep.subr.bf16.mxu1 %v5184_v17  ;;  %4014 = vmatprep.subr.bf16.mxu0 %v5186_v57  ;;  %v3336_v17 = vld [vmem:[#allocation9 + $0x40] sm:$0xff]  ;;  %v846_v57 = vpop.xlane.xlu0 %845 }
 0x64e   :  { %3974 = vmatpush1.bf16.msra.mxu1 %v5183_v11  ;;  %4015 = vmatpush1.bf16.msra.mxu0 %v5185_v50  ;;  %v5189_v11 = vcombine.low %v3369_v28, %v3385_v36  ;;  %v847_v50 = vmax.f32 %v846_v57, 1e-24  ;;  %v5155_v43 = vcombine.low %v3336_v17, %v3352_v44  ;;  %v3386_v28 = vld [vmem:[#allocation9 + $0x1d0] sm:$0xff]  ;;  %v3371_v36 = vld [vmem:[#allocation9 + $0x158] sm:$0xff] }
 0x64f   :  { %5463 = vset.pattern.permute.xlu1 %v6903_v37  ;;  %5477 = vset.pattern.permute.xlu0 %v6889_v58  ;;  %v3373_v58 = vld [vmem:[#allocation9 + $0x168] sm:$0xff]  ;;  %v6974_v37 = vmov 2  }
 0x650   :  { %3975 = vmatprep.subr.bf16.mxu1 %v5152_v18  ;;  %4016 = vmatprep.subr.bf16.mxu0 %v5154_v12  ;;  %v5156_v18 = vcombine.high %v3336_v17, %v3352_v44  ;;  %v5158_v12 = vcombine.high %v3337_v1, %v3353_v48  ;;  %5588 = vrsqrt.f32 %v847_v50  ;;  %v5194_v17 = vcombine.high %v3371_v36, %v3387_v29  ;;  %v3338_v44 = vld [vmem:[#allocation9 + $0x50] sm:$0xff] }
 0x651   :  { %1931 = vperm.xlu1 %5463, %v6383_v6   ;;  %2015 = vperm.xlu0 %5477, %v6383_v6   ;;  %v3354_v50 = vld [vmem:[#allocation9 + $0xd0] sm:$0xff] }
 0x652   :  { %3976 = vmatpush1.bf16.msra.mxu1 %v5151_v31  ;;  %4017 = vmatpush1.bf16.msra.mxu0 %v5153_v47  ;;  %v6895_v31 = vmov 6   ;;  %v6887_v47 = vmov 22  }
 0x653   :  { %3993 = vmatprep.mubr.bf16.mxu1 %v6973_v35  ;;  %4034 = vmatprep.mubr.bf16.mxu0 %v6973_v35 }
 0x654   :  { %4055 = vmatprep.subr.bf16.mxu1 %v5188_v13  ;;  %4096 = vmatprep.subr.bf16.mxu0 %v5190_v42  ;;  %v5157_v13 = vcombine.low %v3337_v1, %v3353_v48  ;;  %v3370_v42 = vld [vmem:[#allocation9 + $0x150] sm:$0xff]  ;;  %v6891_v1 = vmov 7   ;;  %v6885_v48 = vmov 25  }
 0x655   :  { %5209 = vmatmul.mubr.msk.bf16.vlgmr.msra.gmra.mxu1 %vm225_vm1, %v6385_v56  ;;  %5210 = vmatmul.mubr.msk.bf16.vlgmr.msra.gmra.mxu0 %vm225_vm1, %v6385_v56  ;;  %v5192_v57 = vcombine.high %v3370_v42, %v3386_v28 }
 0x656   :  { %5464 = vset.pattern.permute.xlu1 %v6895_v31  ;;  %5480 = vset.pattern.permute.xlu0 %v6887_v47  ;;  %v3388_v47 = vld [vmem:[#allocation9 + $0x1e0] sm:$0xff]  ;;  %v3374_v31 = vld [vmem:[#allocation9 + $0x170] sm:$0xff] }
 0x657   :  { %4056 = vmatpush1.bf16.msra.mxu1 %v5187_v49  ;;  %4097 = vmatpush1.bf16.msra.mxu0 %v5189_v11  ;;  %v5191_v49 = vcombine.low %v3370_v42, %v3386_v28  ;;  %v5193_v11 = vcombine.low %v3371_v36, %v3387_v29  ;;  %v5159_v42 = vcombine.low %v3338_v44, %v3354_v50  ;;  %v3372_v36 = vld [vmem:[#allocation9 + $0x160] sm:$0xff]  ;;  %v6897_v29 = vmov 8  }
 0x658   :  { %1937 = vperm.xlu1 %5464, %v6383_v6   ;;  %2033 = vperm.xlu0 %5480, %v6383_v6  }
 0x659   :  { %4057 = vmatprep.subr.bf16.mxu1 %v5156_v18  ;;  %4098 = vmatprep.subr.bf16.mxu0 %v5158_v12  ;;  %v3339_v18 = vld [vmem:[#allocation9 + $0x58] sm:$0xff] }
 0x65a   :  { %4075 = vmatprep.mubr.bf16.mxu1 %v6973_v35  ;;  %4116 = vmatprep.mubr.bf16.mxu0 %v6973_v35  ;;  %v3355_v12 = vld [vmem:[#allocation9 + $0xd8] sm:$0xff] }
 0x65b   :  { %4058 = vmatpush1.bf16.msra.mxu1 %v5155_v43  ;;  %4099 = vmatpush1.bf16.msra.mxu0 %v5157_v13  ;;  %v5160_v43 = vcombine.high %v3338_v44, %v3354_v50  ;;  %v5162_v13 = vcombine.high %v3339_v18, %v3355_v12  ;;  %v5161_v28 = vcombine.low %v3339_v18, %v3355_v12  ;;  %v3357_v50 = vld [vmem:[#allocation9 + $0xe8] sm:$0xff]  ;;  %v6901_v12 = vmov 9  }
 0x65c   :  { %5465 = vset.pattern.permute.xlu1 %v6891_v1  ;;  %5483 = vset.pattern.permute.xlu0 %v6885_v48  ;;  %v6893_v48 = vmov 28   ;;  %v3389_v1 = vld [vmem:[#allocation9 + $0x1e8] sm:$0xff] }
 0x65d   :  { %1943 = vperm.xlu1 %5465, %v6383_v6   ;;  %2051 = vperm.xlu0 %5483, %v6383_v6   ;;  %v5198_v44 = vcombine.high %v3373_v58, %v3389_v1  ;;  %v5589_v18 = vpop.eup %5588 }
 0x65e   :  { %5211 = vmatmul.mubr.msk.bf16.vlgmr.msra.gmra.mxu1 %vm225_vm1, %v6385_v56  ;;  %5212 = vmatmul.mubr.msk.bf16.vlgmr.msra.gmra.mxu0 %vm225_vm1, %v6385_v56 }
 0x65f   :  { %4137 = vmatprep.subr.bf16.mxu1 %v5192_v57  ;;  %4178 = vmatprep.subr.bf16.mxu0 %v5194_v17  ;;  %v3340_v57 = vld [vmem:[#allocation9 + $0x60] sm:$0xff]  ;;  %v5196_v17 = vcombine.high %v3372_v36, %v3388_v47 }
 0x660   :  { %4138 = vmatpush1.bf16.msra.mxu1 %v5191_v49  ;;  %4179 = vmatpush1.bf16.msra.mxu0 %v5193_v11  ;;  %v3356_v49 = vld [vmem:[#allocation9 + $0xe0] sm:$0xff]  ;;  %v3341_v11 = vld [vmem:[#allocation9 + $0x68] sm:$0xff] }
 0x661   :  { %5466 = vset.pattern.permute.xlu1 %v6897_v29  ;;  %5486 = vset.pattern.permute.xlu0 %v6893_v48  ;;  %v6899_v48 = vmov 31   ;;  %v6478_v29 = vmul.f32 %v5589_v18, %v6246_v61  ;;  %v6911_v18 = vmov 11  }
 0x662   :  { %1949 = vperm.xlu1 %5466, %v6383_v6   ;;  %2069 = vperm.xlu0 %5486, %v6383_v6  }
 0x663   :  { %4139 = vmatprep.subr.bf16.mxu1 %v5160_v43  ;;  %4180 = vmatprep.subr.bf16.mxu0 %v5162_v13  ;;  %v5195_v43 = vcombine.low %v3372_v36, %v3388_v47  ;;  %v5197_v13 = vcombine.low %v3373_v58, %v3389_v1  ;;  %v3390_v47 = vld [vmem:[#allocation9 + $0x1f0] sm:$0xff]  ;;  %v3375_v58 = vld [vmem:[#allocation9 + $0x178] sm:$0xff]  ;;  %v3132_v36 = vstv %s6465_s2 }
 0x664   :  { %4140 = vmatpush1.bf16.msra.mxu1 %v5159_v42  ;;  %4181 = vmatpush1.bf16.msra.mxu0 %v5161_v28  ;;  %v5164_v42 = vcombine.high %v3340_v57, %v3356_v49  ;;  %v5166_v28 = vcombine.high %v3341_v11, %v3357_v50  ;;  %v3391_v1 = vld [vmem:[#allocation9 + $0x1f8] sm:$0xff]  ;;  %v5200_v61 = vcombine.high %v3374_v31, %v3390_v47 }
 0x665   :  { %4157 = vmatprep.mubr.bf16.mxu1 %v6973_v35  ;;  %4198 = vmatprep.mubr.bf16.mxu0 %v6973_v35 }
 0x666   :  { %5467 = vset.pattern.permute.xlu1 %v6901_v12  ;;  %5489 = vset.pattern.permute.xlu0 %v6899_v48  ;;  %v5163_v48 = vcombine.low %v3340_v57, %v3356_v49  ;;  %v5165_v12 = vcombine.low %v3341_v11, %v3357_v50  ;;  %v5199_v57 = vcombine.low %v3374_v31, %v3390_v47  ;;  %v3358_v11 = vld [vmem:[#allocation9 + $0xf0] sm:$0xff]  ;;  %v3343_v50 = vld [vmem:[#allocation9 + $0x78] sm:$0xff]  ;;  %v6975_v47 = vmov 5  }
 0x667   :  { %5213 = vmatmul.mubr.msk.bf16.vlgmr.msra.gmra.mxu1 %vm225_vm1, %v6385_v56  ;;  %5214 = vmatmul.mubr.msk.bf16.vlgmr.msra.gmra.mxu0 %vm225_vm1, %v6385_v56  ;;  %v5201_v49 = vcombine.low %v3375_v58, %v3391_v1 }
 0x668   :  { %4219 = vmatprep.subr.bf16.mxu1 %v5196_v17  ;;  %4260 = vmatprep.subr.bf16.mxu0 %v5198_v44  ;;  %v5202_v17 = vcombine.high %v3375_v58, %v3391_v1  ;;  %v6486_v44 = vmul.f32 %v3132_v36, %v6478_v29  ;;  %v6910_v58 = vmov 14   ;;  %v6976_v1 = vmov 8  }
 0x669   :  { %1955 = vperm.xlu1 %5467, %v6383_v6   ;;  %2087 = vperm.xlu0 %5489, %v6383_v6   ;;  %v6977_v36 = vmov 0.0  }
 0x66a   :  { %4220 = vmatpush1.bf16.msra.mxu1 %v5195_v43  ;;  %4261 = vmatpush1.bf16.msra.mxu0 %v5197_v13  ;;  %v3342_v43 = vld [vmem:[#allocation9 + $0x70] sm:$0xff]  ;;  %v3359_v13 = vld [vmem:[#allocation9 + $0xf8] sm:$0xff] }
 0x66b   :  { %4221 = vmatprep.subr.bf16.mxu1 %v5164_v42  ;;  %4262 = vmatprep.subr.bf16.mxu0 %v5166_v28  ;;  %v5168_v42 = vcombine.high %v3342_v43, %v3358_v11  ;;  %v5167_v31 = vcombine.low %v3342_v43, %v3358_v11  ;;  %v6914_v28 = vmov 12   ;;  %v6908_v43 = vmov 20  }
 0x66c   :  { %4239 = vmatprep.mubr.bf16.mxu1 %v6973_v35  ;;  %4280 = vmatprep.mubr.bf16.mxu0 %v6973_v35  ;;  %v6905_v11 = vmov 26  }
 0x66d   :  { %5469 = vset.pattern.permute.xlu1 %v6911_v18  ;;  %5492 = vset.pattern.permute.xlu0 %v6974_v37 }
 0x66e   :  { %4222 = vmatpush1.bf16.msra.mxu1 %v5163_v48  ;;  %4263 = vmatpush1.bf16.msra.mxu0 %v5165_v12  ;;  %v5170_v48 = vcombine.high %v3343_v50, %v3359_v13  ;;  %v5169_v12 = vcombine.low %v3343_v50, %v3359_v13  ;;  %v5829_v50 = vmov 24   ;;  %v6906_v13 = vmov 29  }
 0x66f   :  { %1967 = vperm.xlu1 %5469, %v6383_v6   ;;  %3148 = vperm.xlu0 %5492, %v6486_v44  }
 0x670   :  { %4301 = vmatprep.subr.bf16.mxu1 %v5200_v61  ;;  %4342 = vmatprep.subr.bf16.mxu0 %v5202_v17  ;;  %v6913_v61 = vmov 15   ;;  %v6912_v17 = vmov 18  }
 0x671   :  { %5215 = vmatmul.mubr.msk.bf16.vlgmr.msra.gmra.mxu1 %vm225_vm1, %v6385_v56  ;;  %5216 = vmatmul.mubr.msk.bf16.vlgmr.msra.gmra.mxu0 %vm225_vm1, %v6385_v56 }
 0x672   :  { %4302 = vmatpush1.bf16.msra.mxu1 %v5199_v57  ;;  %4343 = vmatpush1.bf16.msra.mxu0 %v5201_v49  ;;  %v6915_v57 = vmov 21   ;;  %v6907_v49 = vmov 23  }
 0x673   :  { %5470 = vset.pattern.permute.xlu1 %v6914_v28  ;;  %5495 = vset.pattern.permute.xlu0 %v6975_v47 }
 0x674   :  { %1973 = vperm.xlu1 %5470, %v6383_v6   ;;  %3166 = vperm.xlu0 %5495, %v6486_v44  }
 0x675   :  { %4303 = vmatprep.subr.bf16.mxu1 %v5168_v42  ;;  %4344 = vmatprep.subr.bf16.mxu0 %v5170_v48  ;;  %v4371_v42 = vstv %s4978_s7 }
 0x676   :  { %4304 = vmatpush1.bf16.msra.mxu1 %v5167_v31  ;;  %4345 = vmatpush1.bf16.msra.mxu0 %v5169_v12  ;;  %v6545_v48 = vmul.f32 %v4371_v42, %v6478_v29  ;;  %v5831_v31 = vmov 27   ;;  %v6978_v12 = vmov 3   ;;  %v6979_v29 = vmov 6  }
 0x677   :  { %4321 = vmatprep.mubr.bf16.mxu1 %v6973_v35  ;;  %4362 = vmatprep.mubr.bf16.mxu0 %v6973_v35  ;;  %v5832_v42 = vmov 30  }
 0x678   :  { %5472 = vset.pattern.permute.xlu1 %v6910_v58  ;;  %5498 = vset.pattern.permute.xlu0 %v6976_v1 }
 0x679   :  { %1985 = vperm.xlu1 %5472, %v6383_v6   ;;  %3184 = vperm.xlu0 %5498, %v6486_v44  }
 0x67a   :  { %5217 = vmatmul.mubr.msk.bf16.vlgmr.msra.gmra.mxu1 %vm225_vm1, %v6385_v56  ;;  %5218 = vmatmul.mubr.msk.bf16.vlgmr.msra.gmra.mxu0 %vm225_vm1, %v6385_v56  ;;  %v6909_v56 = vmov 17  }
 0x67b   :  { %5341 = vmatprep.subr.bf16.mxu1 %v6977_v36  ;;  %5357 = vmatprep.mubr.msk.bf16.mxu1 %vm5800_vm0, %v6977_v36 }
 0x67c   :  { %5361 = vmatprep.subr.bf16.mxu0 %v6977_v36  ;;  %5365 = vmatprep.mubr.msk.bf16.mxu0 %vm5800_vm0, %v6977_v36 }
 0x67d   :  { %5473 = vset.pattern.permute.xlu1 %v6913_v61  ;;  %5501 = vset.pattern.permute.xlu0 %v6911_v18  ;;  %v6982_v18 = vmov 4  }
 0x67e   :  { %1991 = vperm.xlu1 %5473, %v6383_v6   ;;  %3202 = vperm.xlu0 %5501, %v6486_v44  }
 0x682   :  { %5475 = vset.pattern.permute.xlu1 %v6909_v56  ;;  %5504 = vset.pattern.permute.xlu0 %v6910_v58 }
 0x683   :  { %2003 = vperm.xlu1 %5475, %v6383_v6   ;;  %3220 = vperm.xlu0 %5504, %v6486_v44  }
 0x687   :  { %5476 = vset.pattern.permute.xlu1 %v6912_v17  ;;  %5507 = vset.pattern.permute.xlu0 %v6909_v56 }
 0x688   :  { %2009 = vperm.xlu1 %5476, %v6383_v6   ;;  %3238 = vperm.xlu0 %5507, %v6486_v44  }
 0x68c   :  { %5478 = vset.pattern.permute.xlu1 %v6908_v43  ;;  %5510 = vset.pattern.permute.xlu0 %v6908_v43 }
 0x68d   :  { %2021 = vperm.xlu1 %5478, %v6383_v6   ;;  %3256 = vperm.xlu0 %5510, %v6486_v44  }
 0x691   :  { %5479 = vset.pattern.permute.xlu1 %v6915_v57  ;;  %5513 = vset.pattern.permute.xlu0 %v6907_v49 }
 0x692   :  { %2027 = vperm.xlu1 %5479, %v6383_v6   ;;  %3274 = vperm.xlu0 %5513, %v6486_v44  }
 0x696   :  { %5481 = vset.pattern.permute.xlu1 %v6907_v49  ;;  %5516 = vset.pattern.permute.xlu0 %v6905_v11  ;;  %v6981_v49 = vmov 1  }
 0x697   :  { %2039 = vperm.xlu1 %5481, %v6383_v6   ;;  %3292 = vperm.xlu0 %5516, %v6486_v44  }
 0x69b   :  { %5482 = vset.pattern.permute.xlu1 %v5829_v50  ;;  %5519 = vset.pattern.permute.xlu0 %v6906_v13 }
 0x69c   :  { %2045 = vperm.xlu1 %5482, %v6383_v6   ;;  %3310 = vperm.xlu0 %5519, %v6486_v44  }
 0x6a0   :  { %5484 = vset.pattern.permute.xlu1 %v6905_v11  ;;  %5522 = vset.pattern.permute.xlu0 %v6973_v35  ;;  %v6980_v11 = vmov 9  }
 0x6a1   :  { %2057 = vperm.xlu1 %5484, %v6383_v6   ;;  %4375 = vperm.xlu0 %5522, %v6545_v48  }
 0x6a5   :  { %5485 = vset.pattern.permute.xlu1 %v5831_v31  ;;  %5525 = vset.pattern.permute.xlu0 %v6978_v12 }
 0x6a6   :  { %2063 = vperm.xlu1 %5485, %v6383_v6   ;;  %4393 = vperm.xlu0 %5525, %v6545_v48  }
 0x6aa   :  { %5487 = vset.pattern.permute.xlu1 %v6906_v13  ;;  %5528 = vset.pattern.permute.xlu0 %v6979_v29 }
 0x6ab   :  { %2075 = vperm.xlu1 %5487, %v6383_v6   ;;  %4411 = vperm.xlu0 %5528, %v6545_v48  }
 0x6af   :  { %5488 = vset.pattern.permute.xlu1 %v5832_v42  ;;  %5531 = vset.pattern.permute.xlu0 %v6980_v11 }
 0x6b0   :  { %2081 = vperm.xlu1 %5488, %v6383_v6   ;;  %4429 = vperm.xlu0 %5531, %v6545_v48  }
 0x6b4   :  { %5490 = vset.pattern.permute.xlu1 %v6973_v35  ;;  %5534 = vset.pattern.permute.xlu0 %v6914_v28 }
 0x6b5   :  { %4447 = vperm.xlu0 %5534, %v6545_v48   ;;  %3136 = vperm.xlu1 %5490, %v6486_v44  }
 0x6b6   :  { %v1902_v13 = vpop.permute.xlu1 %1901  ;;  %v1908_v35 = vpop.permute.xlu0 %1907 }
 0x6b7   :  { %v1904_v56 = vmul.f32 %v1902_v13, %v6270_v51  ;;  %v1910_v58 = vmul.f32 %v1908_v35, %v6274_v53 }
 0x6b9   :  { %5537 = vset.pattern.permute.xlu0 %v6913_v61  ;;  %5491 = vset.pattern.permute.xlu1 %v6981_v49  ;;  %v1911_v61 = vadd.f32 %v1910_v58, %v1904_v56  ;;  %v6986_v56 = vmov 12  }
 0x6ba   :  { %4465 = vperm.xlu0 %5537, %v6545_v48   ;;  %3142 = vperm.xlu1 %5491, %v6486_v44  }
 0x6bc   :  { %v1914_v6 = vpop.permute.xlu1 %1913 }
 0x6be   :  { %5540 = vset.pattern.permute.xlu0 %v6912_v17  ;;  %5493 = vset.pattern.permute.xlu1 %v6978_v12  ;;  %v1916_v12 = vmul.f32 %v1914_v6, %v6272_v52  ;;  %v6983_v52 = vmov 7  }
 0x6bf   :  { %4483 = vperm.xlu0 %5540, %v6545_v48   ;;  %3154 = vperm.xlu1 %5493, %v6486_v44  }
 0x6c0   :  { %v1917_v51 = vadd.f32 %v1916_v12, %v1911_v61  ;;  %v6985_v61 = vmov 31  }
 0x6c1   :  { %v1920_v43 = vpop.permute.xlu1 %1919 }
 0x6c2   :  { %v1922_v28 = vmul.f32 %v1920_v43, %v6276_v54 }
 0x6c3   :  { %5543 = vset.pattern.permute.xlu0 %v6915_v57  ;;  %5494 = vset.pattern.permute.xlu1 %v6982_v18 }
 0x6c4   :  { %4501 = vperm.xlu0 %5543, %v6545_v48   ;;  %3160 = vperm.xlu1 %5494, %v6486_v44   ;;  %v1923_v13 = vadd.f32 %v1922_v28, %v1917_v51  ;;  %v6984_v28 = vmov 10  }
 0x6c6   :  { %v1926_v17 = vpop.permute.xlu1 %1925 }
 0x6c7   :  { %v1928_v53 = vmul.f32 %v1926_v17, %v6278_v60 }
 0x6c8   :  { %5546 = vset.pattern.permute.xlu0 %v5829_v50  ;;  %5496 = vset.pattern.permute.xlu1 %v6979_v29 }
 0x6c9   :  { %4519 = vperm.xlu0 %5546, %v6545_v48   ;;  %3172 = vperm.xlu1 %5496, %v6486_v44   ;;  %v1929_v57 = vadd.f32 %v1928_v53, %v1923_v13 }
 0x6cc   :  { %v1932_v35 = vpop.permute.xlu1 %1931 }
 0x6cd   :  { %5549 = vset.pattern.permute.xlu0 %v5831_v31  ;;  %5497 = vset.pattern.permute.xlu1 %v6983_v52  ;;  %v1934_v54 = vmul.f32 %v1932_v35, %v6282_v63  ;;  %v6988_v35 = vmov 15  }
 0x6ce   :  { %4537 = vperm.xlu0 %5549, %v6545_v48   ;;  %3178 = vperm.xlu1 %5497, %v6486_v44  }
 0x6cf   :  { %v1935_v58 = vadd.f32 %v1934_v54, %v1929_v57  ;;  %v1962_v54 = vpop.permute.xlu0 %1961 }
 0x6d2   :  { %5552 = vset.pattern.permute.xlu0 %v5832_v42  ;;  %5499 = vset.pattern.permute.xlu1 %v6980_v11  ;;  %v6987_v11 = vmov 13  }
 0x6d3   :  { %4555 = vperm.xlu0 %5552, %v6545_v48   ;;  %3190 = vperm.xlu1 %5499, %v6486_v44   ;;  %v1938_v60 = vpop.permute.xlu1 %1937 }
 0x6d4   :  { %v1940_v17 = vmul.f32 %v1938_v60, %v6280_v62 }
 0x6d6   :  { %v1941_v29 = vadd.f32 %v1940_v17, %v1935_v58 }
 0x6d7   :  { %5500 = vset.pattern.permute.xlu1 %v6984_v28  ;;  %5554 = vset.pattern.permute.xlu0 %v6985_v61 }
 0x6d8   :  { %3196 = vperm.xlu1 %5500, %v6486_v44   ;;  %v1944_v63 = vpop.permute.xlu1 %1943 }
 0x6d9   :  { %v1946_v57 = vmul.f32 %v1944_v63, %v6284_v0  ;;  %v1964_v0 = vmul.f32 %v1962_v54, %v6288_v8  ;;  %v6989_v63 = vmov 16  }
 0x6db   :  { %v1947_v12 = vadd.f32 %v1946_v57, %v1941_v29  ;;  %v1980_v57 = vpop.permute.xlu0 %1979 }
 0x6dc   :  { %5502 = vset.pattern.permute.xlu1 %v6986_v56  ;;  %v1982_v8 = vmul.f32 %v1980_v57, %v6298_v19 }
 0x6dd   :  { %3208 = vperm.xlu1 %5502, %v6486_v44   ;;  %v1950_v43 = vpop.permute.xlu1 %1949 }
 0x6de   :  { %v1952_v6 = vmul.f32 %v1950_v43, %v6286_v7  ;;  %v6990_v43 = vmov 18  }
 0x6e0   :  { %v1953_v13 = vadd.f32 %v1952_v6, %v1947_v12  ;;  %v6991_v12 = vmov 19  }
 0x6e1   :  { %5503 = vset.pattern.permute.xlu1 %v6987_v11 }
 0x6e2   :  { %3214 = vperm.xlu1 %5503, %v6486_v44  }
 0x6e4   :  { %v1956_v51 = vpop.permute.xlu1 %1955 }
 0x6e5   :  { %v1958_v53 = vmul.f32 %v1956_v51, %v6290_v9 }
 0x6e6   :  { %5505 = vset.pattern.permute.xlu1 %v6988_v35  ;;  %v6992_v35 = vmov 21  }
 0x6e7   :  { %3226 = vperm.xlu1 %5505, %v6486_v44   ;;  %v1959_v62 = vadd.f32 %v1958_v53, %v1953_v13 }
 0x6e9   :  { %v1965_v58 = vadd.f32 %v1964_v0, %v1959_v62  ;;  %v1998_v0 = vpop.permute.xlu0 %1997 }
 0x6ea   :  { %v1968_v60 = vpop.permute.xlu1 %1967 }
 0x6eb   :  { %5506 = vset.pattern.permute.xlu1 %v6989_v63  ;;  %v1970_v7 = vmul.f32 %v1968_v60, %v6292_v10 }
 0x6ec   :  { %3232 = vperm.xlu1 %5506, %v6486_v44  }
 0x6ed   :  { %v1971_v17 = vadd.f32 %v1970_v7, %v1965_v58 }
 0x6ef   :  { %v1974_v56 = vpop.permute.xlu1 %1973 }
 0x6f0   :  { %v1976_v9 = vmul.f32 %v1974_v56, %v6294_v16  ;;  %5508 = vset.pattern.permute.xlu1 %v6990_v43  ;;  %v6993_v56 = vmov 22  }
 0x6f1   :  { %3244 = vperm.xlu1 %5508, %v6486_v44  }
 0x6f2   :  { %v1977_v29 = vadd.f32 %v1976_v9, %v1971_v17 }
 0x6f4   :  { %v1986_v6 = vpop.permute.xlu1 %1985  ;;  %v1983_v51 = vadd.f32 %v1982_v8, %v1977_v29 }
 0x6f5   :  { %5509 = vset.pattern.permute.xlu1 %v6991_v12  ;;  %v1988_v10 = vmul.f32 %v1986_v6, %v6296_v14  ;;  %v2000_v14 = vmul.f32 %v1998_v0, %v6302_v24 }
 0x6f6   :  { %3250 = vperm.xlu1 %5509, %v6486_v44  }
 0x6f7   :  { %v1989_v13 = vadd.f32 %v1988_v10, %v1983_v51 }
 0x6f9   :  { %v1992_v53 = vpop.permute.xlu1 %1991 }
 0x6fa   :  { %v1994_v16 = vmul.f32 %v1992_v53, %v6300_v20  ;;  %5511 = vset.pattern.permute.xlu1 %v6992_v35  ;;  %v6623_v54 = vpop.f32.mrf.mxu1  ;;  %v6625_v62 = vpop.f32.mrf.mxu0 }
 0x6fb   :  { %3262 = vperm.xlu1 %5511, %v6486_v44   ;;  %v2016_v53 = vpop.permute.xlu0 %2015 }
 0x6fc   :  { %v1995_v19 = vadd.f32 %v1994_v16, %v1989_v13  ;;  %v6628_v60 = vpop.f32.mrf.mxu1  ;;  %v6630_v58 = vpop.f32.mrf.mxu0  ;;  %v2018_v35 = vmul.f32 %v2016_v53, %v6308_v27 }
 0x6fe   :  { %v2004_v7 = vpop.permute.xlu1 %2003  ;;  %v3753_v20 = vpop.f32.mrf.mxu1  ;;  %v2001_v9 = vadd.f32 %v2000_v14, %v1995_v19  ;;  %v6994_v19 = vmov 25  }
 0x6ff   :  { %5512 = vset.pattern.permute.xlu1 %v6993_v56  ;;  %v3794_v17 = vpop.f32.mrf.mxu0  ;;  %v2006_v43 = vmul.f32 %v2004_v7, %v6306_v26 }
 0x700   :  { %3268 = vperm.xlu1 %5512, %v6486_v44   ;;  %v3754_v57 = vpop.f32.mrf.mxu1 }
 0x701   :  { %v3795_v29 = vpop.f32.mrf.mxu0  ;;  %v2007_v6 = vadd.f32 %v2006_v43, %v2001_v9 }
 0x703   :  { %v2010_v8 = vpop.permute.xlu1 %2009  ;;  %v6638_v10 = vpop.f32.mrf.mxu1 }
 0x704   :  { %v2012_v51 = vmul.f32 %v2010_v8, %v6304_v25  ;;  %5514 = vset.pattern.permute.xlu1 %v5829_v50  ;;  %v6640_v24 = vpop.f32.mrf.mxu0  ;;  %v2034_v8 = vpop.permute.xlu0 %2033 }
 0x705   :  { %3280 = vperm.xlu1 %5514, %v6486_v44   ;;  %v6643_v16 = vpop.f32.mrf.mxu1  ;;  %v2036_v53 = vmul.f32 %v2034_v8, %v6312_v32 }
 0x706   :  { %v2013_v13 = vadd.f32 %v2012_v51, %v2007_v6  ;;  %v6645_v26 = vpop.f32.mrf.mxu0 }
 0x707   :  { %v3835_v25 = vpop.f32.mrf.mxu1 }
 0x708   :  { %v2022_v0 = vpop.permute.xlu1 %2021  ;;  %v3876_v14 = vpop.f32.mrf.mxu0  ;;  %v2019_v50 = vadd.f32 %v2018_v35, %v2013_v13  ;;  %v6995_v35 = vmov 28  }
 0x709   :  { %5515 = vset.pattern.permute.xlu1 %v6994_v19  ;;  %v2024_v7 = vmul.f32 %v2022_v0, %v6310_v5  ;;  %v3836_v20 = vpop.f32.mrf.mxu1 }
 0x70a   :  { %3286 = vperm.xlu1 %5515, %v6486_v44   ;;  %v3877_v17 = vpop.f32.mrf.mxu0 }
 0x70b   :  { %v2025_v43 = vadd.f32 %v2024_v7, %v2019_v50 }
 0x70c   :  { %v6653_v29 = vpop.f32.mrf.mxu1  ;;  %v6655_v27 = vpop.f32.mrf.mxu0 }
 0x70d   :  { %v2028_v9 = vpop.permute.xlu1 %2027 }
 0x70e   :  { %v2030_v57 = vmul.f32 %v2028_v9, %v6314_v33  ;;  %5517 = vset.pattern.permute.xlu1 %v5831_v31  ;;  %v6658_v51 = vpop.f32.mrf.mxu1  ;;  %v6660_v5 = vpop.f32.mrf.mxu0 }
 0x70f   :  { %3298 = vperm.xlu1 %5517, %v6486_v44  }
 0x710   :  { %v2031_v6 = vadd.f32 %v2030_v57, %v2025_v43  ;;  %v3917_v33 = vpop.f32.mrf.mxu1  ;;  %v3958_v0 = vpop.f32.mrf.mxu0 }
 0x711   :  { %v2052_v43 = vpop.permute.xlu0 %2051 }
 0x712   :  { %v2040_v13 = vpop.permute.xlu1 %2039  ;;  %v2037_v31 = vadd.f32 %v2036_v53, %v2031_v6  ;;  %v3918_v14 = vpop.f32.mrf.mxu1  ;;  %v2054_v6 = vmul.f32 %v2052_v43, %v6322_v41 }
 0x713   :  { %5518 = vset.pattern.permute.xlu1 %v6995_v35  ;;  %v2042_v25 = vmul.f32 %v2040_v13, %v6316_v34  ;;  %v3959_v50 = vpop.f32.mrf.mxu0 }
 0x714   :  { %3304 = vperm.xlu1 %5518, %v6486_v44  }
 0x715   :  { %v2043_v20 = vadd.f32 %v2042_v25, %v2037_v31  ;;  %v6668_v9 = vpop.f32.mrf.mxu1  ;;  %v6670_v32 = vpop.f32.mrf.mxu0 }
 0x717   :  { %v2046_v7 = vpop.permute.xlu1 %2045  ;;  %v6673_v8 = vpop.f32.mrf.mxu1 }
 0x718   :  { %v2048_v17 = vmul.f32 %v2046_v7, %v6318_v39  ;;  %5520 = vset.pattern.permute.xlu1 %v5832_v42  ;;  %v6675_v34 = vpop.f32.mrf.mxu0 }
 0x719   :  { %3316 = vperm.xlu1 %5520, %v6486_v44   ;;  %v3999_v39 = vpop.f32.mrf.mxu1 }
 0x71a   :  { %v2049_v57 = vadd.f32 %v2048_v17, %v2043_v20  ;;  %v4040_v13 = vpop.f32.mrf.mxu0  ;;  %v2070_v20 = vpop.permute.xlu0 %2069 }
 0x71b   :  { %v4000_v0 = vpop.f32.mrf.mxu1 }
 0x71c   :  { %v2058_v53 = vpop.permute.xlu1 %2057  ;;  %v2055_v42 = vadd.f32 %v2054_v6, %v2049_v57  ;;  %v4041_v31 = vpop.f32.mrf.mxu0 }
 0x71d   :  { %5521 = vset.pattern.permute.xlu1 %v6985_v61  ;;  %v2060_v33 = vmul.f32 %v2058_v53, %v6320_v40 }
 0x71e   :  { %3322 = vperm.xlu1 %5521, %v6486_v44   ;;  %v6682_v7 = vpop.f32.mrf.mxu1  ;;  %v6685_v41 = vpop.f32.mrf.mxu0  ;;  %v2072_v44 = vmul.f32 %v2070_v20, %v6326_v59 }
 0x71f   :  { %v2061_v14 = vadd.f32 %v2060_v33, %v2055_v42 }
 0x720   :  { %v6688_v43 = vpop.f32.mrf.mxu1  ;;  %v6690_v40 = vpop.f32.mrf.mxu0 }
 0x721   :  { %v2064_v25 = vpop.permute.xlu1 %2063 }
 0x722   :  { %v2066_v50 = vmul.f32 %v2064_v25, %v6324_v45  ;;  %5523 = vset.pattern.permute.xlu1 %v6981_v49  ;;  %v4081_v57 = vpop.f32.mrf.mxu1  ;;  %v4122_v53 = vpop.f32.mrf.mxu0 }
 0x723   :  { %4381 = vperm.xlu1 %5523, %v6545_v48  }
 0x724   :  { %v2067_v17 = vadd.f32 %v2066_v50, %v2061_v14  ;;  %v4082_v39 = vpop.f32.mrf.mxu1  ;;  %v4123_v13 = vpop.f32.mrf.mxu0 }
 0x726   :  { %v2076_v6 = vpop.permute.xlu1 %2075  ;;  %v2073_v45 = vadd.f32 %v2072_v44, %v2067_v17 }
 0x727   :  { %5524 = vset.pattern.permute.xlu1 %v6974_v37  ;;  %v2078_v49 = vmul.f32 %v2076_v6, %v6330_v3  ;;  %v6696_v42 = vpop.f32.mrf.mxu1  ;;  %v6698_v33 = vpop.f32.mrf.mxu0 }
 0x728   :  { %4387 = vperm.xlu1 %5524, %v6545_v48   ;;  %v2088_v37 = vpop.permute.xlu0 %2087 }
 0x729   :  { %v2079_v31 = vadd.f32 %v2078_v49, %v2073_v45  ;;  %v6701_v25 = vpop.f32.mrf.mxu1  ;;  %v6704_v14 = vpop.f32.mrf.mxu0  ;;  %v2090_v17 = vmul.f32 %v2088_v37, %v6332_v4 }
 0x72b   :  { %v2082_v0 = vpop.permute.xlu1 %2081  ;;  %v4163_v50 = vpop.f32.mrf.mxu1 }
 0x72c   :  { %v2084_v59 = vmul.f32 %v2082_v0, %v6328_v2  ;;  %5526 = vset.pattern.permute.xlu1 %v6982_v18  ;;  %v4204_v20 = vpop.f32.mrf.mxu0 }
 0x72d   :  { %4399 = vperm.xlu1 %5526, %v6545_v48   ;;  %v4164_v44 = vpop.f32.mrf.mxu1 }
 0x72e   :  { %v2085_v3 = vadd.f32 %v2084_v59, %v2079_v31  ;;  %v4205_v6 = vpop.f32.mrf.mxu0 }
 0x730   :  { %v3137_v57 = vpop.permute.xlu1 %3136  ;;  %v2091_v2 = vadd.f32 %v2090_v17, %v2085_v3 }
 0x731   :  { %5527 = vset.pattern.permute.xlu1 %v6975_v47  ;;  %v3139_v53 = vmul.f32 %v3137_v57, %v6334_v15  ;;  %v6710_v45 = vpop.f32.mrf.mxu1  ;;  %v6713_v18 = vpop.f32.mrf.mxu0 }
 0x732   :  { %4405 = vperm.xlu1 %5527, %v6545_v48   ;;  %v3149_v47 = vpop.permute.xlu0 %3148 }
 0x733   :  { %v6715_v49 = vpop.f32.mrf.mxu1  ;;  %v6717_v39 = vpop.f32.mrf.mxu0  ;;  %v3140_v4 = vadd.f32 %v3139_v53, %v2091_v2  ;;  %v3151_v50 = vmul.f32 %v3149_v47, %v6336_v21 }
 0x735   :  { %v3143_v13 = vpop.permute.xlu1 %3142  ;;  %v4245_v31 = vpop.f32.mrf.mxu1 }
 0x736   :  { %v3145_v0 = vmul.f32 %v3143_v13, %v6338_v22  ;;  %5529 = vset.pattern.permute.xlu1 %v6983_v52  ;;  %v4286_v59 = vpop.f32.mrf.mxu0  ;;  %v3167_v47 = vpop.permute.xlu0 %3166 }
 0x737   :  { %4417 = vperm.xlu1 %5529, %v6545_v48   ;;  %v4246_v37 = vpop.f32.mrf.mxu1  ;;  %v6997_v59 = vld [vmem:[#allocation44_spill] sm:$0xff] }
 0x738   :  { %v3146_v15 = vadd.f32 %v3145_v0, %v3140_v4  ;;  %v4287_v3 = vpop.f32.mrf.mxu0  ;;  %v6996_v4 = vld [vmem:[#allocation42_spill] sm:$0xff] }
 0x739   :  { %v6998_v3 = vmov 11  }
 0x73a   :  { %v6723_v20 = vpop.f32.mrf.mxu1  ;;  %v3155_v17 = vpop.permute.xlu1 %3154  ;;  %v3152_v22 = vadd.f32 %v3151_v50, %v3146_v15  ;;  %v3169_v15 = vmul.f32 %v3167_v47, %v6997_v59  ;;  %v7002_v47 = vmov 14  }
 0x73b   :  { %v6725_v44 = vpop.f32.mrf.mxu0  ;;  %5530 = vset.pattern.permute.xlu1 %v6976_v1  ;;  %v3157_v57 = vmul.f32 %v3155_v17, %v6340_v23  ;;  %v6999_v17 = vld [vmem:[#allocation43_spill] sm:$0xff] }
 0x73c   :  { %v6729_v52 = vpop.f32.mrf.mxu1  ;;  %4423 = vperm.xlu1 %5530, %v6545_v48  }
 0x73d   :  { %v6732_v6 = vpop.f32.mrf.mxu0  ;;  %v3158_v21 = vadd.f32 %v3157_v57, %v3152_v22 }
 0x73e   :  { %v4327_v2 = vpop.f32.mrf.mxu1 }
 0x73f   :  { %v4368_v53 = vpop.f32.mrf.mxu0  ;;  %v3161_v13 = vpop.permute.xlu1 %3160 }
 0x740   :  { %v3163_v0 = vmul.f32 %v3161_v13, %v6996_v4  ;;  %v4328_v31 = vpop.f32.mrf.mxu1  ;;  %5532 = vset.pattern.permute.xlu1 %v6984_v28  ;;  %v7000_v53 = vld [vmem:[#allocation45_spill] sm:$0xff]  ;;  %v3185_v28 = vpop.permute.xlu0 %3184  ;;  %v7001_v4 = vld [vmem:[#allocation46_spill] sm:$0xff] }
 0x741   :  { %v4369_v1 = vpop.f32.mrf.mxu0  ;;  %4435 = vperm.xlu1 %5532, %v6545_v48  }
 0x742   :  { %v3164_v23 = vadd.f32 %v3163_v0, %v3158_v21  ;;  %v3187_v0 = vmul.f32 %v3185_v28, %v7001_v4  ;;  %v7007_v28 = vld [vmem:[#allocation50_spill] sm:$0xff] }
 0x744   :  { %v3173_v37 = vpop.permute.xlu1 %3172  ;;  %v3170_v50 = vadd.f32 %v3169_v15, %v3164_v23  ;;  %v7003_v23 = vld [vmem:[#allocation48_spill] sm:$0xff] }
 0x745   :  { %5533 = vset.pattern.permute.xlu1 %v6998_v3  ;;  %v3175_v2 = vmul.f32 %v3173_v37, %v6999_v17  ;;  %v7004_v3 = vld [vmem:[#allocation47_spill] sm:$0xff] }
 0x746   :  { %4441 = vperm.xlu1 %5533, %v6545_v48  }
 0x747   :  { %v3176_v57 = vadd.f32 %v3175_v2, %v3170_v50  ;;  %v7005_v2 = vld [vmem:[#allocation49_spill] sm:$0xff] }
 0x749   :  { %v3179_v22 = vpop.permute.xlu1 %3178 }
 0x74a   :  { %v3181_v13 = vmul.f32 %v3179_v22, %v7000_v53  ;;  %5535 = vset.pattern.permute.xlu1 %v6987_v11  ;;  %v3203_v11 = vpop.permute.xlu0 %3202  ;;  %v7006_v53 = vmov 17  }
 0x74b   :  { %4453 = vperm.xlu1 %5535, %v6545_v48   ;;  %v3205_v22 = vmul.f32 %v3203_v11, %v7005_v2 }
 0x74c   :  { %v3182_v21 = vadd.f32 %v3181_v13, %v3176_v57 }
 0x74e   :  { %v3191_v31 = vpop.permute.xlu1 %3190  ;;  %v3188_v1 = vadd.f32 %v3187_v0, %v3182_v21 }
 0x74f   :  { %5536 = vset.pattern.permute.xlu1 %v7002_v47  ;;  %v3193_v59 = vmul.f32 %v3191_v31, %v7003_v23  ;;  %v7008_v31 = vld [vmem:[#allocation52_spill] sm:$0xff]  ;;  %v7009_v23 = vld [vmem:[#allocation51_spill] sm:$0xff] }
 0x750   :  { %4459 = vperm.xlu1 %5536, %v6545_v48  }
 0x751   :  { %v3194_v37 = vadd.f32 %v3193_v59, %v3188_v1 }
 0x753   :  { %v3197_v15 = vpop.permute.xlu1 %3196 }
 0x754   :  { %v3199_v50 = vmul.f32 %v3197_v15, %v7004_v3  ;;  %5538 = vset.pattern.permute.xlu1 %v6989_v63  ;;  %v3221_v63 = vpop.permute.xlu0 %3220 }
 0x755   :  { %4471 = vperm.xlu1 %5538, %v6545_v48   ;;  %v3223_v59 = vmul.f32 %v3221_v63, %v7009_v23 }
 0x756   :  { %v3200_v17 = vadd.f32 %v3199_v50, %v3194_v37  ;;  %v7011_v37 = vmov 20   ;;  %v7012_v50 = vld [vmem:[#allocation53_spill] sm:$0xff] }
 0x758   :  { %v3209_v57 = vpop.permute.xlu1 %3208  ;;  %v3206_v13 = vadd.f32 %v3205_v22, %v3200_v17  ;;  %v7013_v22 = vld [vmem:[#allocation54_spill] sm:$0xff] }
 0x759   :  { %5539 = vset.pattern.permute.xlu1 %v7006_v53  ;;  %v3211_v21 = vmul.f32 %v3209_v57, %v7007_v28  ;;  %v3239_v57 = vpop.permute.xlu0 %3238 }
 0x75a   :  { %4477 = vperm.xlu1 %5539, %v6545_v48  }
 0x75b   :  { %v3212_v0 = vadd.f32 %v3211_v21, %v3206_v13  ;;  %v7014_v13 = vld [vmem:[#allocation56_spill] sm:$0xff] }
 0x75c   :  { %v3241_v28 = vmul.f32 %v3239_v57, %v7014_v13  ;;  %v7020_v57 = vld [vmem:[#allocation60_spill] sm:$0xff] }
 0x75d   :  { %v3215_v4 = vpop.permute.xlu1 %3214 }
 0x75e   :  { %v3217_v47 = vmul.f32 %v3215_v4, %v7008_v31  ;;  %5541 = vset.pattern.permute.xlu1 %v6991_v12  ;;  %v5566_v4 = vld [vmem:[%s7010_s10 + $0x38] sm:$0xff]  }
 0x75f   :  { %4489 = vperm.xlu1 %5541, %v6545_v48   ;;  %5342 = vmatpush3.bf16.msra.mxu1 %v5566_v4 }
 0x760   :  { %v3218_v1 = vadd.f32 %v3217_v47, %v3212_v0  ;;  %v7015_v0 = vmov 23   ;;  %v7016_v47 = vld [vmem:[#allocation55_spill] sm:$0xff]  ;;  %5343 = vmatprep.subr.bf16.mxu1 %v6977_v36 }
 0x762   :  { %v3227_v15 = vpop.permute.xlu1 %3226  ;;  %v3224_v3 = vadd.f32 %v3223_v59, %v3218_v1  ;;  %v5567_v1 = vld [vmem:[%s7010_s10 + $0x30] sm:$0xff]   ;;  %v7017_v59 = vld [vmem:[#allocation57_spill] sm:$0xff] }
 0x763   :  { %5542 = vset.pattern.permute.xlu1 %v7011_v37  ;;  %v3229_v11 = vmul.f32 %v3227_v15, %v7012_v50  ;;  %v3257_v37 = vpop.permute.xlu0 %3256  ;;  %5344 = vmatpush3.bf16.msra.mxu1 %v5567_v1  ;;  %v5568_v50 = vld [vmem:[%s7010_s10 + $0x28] sm:$0xff]  }
 0x764   :  { %4495 = vperm.xlu1 %5542, %v6545_v48   ;;  %5345 = vmatprep.subr.bf16.mxu1 %v6977_v36 }
 0x765   :  { %v3230_v2 = vadd.f32 %v3229_v11, %v3224_v3  ;;  %v7018_v11 = vld [vmem:[#allocation58_spill] sm:$0xff] }
 0x767   :  { %v3233_v17 = vpop.permute.xlu1 %3232  ;;  %5346 = vmatpush3.bf16.msra.mxu1 %v5568_v50  ;;  %v5572_v50 = vld [vmem:[%s7010_s10 + $0x8] sm:$0xff]  }
 0x768   :  { %v3235_v12 = vmul.f32 %v3233_v17, %v7013_v22  ;;  %5544 = vset.pattern.permute.xlu1 %v6993_v56  ;;  %v3259_v17 = vmul.f32 %v3257_v37, %v7018_v11  ;;  %v7019_v22 = vmov 26   ;;  %5347 = vmatprep.subr.bf16.mxu1 %v6977_v36 }
 0x769   :  { %4507 = vperm.xlu1 %5544, %v6545_v48  }
 0x76a   :  { %v3236_v53 = vadd.f32 %v3235_v12, %v3230_v2 }
 0x76c   :  { %v3245_v21 = vpop.permute.xlu1 %3244  ;;  %v3242_v31 = vadd.f32 %v3241_v28, %v3236_v53 }
 0x76d   :  { %5545 = vset.pattern.permute.xlu1 %v7015_v0  ;;  %v3247_v63 = vmul.f32 %v3245_v21, %v7016_v47  ;;  %v7021_v21 = vld [vmem:[#allocation59_spill] sm:$0xff]  ;;  %v3275_v0 = vpop.permute.xlu0 %3274 }
 0x76e   :  { %4513 = vperm.xlu1 %5545, %v6545_v48  }
 0x76f   :  { %v3248_v23 = vadd.f32 %v3247_v63, %v3242_v31  ;;  %v5570_v31 = vld [vmem:[%s7010_s10 + $0x18] sm:$0xff]  }
 0x770   :  { %v7022_v63 = vld [vmem:[#allocation61_spill] sm:$0xff] }
 0x771   :  { %v3251_v56 = vpop.permute.xlu1 %3250 }
 0x772   :  { %v3253_v15 = vmul.f32 %v3251_v56, %v7017_v59  ;;  %5547 = vset.pattern.permute.xlu1 %v6994_v19  ;;  %v5569_v19 = vld [vmem:[%s7010_s10 + $0x20] sm:$0xff]   ;;  %v3277_v56 = vmul.f32 %v3275_v0, %v7022_v63  ;;  %v7023_v59 = vmov 29   ;;  %v5574_v0 = vld [vmem:[%s7025_s11 + $0x8] sm:$0xff]  }
 0x773   :  { %4525 = vperm.xlu1 %5547, %v6545_v48   ;;  %5348 = vmatpush3.bf16.msra.mxu1 %v5569_v19 }
 0x774   :  { %v3254_v3 = vadd.f32 %v3253_v15, %v3248_v23  ;;  %5349 = vmatprep.subr.bf16.mxu1 %v6977_v36  ;;  %v5571_v23 = vld [vmem:[%s7010_s10 + $0x10] sm:$0xff]   ;;  %5362 = vmatpush3.bf16.msra.mxu0 %v5574_v0 }
 0x775   :  { %5363 = vmatprep.subr.bf16.mxu0 %v6977_v36 }
 0x776   :  { %v3263_v2 = vpop.permute.xlu1 %3262  ;;  %v3260_v12 = vadd.f32 %v3259_v17, %v3254_v3  ;;  %v7026_v17 = vld [vmem:[#allocation64_spill] sm:$0xff] }
 0x777   :  { %5548 = vset.pattern.permute.xlu1 %v7019_v22  ;;  %v3265_v53 = vmul.f32 %v3263_v2, %v7020_v57  ;;  %5350 = vmatpush3.bf16.msra.mxu1 %v5570_v31  ;;  %v3293_v22 = vpop.permute.xlu0 %3292  ;;  %v5573_v57 = vld [vmem:[%s7010_s10] sm:$0xff]  }
 0x778   :  { %4531 = vperm.xlu1 %5548, %v6545_v48   ;;  %5351 = vmatprep.subr.bf16.mxu1 %v6977_v36 }
 0x779   :  { %v3266_v28 = vadd.f32 %v3265_v53, %v3260_v12  ;;  %v7027_v53 = vld [vmem:[#allocation63_spill] sm:$0xff] }
 0x77a   :  { %v3295_v19 = vmul.f32 %v3293_v22, %v7027_v53 }
 0x77b   :  { %v3269_v13 = vpop.permute.xlu1 %3268  ;;  %5352 = vmatpush3.bf16.msra.mxu1 %v5571_v23 }
 0x77c   :  { %v3271_v4 = vmul.f32 %v3269_v13, %v7021_v21  ;;  %5550 = vset.pattern.permute.xlu1 %v6995_v35  ;;  %v7024_v35 = vld [vmem:[#allocation62_spill] sm:$0xff]  ;;  %5353 = vmatprep.subr.bf16.mxu1 %v6977_v36  ;;  %v7028_v21 = vld [vmem:[#allocation65_spill] sm:$0xff] }
 0x77d   :  { %4543 = vperm.xlu1 %5550, %v6545_v48  }
 0x77e   :  { %v3272_v47 = vadd.f32 %v3271_v4, %v3266_v28 }
 0x77f   :  { %5354 = vmatpush3.bf16.msra.mxu1 %v5572_v50 }
 0x780   :  { %v3281_v1 = vpop.permute.xlu1 %3280  ;;  %v3278_v15 = vadd.f32 %v3277_v56, %v3272_v47  ;;  %5355 = vmatprep.subr.bf16.mxu1 %v6977_v36 }
 0x781   :  { %5551 = vset.pattern.permute.xlu1 %v7023_v59  ;;  %v3283_v37 = vmul.f32 %v3281_v1, %v7024_v35 }
 0x782   :  { %4549 = vperm.xlu1 %5551, %v6545_v48  }
 0x783   :  { %v3284_v11 = vadd.f32 %v3283_v37, %v3278_v15  ;;  %5356 = vmatpush3.bf16.msra.mxu1 %v5573_v57 }
 0x785   :  { %v3287_v3 = vpop.permute.xlu1 %3286 }
 0x786   :  { %v3289_v2 = vmul.f32 %v3287_v3, %v7026_v17  ;;  %5553 = vset.pattern.permute.xlu1 %v6985_v61 }
 0x787   :  { %4561 = vperm.xlu1 %5553, %v6545_v48   ;;  %v3311_v48 = vpop.permute.xlu0 %3310 }
 0x788   :  { %v3290_v12 = vadd.f32 %v3289_v2, %v3284_v11  ;;  %v3313_v56 = vmul.f32 %v3311_v48, %v6417_v55 }
 0x78a   :  { %v3299_v13 = vpop.permute.xlu1 %3298  ;;  %v3296_v28 = vadd.f32 %v3295_v19, %v3290_v12 }
 0x78b   :  { %v3301_v4 = vmul.f32 %v3299_v13, %v7028_v21  ;;  %v4376_v15 = vpop.permute.xlu0 %4375 }
 0x78c   :  { %v4378_v50 = vmul.f32 %v4376_v15, %v6623_v54 }
 0x78d   :  { %v3302_v47 = vadd.f32 %v3301_v4, %v3296_v28 }
 0x78f   :  { %v3305_v31 = vpop.permute.xlu1 %3304  ;;  %v4394_v22 = vpop.permute.xlu0 %4393 }
 0x790   :  { %v3307_v61 = vmul.f32 %v3305_v31, %v6411_v46  ;;  %v4396_v53 = vmul.f32 %v4394_v22, %v6630_v58 }
 0x792   :  { %v3308_v63 = vadd.f32 %v3307_v61, %v3302_v47 }
 0x794   :  { %v3317_v1 = vpop.permute.xlu1 %3316  ;;  %v3314_v23 = vadd.f32 %v3313_v56, %v3308_v63 }
 0x795   :  { %v3319_v59 = vmul.f32 %v3317_v1, %v6413_v30 }
 0x797   :  { %v3320_v37 = vadd.f32 %v3319_v59, %v3314_v23 }
 0x799   :  { %v3323_v35 = vpop.permute.xlu1 %3322 }
 0x79a   :  { %v3325_v3 = vmul.f32 %v3323_v35, %v6419_v38  ;;  %v4412_v38 = vpop.permute.xlu0 %4411 }
 0x79b   :  { %v4414_v0 = vmul.f32 %v4412_v38, %v6640_v24 }
 0x79c   :  { %v3326_v11 = vadd.f32 %v3325_v3, %v3320_v37 }
 0x79e   :  { %v4382_v17 = vpop.permute.xlu1 %4381  ;;  %v4379_v46 = vadd.f32 %v4378_v50, %v3326_v11 }
 0x79f   :  { %v4384_v2 = vmul.f32 %v4382_v17, %v6628_v60 }
 0x7a1   :  { %v4385_v57 = vadd.f32 %v4384_v2, %v4379_v46 }
 0x7a3   :  { %v4388_v12 = vpop.permute.xlu1 %4387 }
 0x7a4   :  { %v4390_v55 = vmul.f32 %v4388_v12, %v6625_v62  ;;  %v4430_v62 = vpop.permute.xlu0 %4429 }
 0x7a5   :  { %v4432_v56 = vmul.f32 %v4430_v62, %v6658_v51 }
 0x7a6   :  { %v4391_v30 = vadd.f32 %v4390_v55, %v4385_v57 }
 0x7a8   :  { %v4400_v19 = vpop.permute.xlu1 %4399  ;;  %v4397_v13 = vadd.f32 %v4396_v53, %v4391_v30 }
 0x7a9   :  { %v4402_v28 = vmul.f32 %v4400_v19, %v6638_v10 }
 0x7ab   :  { %v4403_v54 = vadd.f32 %v4402_v28, %v4397_v13 }
 0x7ad   :  { %v4406_v21 = vpop.permute.xlu1 %4405 }
 0x7ae   :  { %v4408_v4 = vmul.f32 %v4406_v21, %v6643_v16  ;;  %v4448_v16 = vpop.permute.xlu0 %4447 }
 0x7af   :  { %v4450_v37 = vmul.f32 %v4448_v16, %v6668_v9 }
 0x7b0   :  { %v4409_v60 = vadd.f32 %v4408_v4, %v4403_v54 }
 0x7b2   :  { %v4418_v31 = vpop.permute.xlu1 %4417  ;;  %v4415_v47 = vadd.f32 %v4414_v0, %v4409_v60 }
 0x7b3   :  { %v4420_v61 = vmul.f32 %v4418_v31, %v6645_v26 }
 0x7b5   :  { %v4421_v58 = vadd.f32 %v4420_v61, %v4415_v47 }
 0x7b7   :  { %v4424_v48 = vpop.permute.xlu1 %4423 }
 0x7b8   :  { %v4426_v63 = vmul.f32 %v4424_v48, %v6653_v29  ;;  %v4466_v29 = vpop.permute.xlu0 %4465 }
 0x7b9   :  { %v4468_v2 = vmul.f32 %v4466_v29, %v6675_v34 }
 0x7ba   :  { %v4427_v10 = vadd.f32 %v4426_v63, %v4421_v58 }
 0x7bc   :  { %v4436_v1 = vpop.permute.xlu1 %4435  ;;  %v4433_v23 = vadd.f32 %v4432_v56, %v4427_v10 }
 0x7bd   :  { %v4438_v59 = vmul.f32 %v4436_v1, %v6655_v27 }
 0x7bf   :  { %v4439_v24 = vadd.f32 %v4438_v59, %v4433_v23 }
 0x7c1   :  { %v4442_v15 = vpop.permute.xlu1 %4441 }
 0x7c2   :  { %v4444_v35 = vmul.f32 %v4442_v15, %v6660_v5  ;;  %v4484_v5 = vpop.permute.xlu0 %4483 }
 0x7c3   :  { %v4486_v30 = vmul.f32 %v4484_v5, %v6685_v41 }
 0x7c4   :  { %v4445_v26 = vadd.f32 %v4444_v35, %v4439_v24 }
 0x7c6   :  { %v4454_v3 = vpop.permute.xlu1 %4453  ;;  %v4451_v50 = vadd.f32 %v4450_v37, %v4445_v26  ;;  %v5219_v37 = vld [vmem:[%s7029_s15] ss:$0 sm:$0xff] }
 0x7c7   :  { %v4456_v11 = vmul.f32 %v4454_v3, %v6673_v8 }
 0x7c9   :  { %v4457_v51 = vadd.f32 %v4456_v11, %v4451_v50  ;;  %v5575_v11 = vld [vmem:[%s7025_s11] sm:$0xff]  }
 0x7ca   :  { %5364 = vmatpush3.bf16.msra.mxu0 %v5575_v11 }
 0x7cb   :  { %v4460_v17 = vpop.permute.xlu1 %4459  ;;  %5369 = vmatprep.subr.bf16.mxu0 %v6977_v36 }
 0x7cc   :  { %v4462_v46 = vmul.f32 %v4460_v17, %v6670_v32  ;;  %v4502_v32 = vpop.permute.xlu0 %4501 }
 0x7cd   :  { %v4504_v54 = vmul.f32 %v4502_v32, %v6701_v25 }
 0x7ce   :  { %v4463_v27 = vadd.f32 %v4462_v46, %v4457_v51  ;;  %v5576_v51 = vld [vmem:[%s7031_s16 + $0x8] sm:$0xff]  }
 0x7d0   :  { %v4472_v22 = vpop.permute.xlu1 %4471  ;;  %v4469_v12 = vadd.f32 %v4468_v2, %v4463_v27  ;;  %v5577_v27 = vld [vmem:[%s7031_s16] sm:$0xff]  }
 0x7d1   :  { %v4474_v57 = vmul.f32 %v4472_v22, %v6682_v7  ;;  %v5229_v22 = vld [vmem:[%s7032_s18] ss:$0 sm:$0xff] }
 0x7d3   :  { %v4475_v9 = vadd.f32 %v4474_v57, %v4469_v12 }
 0x7d5   :  { %v4478_v55 = vpop.permute.xlu1 %4477 }
 0x7d6   :  { %v4480_v53 = vmul.f32 %v4478_v55, %v6688_v43  ;;  %v4520_v43 = vpop.permute.xlu0 %4519 }
 0x7d7   :  { %v4522_v61 = vmul.f32 %v4520_v43, %v6710_v45 }
 0x7d8   :  { %v4481_v8 = vadd.f32 %v4480_v53, %v4475_v9 }
 0x7da   :  { %v4490_v19 = vpop.permute.xlu1 %4489  ;;  %v4487_v13 = vadd.f32 %v4486_v30, %v4481_v8  ;;  %v5233_v8 = vld [vmem:[%s7033_s5] ss:$0 sm:$0xff] }
 0x7db   :  { %v4492_v28 = vmul.f32 %v4490_v19, %v6690_v40 }
 0x7dd   :  { %v4493_v34 = vadd.f32 %v4492_v28, %v4487_v13 }
 0x7df   :  { %v4496_v38 = vpop.permute.xlu1 %4495 }
 0x7e0   :  { %v4498_v21 = vmul.f32 %v4496_v38, %v6696_v42  ;;  %v4538_v42 = vpop.permute.xlu0 %4537 }
 0x7e2   :  { %v4499_v7 = vadd.f32 %v4498_v21, %v4493_v34 }
 0x7e4   :  { %v4508_v4 = vpop.permute.xlu1 %4507  ;;  %v4505_v0 = vadd.f32 %v4504_v54, %v4499_v7  ;;  %v4556_v45 = vpop.permute.xlu0 %4555 }
 0x7e5   :  { %v4510_v60 = vmul.f32 %v4508_v4, %v6698_v33  ;;  %v4540_v33 = vmul.f32 %v4538_v42, %v6717_v39  ;;  %v4558_v15 = vmul.f32 %v4556_v45, %v6725_v44 }
 0x7e7   :  { %v4511_v41 = vadd.f32 %v4510_v60, %v4505_v0 }
 0x7e9   :  { %v4514_v31 = vpop.permute.xlu1 %4513 }
 0x7ea   :  { %v4516_v47 = vmul.f32 %v4514_v31, %v6704_v14 }
 0x7ec   :  { %v4517_v40 = vadd.f32 %v4516_v47, %v4511_v41 }
 0x7ee   :  { %v4526_v62 = vpop.permute.xlu1 %4525  ;;  %v4523_v48 = vadd.f32 %v4522_v61, %v4517_v40 }
 0x7ef   :  { %v4528_v58 = vmul.f32 %v4526_v62, %v6715_v49 }
 0x7f1   :  { %v4529_v25 = vadd.f32 %v4528_v58, %v4523_v48 }
 0x7f3   :  { %v4532_v63 = vpop.permute.xlu1 %4531 }
 0x7f4   :  { %v4534_v56 = vmul.f32 %v4532_v63, %v6713_v18 }
 0x7f6   :  { %v4535_v10 = vadd.f32 %v4534_v56, %v4529_v25 }
 0x7f8   :  { %v4544_v1 = vpop.permute.xlu1 %4543  ;;  %v4541_v23 = vadd.f32 %v4540_v33, %v4535_v10 }
 0x7f9   :  { %v4546_v14 = vmul.f32 %v4544_v1, %v6723_v20 }
 0x7fb   :  { %v4547_v16 = vadd.f32 %v4546_v14, %v4541_v23 }
 0x7fd   :  { %v4550_v59 = vpop.permute.xlu1 %4549 }
 0x7fe   :  { %v4552_v49 = vmul.f32 %v4550_v59, %v6729_v52  ;;  %v5220_v52 = vld [vmem:[%s7030_s0] ss:$0 sm:$0xff] }
 0x800   :  { %v4553_v24 = vadd.f32 %v4552_v49, %v4547_v16 }
 0x802   :  { %v4562_v35 = vpop.permute.xlu1 %4561  ;;  %v4559_v18 = vadd.f32 %v4558_v15, %v4553_v24 }
 0x803   :  { %v4564_v39 = vmul.f32 %v4562_v35, %v6732_v6 }
 0x805   :  { %v4565_v26 = vadd.f32 %v4564_v39, %v4559_v18 }
 0x807   :  { %v4573_v3 = vadd.f32 %v5219_v37, %v4565_v26 }
 0x809   :  { %v4574_v50 = vmax.f32 %v4573_v3, 0.0 }
 0x80b   :  { %v4575_v20 = vpack.c.bf16 %v4574_v50, %v4574_v50 }
 0x80d   :  { %5358 = vmatmul.mubr.bf16.vlgmr.msra.gmra.mxu1 %v4575_v20 }
 0x8cd   :  { %v4681_v44 = vpop.f32.mrf.mxu1 }
 0x8ce   :  { %v4682_v29 = vadd.f32 %v5220_v52, %v4681_v44 }
 0x8cf   :  { %v5359_v17 = vpop.f32.mrf.mxu1 }
 0x8d0   :  { %v4687_v46 = vpack.c.bf16 %v4682_v29, %v4682_v29 }
 0x8d1   :  { %v4684_v2 = vpop.f32.mrf.mxu1 }
 0x8d2   :  { %5366 = vmatmul.mubr.msk.bf16.vlgmr.msra.gmra.mxu0 %vm225_vm1, %v4687_v46 }
 0x8d3   :  { %v5360_v6 = vpop.f32.mrf.mxu1  ;;  %5370 = vmatpush3.bf16.msra.mxu0 %v5576_v51  ;;  %5373 = vmatprep.mubr.msk.bf16.mxu0 %vm5800_vm0, %v6977_v36 }
 0x8d4   :  { %5371 = vmatprep.subr.bf16.mxu0 %v6977_v36 }
 0x8d7   :  { %5372 = vmatpush3.bf16.msra.mxu0 %v5577_v27 }
 0x992   :  { %v4748_v12 = vpop.f32.mrf.mxu0 }
 0x993   :  { %v4749_v57 = vadd.f32 %v5229_v22, %v4748_v12 }
 0x994   :  { %v5367_v5 = vpop.f32.mrf.mxu0 }
 0x995   :  { %v4754_v55 = vmax.f32 %v4749_v57, 0.0 }
 0x996   :  { %v4751_v9 = vpop.f32.mrf.mxu0 }
 0x997   :  { %v4755_v53 = vpack.c.bf16 %v4754_v55, %v4754_v55 }
 0x998   :  { %v5368_v30 = vpop.f32.mrf.mxu0 }
 0x999   :  { %5374 = vmatmul.mubr.msk.bf16.vlgmr.msra.gmra.mxu0 %vm225_vm1, %v4755_v53 }
 0xa59   :  { %v4816_v19 = vpop.f32.mrf.mxu0 }
 0xa5a   :  { %v4817_v13 = vadd.f32 %v5233_v8, %v4816_v19 }
 0xa5b   :  { %v5375_v28 = vpop.f32.mrf.mxu0 }
 0xa5c   :  { %v4824_v32 = vsel %vm225_vm1, %v4817_v13, 0.0 }
 0xa5d   :  { %4825 = vadd.xlane.f32.xlu1 %v4824_v32  ;;  %v4819_v36 = vpop.f32.mrf.mxu0 }
 0xa5f   :  { %v5376_v38 = vpop.f32.mrf.mxu0 }
 0xae6   :  { %v4826_v34 = vpop.xlane.xlu1 %4825 }
 0xae7   :  { %v4827_v21 = vmul.f32 0.03125, %v4826_v34 }
 0xae9   :  { %v4828_v54 = vsub.f32 %v4817_v13, %v4827_v21 }
 0xaeb   :  { %v4829_v7 = vmul.f32 %v4828_v54, %v4828_v54 }
 0xaed   :  { %v4830_v4 = vsel %vm225_vm1, %v4829_v7, 0.0 }
 0xaee   :  { %4831 = vadd.xlane.f32.xlu0 %v4830_v4 }
 0xaef   :  { %5675 = shalt.err (!%p5672_p10)
}
 0xaf0   :  { %4871 = dma.vmem_to_hbm [thread:$0]  %s4869_s23, 128, %s6020_s17, [#allocation12]  }
 0xaf1   :  { %s5684_s20 = scalar_lea.vmem %s4879_s28, 128  ;;  %p5689_p12 = scmp.lt.s32.totalorder %s4879_s28, %s4879_s28 }
 0xaf2   :  { %p5685_p11 = scmp.ne.s32.totalorder %s4879_s28, %s5684_s20  ;;  %p5690_p13 = scmp.lt.s32.totalorder %s5684_s20, %s5684_s20 }
 0xaf4   :  { %p5691_p0 = por %p5690_p13, %p5689_p12 }
 0xaf6   :  { %p5692_p1 = pnand %p5691_p0, %p5685_p11 }
 0xaf8   :  { %5695 = shalt.err (!%p5692_p1)
}
 0xaf9   :  { %4881 = dma.vmem_to_hbm [thread:$0]  %s4879_s28, 128, %s6025_s6, [#allocation12]  }
 0xafa   :  { %s5835_s9 = smov [#allocation14]  }
 0xafb   :  { %s4888_s13 = sshll.u32 %s5835_s9, 4  ;;  %s4889_s13 = int_to_ptr.vmem [resolvable:$true] %s4888_s13 }
 0xafc   :  { %s5704_s21 = scalar_lea.vmem %s4889_s13, 128  ;;  %p5709_p3 = scmp.lt.s32.totalorder %s4889_s13, %s4889_s13 }
 0xafd   :  { %p5705_p2 = scmp.ne.s32.totalorder %s4889_s13, %s5704_s21  ;;  %p5710_p4 = scmp.lt.s32.totalorder %s5704_s21, %s5704_s21 }
 0xaff   :  { %p5711_p5 = por %p5710_p4, %p5709_p3 }
 0xb01   :  { %p5712_p6 = pnand %p5711_p5, %p5705_p2 }
 0xb03   :  { %5715 = shalt.err (!%p5712_p6)
}
 0xb04   :  { %s7034_s17 = sld [smem:[#allocation40_spill]]  ;;  %s5836_s6 = smov [#allocation10]  }
 0xb05   :  { %s7035_s25 = sld [smem:[#allocation41_spill]]  ;;  %s4858_s29 = sshll.u32 %s5836_s6, 4  ;;  %s4859_s29 = int_to_ptr.vmem [resolvable:$true] %s4858_s29 }
 0xb06   :  { %4891 = dma.vmem_to_hbm [thread:$0]  %s4889_s13, 128, %s6030_s14, [#allocation15]  }
 0xb07   :  { %s5724_s3 = scalar_lea.vmem %s4859_s29, 128  ;;  %p5729_p8 = scmp.lt.s32.totalorder %s4859_s29, %s4859_s29 }
 0xb08   :  { %p5725_p7 = scmp.ne.s32.totalorder %s4859_s29, %s5724_s3  ;;  %p5730_p9 = scmp.lt.s32.totalorder %s5724_s3, %s5724_s3 }
 0xb0a   :  { %v5237_v41 = vld [vmem:[%s7034_s17] ss:$0 sm:$0xff]  ;;  %p5731_p10 = por %p5730_p9, %p5729_p8 }
 0xb0b   :  { %v5238_v61 = vld [vmem:[%s7035_s25] ss:$0 sm:$0xff] }
 0xb0c   :  { %p5732_p11 = pnand %p5731_p10, %p5725_p7 }
 0xb77   :  { %v4832_v0 = vpop.xlane.xlu0 %4831 }
 0xb78   :  { %v4833_v60 = vmul.f32 0.03125, %v4832_v0 }
 0xb7a   :  { %v4834_v43 = vadd.f32 1e-05, %v4833_v60 }
 0xb7c   :  { %5590 = vrsqrt.f32 %v4834_v43 }
 0xb89   :  { %v5591_v31 = vpop.eup %5590 }
 0xb8a   :  { %v4836_v47 = vmul.f32 %v5591_v31, %v4828_v54 }
 0xb8c   :  { %v4843_v40 = vmul.f32 %v5237_v41, %v4836_v47 }
 0xb8e   :  { %v4850_v62 = vadd.f32 %v5238_v61, %v4843_v40 }
 0xb90   :  { %4851 = vst.msk [vmem:[#allocation10] sm:$0xff] %vm225_vm1, %v4850_v62 }
 0xb91   :  { %5735 = shalt.err (!%p5732_p11)
}
 0xb92   :  { %4861 = dma.vmem_to_hbm [thread:$0]  %s4859_s29, 128, %s6015_s12, [#allocation4]  }
 0xb93   :  { %5750 = dma.done.wait [#allocation4], 128  }
 0xb94   :  { %5751 = vsyncadd [#allocation4], 4294967168 }
 0xb95   :  { %5752 = dma.done.wait [#allocation12], 256  }
 0xb96   :  { %5753 = vsyncadd [#allocation12], 4294967040 }
 0xb97   :  { %5754 = dma.done.wait [#allocation15], 128  }
 0xb98   :  { %5755 = vsyncadd [#allocation15], 4294967168 }
 0xb99   :  { %4904 = vsyncpa [#allocation3], 1 }
 0xb9a   :  { %4905 = vsyncpa [#allocation8], 1 }
 0xb9b   :  { %4906 = vsyncpa [#allocation4], 1 }
 0xb9c   :  { %4907 = vsyncpa [#allocation12], 1 }
 0xb9d   :  { %4908 = vsyncpa [#allocation15], 1 }
 0xb9e   :  { %4909 = vsyncpa [#allocation5], 1 }

</bundles_post_ra>
